<compile_context>
chip_gen: v7x
topology: tpu7x:2x2x1
jax: 0.10.0
libtpu: 0.0.40
codegen_flags: <defaults>
</compile_context>

<pallas_src>
import functools

import jax
import jax.numpy as jnp
from jax.experimental import pallas as pl
from jax.experimental.pallas import tpu as pltpu

H_PAD = 128   # padded hidden size == per-gate lane width (one full lane block)
B_PAD = 8     # padded batch (one full sublane)


# ---------------------------------------------------------------------------
# Pallas kernel: fused 2-layer LSTM over the whole sequence.
# ---------------------------------------------------------------------------
def _lstm2_kernel(x_ref, wih0_ref, whh0_ref, b0_ref,
                  wih1_ref, whh1_ref, b1_ref,
                  y_ref, hn_ref, cn_ref,
                  xw_sc, y1_sc, *, seq_len, bp, hp):
    # x_ref    : (S*Bp, In_p)  time-major, batch/feature padded input
    # wih*_ref : (In_p, 4*Hp)  input->gate weights (transposed, gate-padded)
    # whh*_ref : (Hp,   4*Hp)  hidden->gate weights (transposed, gate-padded)
    # b*_ref   : (1,    4*Hp)  combined bias b_ih + b_hh (gate-padded)
    # y_ref    : (S*Bp, Hp)    layer-2 hidden outputs for all timesteps
    # hn_ref   : (2, Bp, Hp)   final hidden state per layer
    # cn_ref   : (2, Bp, Hp)   final cell state per layer
    # xw_sc    : (S*Bp, 4*Hp)  scratch: hoisted input projection (reused per layer)
    # y1_sc    : (S*Bp, Hp)    scratch: layer-1 outputs (stay in VMEM)
    S, Bp, Hp = seq_len, bp, hp

    def run_layer(xw_ref, whh, y_out_ref, layer):
        h = jnp.zeros((Bp, Hp), jnp.float32)
        c = jnp.zeros((Bp, Hp), jnp.float32)
        # S is a small static constant: fully unroll the recurrence so the
        # scheduler can interleave MXU/VPU/EUP work across timesteps.
        for t in range(S):
            r0, r1 = t * Bp, (t + 1) * Bp
            gates = xw_ref[r0:r1, :] + jnp.dot(
                h, whh, preferred_element_type=jnp.float32)       # (Bp, 4*Hp)
            i_g = jax.nn.sigmoid(gates[:, 0 * Hp:1 * Hp])
            f_g = jax.nn.sigmoid(gates[:, 1 * Hp:2 * Hp])
            g_g = jnp.tanh(gates[:, 2 * Hp:3 * Hp])
            o_g = jax.nn.sigmoid(gates[:, 3 * Hp:4 * Hp])
            c = f_g * c + i_g * g_g
            h = o_g * jnp.tanh(c)
            y_out_ref[r0:r1, :] = h
        hn_ref[layer] = h
        cn_ref[layer] = c

    # ---- layer 0: input projection (+bias) hoisted into one MXU matmul ----
    xw_sc[...] = jnp.dot(x_ref[...], wih0_ref[...],
                         preferred_element_type=jnp.float32) + b0_ref[...]
    run_layer(xw_sc, whh0_ref[...], y1_sc, 0)

    # ---- layer 1: projection of layer-1 outputs, again one matmul ----
    xw_sc[...] = jnp.dot(y1_sc[...], wih1_ref[...],
                         preferred_element_type=jnp.float32) + b1_ref[...]
    run_layer(xw_sc, whh1_ref[...], y_ref, 1)


# ---------------------------------------------------------------------------
# Host-side wrappers.
# ---------------------------------------------------------------------------
def prepare_lstm_params(params, hidden_size=50):
    """Transpose + gate-pad PyTorch-layout LSTM params once (cache the result)."""
    H, Hp = hidden_size, H_PAD
    packed = []
    for (w_ih, w_hh, b_ih, b_hh) in params:
        in_sz = w_ih.shape[1]
        wih_p = jnp.zeros((H_PAD, 4 * Hp), jnp.float32)
        whh_p = jnp.zeros((Hp, 4 * Hp), jnp.float32)
        b_p = jnp.zeros((1, 4 * Hp), jnp.float32)
        b = b_ih + b_hh
        for g in range(4):                       # PyTorch gate order [i, f, g, o]
            wih_p = wih_p.at[:in_sz, g * Hp:g * Hp + H].set(
                w_ih[g * H:(g + 1) * H, :].T)
            whh_p = whh_p.at[:H, g * Hp:g * Hp + H].set(
                w_hh[g * H:(g + 1) * H, :].T)
            b_p = b_p.at[0, g * Hp:g * Hp + H].set(b[g * H:(g + 1) * H])
        packed.append((wih_p, whh_p, b_p))
    return packed


def lstm_forward(x, packed_params, hidden_size=50):
    """x: (batch, seq, input) float32. Returns (output, (h_n, c_n)) like nn.LSTM."""
    B, S, In = x.shape
    H, Hp, Bp = hidden_size, H_PAD, B_PAD
    num_layers = len(packed_params)

    # time-major, pad batch to a full sublane and features to a full lane block
    x_tm = jnp.transpose(x, (1, 0, 2))                                  # (S, B, In)
    x_pad = jnp.zeros((S, Bp, Hp), jnp.float32).at[:, :B, :In].set(x_tm)
    x_flat = x_pad.reshape(S * Bp, Hp)

    (wih0, whh0, b0), (wih1, whh1, b1) = packed_params

    vmem = pl.BlockSpec(memory_space=pltpu.MemorySpace.VMEM)
    kernel = functools.partial(_lstm2_kernel, seq_len=S, bp=Bp, hp=Hp)
    y_flat, hn_pad, cn_pad = pl.pallas_call(
        kernel,
        out_shape=(
            jax.ShapeDtypeStruct((S * Bp, Hp), jnp.float32),
            jax.ShapeDtypeStruct((num_layers, Bp, Hp), jnp.float32),
            jax.ShapeDtypeStruct((num_layers, Bp, Hp), jnp.float32),
        ),
        in_specs=[vmem] * 7,
        out_specs=(vmem, vmem, vmem),
        scratch_shapes=[
            pltpu.VMEM((S * Bp, 4 * Hp), jnp.float32),   # hoisted input projection
            pltpu.VMEM((S * Bp, Hp), jnp.float32),       # layer-1 outputs
        ],
        compiler_params=pltpu.CompilerParams(vmem_limit_bytes=32 * 1024 * 1024),
    )(x_flat, wih0, whh0, b0, wih1, whh1, b1)

    y = y_flat.reshape(S, Bp, Hp)[:, :B, :H]             # (S, B, H)
    output = jnp.transpose(y, (1, 0, 2))                 # (B, S, H) batch_first
    h_n = hn_pad[:, :B, :H]                              # (num_layers, B, H)
    c_n = cn_pad[:, :B, :H]
    return output, (h_n, c_n)


# ---------------------------------------------------------------------------
# Param init (PyTorch-style) and pure-JAX reference.
# ---------------------------------------------------------------------------
def init_lstm_params(key, input_size=50, hidden_size=50, num_layers=2):
    k = 1.0 / jnp.sqrt(jnp.float32(hidden_size))
    params = []
    for layer in range(num_layers):
        in_sz = input_size if layer == 0 else hidden_size
        key, k1, k2, k3, k4 = jax.random.split(key, 5)
        w_ih = jax.random.uniform(k1, (4 * hidden_size, in_sz), jnp.float32, -k, k)
        w_hh = jax.random.uniform(k2, (4 * hidden_size, hidden_size), jnp.float32, -k, k)
        b_ih = jax.random.uniform(k3, (4 * hidden_size,), jnp.float32, -k, k)
        b_hh = jax.random.uniform(k4, (4 * hidden_size,), jnp.float32, -k, k)
        params.append((w_ih, w_hh, b_ih, b_hh))
    return params


def lstm_forward_ref(x, params):
    B, S, _ = x.shape
    layer_in = x
    h_finals, c_finals = [], []
    for (w_ih, w_hh, b_ih, b_hh) in params:
        H = w_hh.shape[1]
        h = jnp.zeros((B, H), jnp.float32)
        c = jnp.zeros((B, H), jnp.float32)
        ys = []
        for t in range(S):
            gates = layer_in[:, t, :] @ w_ih.T + h @ w_hh.T + b_ih + b_hh
            i_g = jax.nn.sigmoid(gates[:, 0 * H:1 * H])
            f_g = jax.nn.sigmoid(gates[:, 1 * H:2 * H])
            g_g = jnp.tanh(gates[:, 2 * H:3 * H])
            o_g = jax.nn.sigmoid(gates[:, 3 * H:4 * H])
            c = f_g * c + i_g * g_g
            h = o_g * jnp.tanh(c)
            ys.append(h)
        layer_in = jnp.stack(ys, axis=1)
        h_finals.append(h)
        c_finals.append(c)
    return layer_in, (jnp.stack(h_finals, 0), jnp.stack(c_finals, 0))


if __name__ == "__main__":
    key = jax.random.PRNGKey(0)
    key_x, key_p = jax.random.split(key)

    batch, seq, input_size, hidden_size = 2, 8, 50, 50
    x = jax.random.normal(key_x, (batch, seq, input_size), jnp.float32)
    params = init_lstm_params(key_p, input_size, hidden_size, num_layers=2)
    packed = prepare_lstm_params(params, hidden_size)   # one-time weight prep

    out, (h_n, c_n) = jax.jit(lstm_forward)(x, packed)
    jax.block_until_ready((out, h_n, c_n))

    ref_out, (ref_h, ref_c) = lstm_forward_ref(x, params)
    assert out.shape == (batch, seq, hidden_size)
    assert h_n.shape == (2, batch, hidden_size)
    assert c_n.shape == (2, batch, hidden_size)
    # Both kernel and reference use default MXU precision -> 1e-3 is a robust
    # (and still semantically meaningful) tolerance across TPU generations.
    assert jnp.allclose(out, ref_out, atol=1e-3, rtol=1e-3)
    assert jnp.allclose(h_n, ref_h, atol=1e-3, rtol=1e-3)
    assert jnp.allclose(c_n, ref_c, atol=1e-3, rtol=1e-3)

    print("KERNEL_OK")
</pallas_src>

<mosaic_0001>
module attributes {stable_mosaic.version = 11 : i64} {
  func.func @_lstm2_kernel(%arg0: memref<64x128xf32, #tpu.memory_space<vmem>>, %arg1: memref<128x512xf32, #tpu.memory_space<vmem>>, %arg2: memref<128x512xf32, #tpu.memory_space<vmem>>, %arg3: memref<1x512xf32, #tpu.memory_space<vmem>>, %arg4: memref<128x512xf32, #tpu.memory_space<vmem>>, %arg5: memref<128x512xf32, #tpu.memory_space<vmem>>, %arg6: memref<1x512xf32, #tpu.memory_space<vmem>>, %arg7: memref<64x128xf32, #tpu.memory_space<vmem>>, %arg8: memref<2x8x128xf32, #tpu.memory_space<vmem>>, %arg9: memref<2x8x128xf32, #tpu.memory_space<vmem>>, %arg10: memref<64x512xf32, #tpu.memory_space<vmem>>, %arg11: memref<64x128xf32, #tpu.memory_space<vmem>>) attributes {dimension_semantics = [], scalar_prefetch = 0 : i64, scratch_operands = 2 : i64, tpu.core_type = #tpu.core_type<tc>} {
    %c0 = arith.constant 0 : index
    %c0_0 = arith.constant 0 : index
    %0 = vector.load %arg0[%c0, %c0_0] : memref<64x128xf32, #tpu.memory_space<vmem>>, vector<64x128xf32>
    %c0_1 = arith.constant 0 : index
    %c0_2 = arith.constant 0 : index
    %1 = vector.load %arg1[%c0_1, %c0_2] : memref<128x512xf32, #tpu.memory_space<vmem>>, vector<128x512xf32>
    %cst = arith.constant dense<0.000000e+00> : vector<64x512xf32>
    %2 = tpu.matmul %0, %1, %cst {dimension_numbers = #tpu.dot_dimension_numbers<[1], [0], [0], [1], [0, 0, 1, 1], [], []>} : vector<64x128xf32>, vector<128x512xf32>, vector<64x512xf32> -> vector<64x512xf32>
    %c0_3 = arith.constant 0 : index
    %c0_4 = arith.constant 0 : index
    %3 = vector.load %arg3[%c0_3, %c0_4] : memref<1x512xf32, #tpu.memory_space<vmem>>, vector<1x512xf32>
    %4 = vector.broadcast %3 : vector<1x512xf32> to vector<64x512xf32>
    %5 = arith.addf %2, %4 : vector<64x512xf32>
    %c0_5 = arith.constant 0 : index
    %c0_6 = arith.constant 0 : index
    %6 = vector.load %arg10[%c0_5, %c0_6] : memref<64x512xf32, #tpu.memory_space<vmem>>, vector<64x512xf32>
    tpu.vector_store %arg10[%c0_5, %c0_6], %5 {strides = array<i32>} : memref<64x512xf32, #tpu.memory_space<vmem>>, vector<64x512xf32>,
    %c0_7 = arith.constant 0 : index
    %c0_8 = arith.constant 0 : index
    %7 = vector.load %arg2[%c0_7, %c0_8] : memref<128x512xf32, #tpu.memory_space<vmem>>, vector<128x512xf32>
    %cst_9 = arith.constant 0.000000e+00 : f32
    %8 = vector.broadcast %cst_9 : f32 to vector<8x128xf32>
    %cst_10 = arith.constant 0.000000e+00 : f32
    %9 = vector.broadcast %cst_10 : f32 to vector<8x128xf32>
    %c0_11 = arith.constant 0 : index
    %c0_12 = arith.constant 0 : index
    %10 = vector.load %arg10[%c0_11, %c0_12] : memref<64x512xf32, #tpu.memory_space<vmem>>, vector<8x512xf32>
    %cst_13 = arith.constant dense<0.000000e+00> : vector<8x512xf32>
    %11 = tpu.matmul %8, %7, %cst_13 {dimension_numbers = #tpu.dot_dimension_numbers<[1], [0], [0], [1], [0, 0, 1, 1], [], []>} : vector<8x128xf32>, vector<128x512xf32>, vector<8x512xf32> -> vector<8x512xf32>
    %12 = arith.addf %10, %11 : vector<8x512xf32>
    %13 = vector.extract_strided_slice %12 {offsets = [0, 0], sizes = [8, 128], strides = [1, 1]} : vector<8x512xf32> to vector<8x128xf32>
    %14 = arith.negf %13 : vector<8x128xf32>
    %15 = math.exp %14 : vector<8x128xf32>
    %cst_14 = arith.constant 1.000000e+00 : f32
    %16 = vector.broadcast %cst_14 : f32 to vector<8x128xf32>
    %17 = arith.addf %16, %15 : vector<8x128xf32>
    %18 = arith.divf %16, %17 : vector<8x128xf32>
    %19 = vector.extract_strided_slice %12 {offsets = [0, 128], sizes = [8, 128], strides = [1, 1]} : vector<8x512xf32> to vector<8x128xf32>
    %20 = arith.negf %19 : vector<8x128xf32>
    %21 = math.exp %20 : vector<8x128xf32>
    %cst_15 = arith.constant 1.000000e+00 : f32
    %22 = vector.broadcast %cst_15 : f32 to vector<8x128xf32>
    %23 = arith.addf %22, %21 : vector<8x128xf32>
    %24 = arith.divf %22, %23 : vector<8x128xf32>
    %25 = vector.extract_strided_slice %12 {offsets = [0, 256], sizes = [8, 128], strides = [1, 1]} : vector<8x512xf32> to vector<8x128xf32>
    %26 = math.tanh %25 : vector<8x128xf32>
    %27 = vector.extract_strided_slice %12 {offsets = [0, 384], sizes = [8, 128], strides = [1, 1]} : vector<8x512xf32> to vector<8x128xf32>
    %28 = arith.negf %27 : vector<8x128xf32>
    %29 = math.exp %28 : vector<8x128xf32>
    %cst_16 = arith.constant 1.000000e+00 : f32
    %30 = vector.broadcast %cst_16 : f32 to vector<8x128xf32>
    %31 = arith.addf %30, %29 : vector<8x128xf32>
    %32 = arith.divf %30, %31 : vector<8x128xf32>
    %33 = arith.mulf %24, %9 : vector<8x128xf32>
    %34 = arith.mulf %18, %26 : vector<8x128xf32>
    %35 = arith.addf %33, %34 : vector<8x128xf32>
    %36 = math.tanh %35 : vector<8x128xf32>
    %37 = arith.mulf %32, %36 : vector<8x128xf32>
    %c0_17 = arith.constant 0 : index
    %c0_18 = arith.constant 0 : index
    %38 = vector.load %arg11[%c0_17, %c0_18] : memref<64x128xf32, #tpu.memory_space<vmem>>, vector<8x128xf32>
    tpu.vector_store %arg11[%c0_17, %c0_18], %37 {strides = array<i32>} : memref<64x128xf32, #tpu.memory_space<vmem>>, vector<8x128xf32>,
    %c8 = arith.constant 8 : index
    %c0_19 = arith.constant 0 : index
    %39 = vector.load %arg10[%c8, %c0_19] : memref<64x512xf32, #tpu.memory_space<vmem>>, vector<8x512xf32>
    %cst_20 = arith.constant dense<0.000000e+00> : vector<8x512xf32>
    %40 = tpu.matmul %37, %7, %cst_20 {dimension_numbers = #tpu.dot_dimension_numbers<[1], [0], [0], [1], [0, 0, 1, 1], [], []>} : vector<8x128xf32>, vector<128x512xf32>, vector<8x512xf32> -> vector<8x512xf32>
    %41 = arith.addf %39, %40 : vector<8x512xf32>
    %42 = vector.extract_strided_slice %41 {offsets = [0, 0], sizes = [8, 128], strides = [1, 1]} : vector<8x512xf32> to vector<8x128xf32>
    %43 = arith.negf %42 : vector<8x128xf32>
    %44 = math.exp %43 : vector<8x128xf32>
    %cst_21 = arith.constant 1.000000e+00 : f32
    %45 = vector.broadcast %cst_21 : f32 to vector<8x128xf32>
    %46 = arith.addf %45, %44 : vector<8x128xf32>
    %47 = arith.divf %45, %46 : vector<8x128xf32>
    %48 = vector.extract_strided_slice %41 {offsets = [0, 128], sizes = [8, 128], strides = [1, 1]} : vector<8x512xf32> to vector<8x128xf32>
    %49 = arith.negf %48 : vector<8x128xf32>
    %50 = math.exp %49 : vector<8x128xf32>
    %cst_22 = arith.constant 1.000000e+00 : f32
    %51 = vector.broadcast %cst_22 : f32 to vector<8x128xf32>
    %52 = arith.addf %51, %50 : vector<8x128xf32>
    %53 = arith.divf %51, %52 : vector<8x128xf32>
    %54 = vector.extract_strided_slice %41 {offsets = [0, 256], sizes = [8, 128], strides = [1, 1]} : vector<8x512xf32> to vector<8x128xf32>
    %55 = math.tanh %54 : vector<8x128xf32>
    %56 = vector.extract_strided_slice %41 {offsets = [0, 384], sizes = [8, 128], strides = [1, 1]} : vector<8x512xf32> to vector<8x128xf32>
    %57 = arith.negf %56 : vector<8x128xf32>
    %58 = math.exp %57 : vector<8x128xf32>
    %cst_23 = arith.constant 1.000000e+00 : f32
    %59 = vector.broadcast %cst_23 : f32 to vector<8x128xf32>
    %60 = arith.addf %59, %58 : vector<8x128xf32>
    %61 = arith.divf %59, %60 : vector<8x128xf32>
    %62 = arith.mulf %53, %35 : vector<8x128xf32>
    %63 = arith.mulf %47, %55 : vector<8x128xf32>
    %64 = arith.addf %62, %63 : vector<8x128xf32>
    %65 = math.tanh %64 : vector<8x128xf32>
    %66 = arith.mulf %61, %65 : vector<8x128xf32>
    %c8_24 = arith.constant 8 : index
    %c0_25 = arith.constant 0 : index
    %67 = vector.load %arg11[%c8_24, %c0_25] : memref<64x128xf32, #tpu.memory_space<vmem>>, vector<8x128xf32>
    tpu.vector_store %arg11[%c8_24, %c0_25], %66 {strides = array<i32>} : memref<64x128xf32, #tpu.memory_space<vmem>>, vector<8x128xf32>,
    %c16 = arith.constant 16 : index
    %c0_26 = arith.constant 0 : index
    %68 = vector.load %arg10[%c16, %c0_26] : memref<64x512xf32, #tpu.memory_space<vmem>>, vector<8x512xf32>
    %cst_27 = arith.constant dense<0.000000e+00> : vector<8x512xf32>
    %69 = tpu.matmul %66, %7, %cst_27 {dimension_numbers = #tpu.dot_dimension_numbers<[1], [0], [0], [1], [0, 0, 1, 1], [], []>} : vector<8x128xf32>, vector<128x512xf32>, vector<8x512xf32> -> vector<8x512xf32>
    %70 = arith.addf %68, %69 : vector<8x512xf32>
    %71 = vector.extract_strided_slice %70 {offsets = [0, 0], sizes = [8, 128], strides = [1, 1]} : vector<8x512xf32> to vector<8x128xf32>
    %72 = arith.negf %71 : vector<8x128xf32>
    %73 = math.exp %72 : vector<8x128xf32>
    %cst_28 = arith.constant 1.000000e+00 : f32
    %74 = vector.broadcast %cst_28 : f32 to vector<8x128xf32>
    %75 = arith.addf %74, %73 : vector<8x128xf32>
    %76 = arith.divf %74, %75 : vector<8x128xf32>
    %77 = vector.extract_strided_slice %70 {offsets = [0, 128], sizes = [8, 128], strides = [1, 1]} : vector<8x512xf32> to vector<8x128xf32>
    %78 = arith.negf %77 : vector<8x128xf32>
    %79 = math.exp %78 : vector<8x128xf32>
    %cst_29 = arith.constant 1.000000e+00 : f32
    %80 = vector.broadcast %cst_29 : f32 to vector<8x128xf32>
    %81 = arith.addf %80, %79 : vector<8x128xf32>
    %82 = arith.divf %80, %81 : vector<8x128xf32>
    %83 = vector.extract_strided_slice %70 {offsets = [0, 256], sizes = [8, 128], strides = [1, 1]} : vector<8x512xf32> to vector<8x128xf32>
    %84 = math.tanh %83 : vector<8x128xf32>
    %85 = vector.extract_strided_slice %70 {offsets = [0, 384], sizes = [8, 128], strides = [1, 1]} : vector<8x512xf32> to vector<8x128xf32>
    %86 = arith.negf %85 : vector<8x128xf32>
    %87 = math.exp %86 : vector<8x128xf32>
    %cst_30 = arith.constant 1.000000e+00 : f32
    %88 = vector.broadcast %cst_30 : f32 to vector<8x128xf32>
    %89 = arith.addf %88, %87 : vector<8x128xf32>
    %90 = arith.divf %88, %89 : vector<8x128xf32>
    %91 = arith.mulf %82, %64 : vector<8x128xf32>
    %92 = arith.mulf %76, %84 : vector<8x128xf32>
    %93 = arith.addf %91, %92 : vector<8x128xf32>
    %94 = math.tanh %93 : vector<8x128xf32>
    %95 = arith.mulf %90, %94 : vector<8x128xf32>
    %c16_31 = arith.constant 16 : index
    %c0_32 = arith.constant 0 : index
    %96 = vector.load %arg11[%c16_31, %c0_32] : memref<64x128xf32, #tpu.memory_space<vmem>>, vector<8x128xf32>
    tpu.vector_store %arg11[%c16_31, %c0_32], %95 {strides = array<i32>} : memref<64x128xf32, #tpu.memory_space<vmem>>, vector<8x128xf32>,
    %c24 = arith.constant 24 : index
    %c0_33 = arith.constant 0 : index
    %97 = vector.load %arg10[%c24, %c0_33] : memref<64x512xf32, #tpu.memory_space<vmem>>, vector<8x512xf32>
    %cst_34 = arith.constant dense<0.000000e+00> : vector<8x512xf32>
    %98 = tpu.matmul %95, %7, %cst_34 {dimension_numbers = #tpu.dot_dimension_numbers<[1], [0], [0], [1], [0, 0, 1, 1], [], []>} : vector<8x128xf32>, vector<128x512xf32>, vector<8x512xf32> -> vector<8x512xf32>
    %99 = arith.addf %97, %98 : vector<8x512xf32>
    %100 = vector.extract_strided_slice %99 {offsets = [0, 0], sizes = [8, 128], strides = [1, 1]} : vector<8x512xf32> to vector<8x128xf32>
    %101 = arith.negf %100 : vector<8x128xf32>
    %102 = math.exp %101 : vector<8x128xf32>
    %cst_35 = arith.constant 1.000000e+00 : f32
    %103 = vector.broadcast %cst_35 : f32 to vector<8x128xf32>
    %104 = arith.addf %103, %102 : vector<8x128xf32>
    %105 = arith.divf %103, %104 : vector<8x128xf32>
    %106 = vector.extract_strided_slice %99 {offsets = [0, 128], sizes = [8, 128], strides = [1, 1]} : vector<8x512xf32> to vector<8x128xf32>
    %107 = arith.negf %106 : vector<8x128xf32>
    %108 = math.exp %107 : vector<8x128xf32>
    %cst_36 = arith.constant 1.000000e+00 : f32
    %109 = vector.broadcast %cst_36 : f32 to vector<8x128xf32>
    %110 = arith.addf %109, %108 : vector<8x128xf32>
    %111 = arith.divf %109, %110 : vector<8x128xf32>
    %112 = vector.extract_strided_slice %99 {offsets = [0, 256], sizes = [8, 128], strides = [1, 1]} : vector<8x512xf32> to vector<8x128xf32>
    %113 = math.tanh %112 : vector<8x128xf32>
    %114 = vector.extract_strided_slice %99 {offsets = [0, 384], sizes = [8, 128], strides = [1, 1]} : vector<8x512xf32> to vector<8x128xf32>
    %115 = arith.negf %114 : vector<8x128xf32>
    %116 = math.exp %115 : vector<8x128xf32>
    %cst_37 = arith.constant 1.000000e+00 : f32
    %117 = vector.broadcast %cst_37 : f32 to vector<8x128xf32>
    %118 = arith.addf %117, %116 : vector<8x128xf32>
    %119 = arith.divf %117, %118 : vector<8x128xf32>
    %120 = arith.mulf %111, %93 : vector<8x128xf32>
    %121 = arith.mulf %105, %113 : vector<8x128xf32>
    %122 = arith.addf %120, %121 : vector<8x128xf32>
    %123 = math.tanh %122 : vector<8x128xf32>
    %124 = arith.mulf %119, %123 : vector<8x128xf32>
    %c24_38 = arith.constant 24 : index
    %c0_39 = arith.constant 0 : index
    %125 = vector.load %arg11[%c24_38, %c0_39] : memref<64x128xf32, #tpu.memory_space<vmem>>, vector<8x128xf32>
    tpu.vector_store %arg11[%c24_38, %c0_39], %124 {strides = array<i32>} : memref<64x128xf32, #tpu.memory_space<vmem>>, vector<8x128xf32>,
    %c32 = arith.constant 32 : index
    %c0_40 = arith.constant 0 : index
    %126 = vector.load %arg10[%c32, %c0_40] : memref<64x512xf32, #tpu.memory_space<vmem>>, vector<8x512xf32>
    %cst_41 = arith.constant dense<0.000000e+00> : vector<8x512xf32>
    %127 = tpu.matmul %124, %7, %cst_41 {dimension_numbers = #tpu.dot_dimension_numbers<[1], [0], [0], [1], [0, 0, 1, 1], [], []>} : vector<8x128xf32>, vector<128x512xf32>, vector<8x512xf32> -> vector<8x512xf32>
    %128 = arith.addf %126, %127 : vector<8x512xf32>
    %129 = vector.extract_strided_slice %128 {offsets = [0, 0], sizes = [8, 128], strides = [1, 1]} : vector<8x512xf32> to vector<8x128xf32>
    %130 = arith.negf %129 : vector<8x128xf32>
    %131 = math.exp %130 : vector<8x128xf32>
    %cst_42 = arith.constant 1.000000e+00 : f32
    %132 = vector.broadcast %cst_42 : f32 to vector<8x128xf32>
    %133 = arith.addf %132, %131 : vector<8x128xf32>
    %134 = arith.divf %132, %133 : vector<8x128xf32>
    %135 = vector.extract_strided_slice %128 {offsets = [0, 128], sizes = [8, 128], strides = [1, 1]} : vector<8x512xf32> to vector<8x128xf32>
    %136 = arith.negf %135 : vector<8x128xf32>
    %137 = math.exp %136 : vector<8x128xf32>
    %cst_43 = arith.constant 1.000000e+00 : f32
    %138 = vector.broadcast %cst_43 : f32 to vector<8x128xf32>
    %139 = arith.addf %138, %137 : vector<8x128xf32>
    %140 = arith.divf %138, %139 : vector<8x128xf32>
    %141 = vector.extract_strided_slice %128 {offsets = [0, 256], sizes = [8, 128], strides = [1, 1]} : vector<8x512xf32> to vector<8x128xf32>
    %142 = math.tanh %141 : vector<8x128xf32>
    %143 = vector.extract_strided_slice %128 {offsets = [0, 384], sizes = [8, 128], strides = [1, 1]} : vector<8x512xf32> to vector<8x128xf32>
    %144 = arith.negf %143 : vector<8x128xf32>
    %145 = math.exp %144 : vector<8x128xf32>
    %cst_44 = arith.constant 1.000000e+00 : f32
    %146 = vector.broadcast %cst_44 : f32 to vector<8x128xf32>
    %147 = arith.addf %146, %145 : vector<8x128xf32>
    %148 = arith.divf %146, %147 : vector<8x128xf32>
    %149 = arith.mulf %140, %122 : vector<8x128xf32>
    %150 = arith.mulf %134, %142 : vector<8x128xf32>
    %151 = arith.addf %149, %150 : vector<8x128xf32>
    %152 = math.tanh %151 : vector<8x128xf32>
    %153 = arith.mulf %148, %152 : vector<8x128xf32>
    %c32_45 = arith.constant 32 : index
    %c0_46 = arith.constant 0 : index
    %154 = vector.load %arg11[%c32_45, %c0_46] : memref<64x128xf32, #tpu.memory_space<vmem>>, vector<8x128xf32>
    tpu.vector_store %arg11[%c32_45, %c0_46], %153 {strides = array<i32>} : memref<64x128xf32, #tpu.memory_space<vmem>>, vector<8x128xf32>,
    %c40 = arith.constant 40 : index
    %c0_47 = arith.constant 0 : index
    %155 = vector.load %arg10[%c40, %c0_47] : memref<64x512xf32, #tpu.memory_space<vmem>>, vector<8x512xf32>
    %cst_48 = arith.constant dense<0.000000e+00> : vector<8x512xf32>
    %156 = tpu.matmul %153, %7, %cst_48 {dimension_numbers = #tpu.dot_dimension_numbers<[1], [0], [0], [1], [0, 0, 1, 1], [], []>} : vector<8x128xf32>, vector<128x512xf32>, vector<8x512xf32> -> vector<8x512xf32>
    %157 = arith.addf %155, %156 : vector<8x512xf32>
    %158 = vector.extract_strided_slice %157 {offsets = [0, 0], sizes = [8, 128], strides = [1, 1]} : vector<8x512xf32> to vector<8x128xf32>
    %159 = arith.negf %158 : vector<8x128xf32>
    %160 = math.exp %159 : vector<8x128xf32>
    %cst_49 = arith.constant 1.000000e+00 : f32
    %161 = vector.broadcast %cst_49 : f32 to vector<8x128xf32>
    %162 = arith.addf %161, %160 : vector<8x128xf32>
    %163 = arith.divf %161, %162 : vector<8x128xf32>
    %164 = vector.extract_strided_slice %157 {offsets = [0, 128], sizes = [8, 128], strides = [1, 1]} : vector<8x512xf32> to vector<8x128xf32>
    %165 = arith.negf %164 : vector<8x128xf32>
    %166 = math.exp %165 : vector<8x128xf32>
    %cst_50 = arith.constant 1.000000e+00 : f32
    %167 = vector.broadcast %cst_50 : f32 to vector<8x128xf32>
    %168 = arith.addf %167, %166 : vector<8x128xf32>
    %169 = arith.divf %167, %168 : vector<8x128xf32>
    %170 = vector.extract_strided_slice %157 {offsets = [0, 256], sizes = [8, 128], strides = [1, 1]} : vector<8x512xf32> to vector<8x128xf32>
    %171 = math.tanh %170 : vector<8x128xf32>
    %172 = vector.extract_strided_slice %157 {offsets = [0, 384], sizes = [8, 128], strides = [1, 1]} : vector<8x512xf32> to vector<8x128xf32>
    %173 = arith.negf %172 : vector<8x128xf32>
    %174 = math.exp %173 : vector<8x128xf32>
    %cst_51 = arith.constant 1.000000e+00 : f32
    %175 = vector.broadcast %cst_51 : f32 to vector<8x128xf32>
    %176 = arith.addf %175, %174 : vector<8x128xf32>
    %177 = arith.divf %175, %176 : vector<8x128xf32>
    %178 = arith.mulf %169, %151 : vector<8x128xf32>
    %179 = arith.mulf %163, %171 : vector<8x128xf32>
    %180 = arith.addf %178, %179 : vector<8x128xf32>
    %181 = math.tanh %180 : vector<8x128xf32>
    %182 = arith.mulf %177, %181 : vector<8x128xf32>
    %c40_52 = arith.constant 40 : index
    %c0_53 = arith.constant 0 : index
    %183 = vector.load %arg11[%c40_52, %c0_53] : memref<64x128xf32, #tpu.memory_space<vmem>>, vector<8x128xf32>
    tpu.vector_store %arg11[%c40_52, %c0_53], %182 {strides = array<i32>} : memref<64x128xf32, #tpu.memory_space<vmem>>, vector<8x128xf32>,
    %c48 = arith.constant 48 : index
    %c0_54 = arith.constant 0 : index
    %184 = vector.load %arg10[%c48, %c0_54] : memref<64x512xf32, #tpu.memory_space<vmem>>, vector<8x512xf32>
    %cst_55 = arith.constant dense<0.000000e+00> : vector<8x512xf32>
    %185 = tpu.matmul %182, %7, %cst_55 {dimension_numbers = #tpu.dot_dimension_numbers<[1], [0], [0], [1], [0, 0, 1, 1], [], []>} : vector<8x128xf32>, vector<128x512xf32>, vector<8x512xf32> -> vector<8x512xf32>
    %186 = arith.addf %184, %185 : vector<8x512xf32>
    %187 = vector.extract_strided_slice %186 {offsets = [0, 0], sizes = [8, 128], strides = [1, 1]} : vector<8x512xf32> to vector<8x128xf32>
    %188 = arith.negf %187 : vector<8x128xf32>
    %189 = math.exp %188 : vector<8x128xf32>
    %cst_56 = arith.constant 1.000000e+00 : f32
    %190 = vector.broadcast %cst_56 : f32 to vector<8x128xf32>
    %191 = arith.addf %190, %189 : vector<8x128xf32>
    %192 = arith.divf %190, %191 : vector<8x128xf32>
    %193 = vector.extract_strided_slice %186 {offsets = [0, 128], sizes = [8, 128], strides = [1, 1]} : vector<8x512xf32> to vector<8x128xf32>
    %194 = arith.negf %193 : vector<8x128xf32>
    %195 = math.exp %194 : vector<8x128xf32>
    %cst_57 = arith.constant 1.000000e+00 : f32
    %196 = vector.broadcast %cst_57 : f32 to vector<8x128xf32>
    %197 = arith.addf %196, %195 : vector<8x128xf32>
    %198 = arith.divf %196, %197 : vector<8x128xf32>
    %199 = vector.extract_strided_slice %186 {offsets = [0, 256], sizes = [8, 128], strides = [1, 1]} : vector<8x512xf32> to vector<8x128xf32>
    %200 = math.tanh %199 : vector<8x128xf32>
    %201 = vector.extract_strided_slice %186 {offsets = [0, 384], sizes = [8, 128], strides = [1, 1]} : vector<8x512xf32> to vector<8x128xf32>
    %202 = arith.negf %201 : vector<8x128xf32>
    %203 = math.exp %202 : vector<8x128xf32>
    %cst_58 = arith.constant 1.000000e+00 : f32
    %204 = vector.broadcast %cst_58 : f32 to vector<8x128xf32>
    %205 = arith.addf %204, %203 : vector<8x128xf32>
    %206 = arith.divf %204, %205 : vector<8x128xf32>
    %207 = arith.mulf %198, %180 : vector<8x128xf32>
    %208 = arith.mulf %192, %200 : vector<8x128xf32>
    %209 = arith.addf %207, %208 : vector<8x128xf32>
    %210 = math.tanh %209 : vector<8x128xf32>
    %211 = arith.mulf %206, %210 : vector<8x128xf32>
    %c48_59 = arith.constant 48 : index
    %c0_60 = arith.constant 0 : index
    %212 = vector.load %arg11[%c48_59, %c0_60] : memref<64x128xf32, #tpu.memory_space<vmem>>, vector<8x128xf32>
    tpu.vector_store %arg11[%c48_59, %c0_60], %211 {strides = array<i32>} : memref<64x128xf32, #tpu.memory_space<vmem>>, vector<8x128xf32>,
    %c56 = arith.constant 56 : index
    %c0_61 = arith.constant 0 : index
    %213 = vector.load %arg10[%c56, %c0_61] : memref<64x512xf32, #tpu.memory_space<vmem>>, vector<8x512xf32>
    %cst_62 = arith.constant dense<0.000000e+00> : vector<8x512xf32>
    %214 = tpu.matmul %211, %7, %cst_62 {dimension_numbers = #tpu.dot_dimension_numbers<[1], [0], [0], [1], [0, 0, 1, 1], [], []>} : vector<8x128xf32>, vector<128x512xf32>, vector<8x512xf32> -> vector<8x512xf32>
    %215 = arith.addf %213, %214 : vector<8x512xf32>
    %216 = vector.extract_strided_slice %215 {offsets = [0, 0], sizes = [8, 128], strides = [1, 1]} : vector<8x512xf32> to vector<8x128xf32>
    %217 = arith.negf %216 : vector<8x128xf32>
    %218 = math.exp %217 : vector<8x128xf32>
    %cst_63 = arith.constant 1.000000e+00 : f32
    %219 = vector.broadcast %cst_63 : f32 to vector<8x128xf32>
    %220 = arith.addf %219, %218 : vector<8x128xf32>
    %221 = arith.divf %219, %220 : vector<8x128xf32>
    %222 = vector.extract_strided_slice %215 {offsets = [0, 128], sizes = [8, 128], strides = [1, 1]} : vector<8x512xf32> to vector<8x128xf32>
    %223 = arith.negf %222 : vector<8x128xf32>
    %224 = math.exp %223 : vector<8x128xf32>
    %cst_64 = arith.constant 1.000000e+00 : f32
    %225 = vector.broadcast %cst_64 : f32 to vector<8x128xf32>
    %226 = arith.addf %225, %224 : vector<8x128xf32>
    %227 = arith.divf %225, %226 : vector<8x128xf32>
    %228 = vector.extract_strided_slice %215 {offsets = [0, 256], sizes = [8, 128], strides = [1, 1]} : vector<8x512xf32> to vector<8x128xf32>
    %229 = math.tanh %228 : vector<8x128xf32>
    %230 = vector.extract_strided_slice %215 {offsets = [0, 384], sizes = [8, 128], strides = [1, 1]} : vector<8x512xf32> to vector<8x128xf32>
    %231 = arith.negf %230 : vector<8x128xf32>
    %232 = math.exp %231 : vector<8x128xf32>
    %cst_65 = arith.constant 1.000000e+00 : f32
    %233 = vector.broadcast %cst_65 : f32 to vector<8x128xf32>
    %234 = arith.addf %233, %232 : vector<8x128xf32>
    %235 = arith.divf %233, %234 : vector<8x128xf32>
    %236 = arith.mulf %227, %209 : vector<8x128xf32>
    %237 = arith.mulf %221, %229 : vector<8x128xf32>
    %238 = arith.addf %236, %237 : vector<8x128xf32>
    %239 = math.tanh %238 : vector<8x128xf32>
    %240 = arith.mulf %235, %239 : vector<8x128xf32>
    %c56_66 = arith.constant 56 : index
    %c0_67 = arith.constant 0 : index
    %241 = vector.load %arg11[%c56_66, %c0_67] : memref<64x128xf32, #tpu.memory_space<vmem>>, vector<8x128xf32>
    tpu.vector_store %arg11[%c56_66, %c0_67], %240 {strides = array<i32>} : memref<64x128xf32, #tpu.memory_space<vmem>>, vector<8x128xf32>,
    %c0_68 = arith.constant 0 : index
    %c0_69 = arith.constant 0 : index
    %c0_70 = arith.constant 0 : index
    %242 = vector.load %arg8[%c0_68, %c0_69, %c0_70] : memref<2x8x128xf32, #tpu.memory_space<vmem>>, vector<1x8x128xf32>
    %243 = vector.shape_cast %242 : vector<1x8x128xf32> to vector<8x128xf32>
    %244 = vector.shape_cast %240 : vector<8x128xf32> to vector<1x8x128xf32>
    tpu.vector_store %arg8[%c0_68, %c0_69, %c0_70], %244 {strides = array<i32>} : memref<2x8x128xf32, #tpu.memory_space<vmem>>, vector<1x8x128xf32>,
    %c0_71 = arith.constant 0 : index
    %c0_72 = arith.constant 0 : index
    %c0_73 = arith.constant 0 : index
    %245 = vector.load %arg9[%c0_71, %c0_72, %c0_73] : memref<2x8x128xf32, #tpu.memory_space<vmem>>, vector<1x8x128xf32>
    %246 = vector.shape_cast %245 : vector<1x8x128xf32> to vector<8x128xf32>
    %247 = vector.shape_cast %238 : vector<8x128xf32> to vector<1x8x128xf32>
    tpu.vector_store %arg9[%c0_71, %c0_72, %c0_73], %247 {strides = array<i32>} : memref<2x8x128xf32, #tpu.memory_space<vmem>>, vector<1x8x128xf32>,
    %c0_74 = arith.constant 0 : index
    %c0_75 = arith.constant 0 : index
    %248 = vector.load %arg11[%c0_74, %c0_75] : memref<64x128xf32, #tpu.memory_space<vmem>>, vector<64x128xf32>
    %c0_76 = arith.constant 0 : index
    %c0_77 = arith.constant 0 : index
    %249 = vector.load %arg4[%c0_76, %c0_77] : memref<128x512xf32, #tpu.memory_space<vmem>>, vector<128x512xf32>
    %cst_78 = arith.constant dense<0.000000e+00> : vector<64x512xf32>
    %250 = tpu.matmul %248, %249, %cst_78 {dimension_numbers = #tpu.dot_dimension_numbers<[1], [0], [0], [1], [0, 0, 1, 1], [], []>} : vector<64x128xf32>, vector<128x512xf32>, vector<64x512xf32> -> vector<64x512xf32>
    %c0_79 = arith.constant 0 : index
    %c0_80 = arith.constant 0 : index
    %251 = vector.load %arg6[%c0_79, %c0_80] : memref<1x512xf32, #tpu.memory_space<vmem>>, vector<1x512xf32>
    %252 = vector.broadcast %251 : vector<1x512xf32> to vector<64x512xf32>
    %253 = arith.addf %250, %252 : vector<64x512xf32>
    %c0_81 = arith.constant 0 : index
    %c0_82 = arith.constant 0 : index
    %254 = vector.load %arg10[%c0_81, %c0_82] : memref<64x512xf32, #tpu.memory_space<vmem>>, vector<64x512xf32>
    tpu.vector_store %arg10[%c0_81, %c0_82], %253 {strides = array<i32>} : memref<64x512xf32, #tpu.memory_space<vmem>>, vector<64x512xf32>,
    %c0_83 = arith.constant 0 : index
    %c0_84 = arith.constant 0 : index
    %255 = vector.load %arg5[%c0_83, %c0_84] : memref<128x512xf32, #tpu.memory_space<vmem>>, vector<128x512xf32>
    %cst_85 = arith.constant 0.000000e+00 : f32
    %256 = vector.broadcast %cst_85 : f32 to vector<8x128xf32>
    %cst_86 = arith.constant 0.000000e+00 : f32
    %257 = vector.broadcast %cst_86 : f32 to vector<8x128xf32>
    %c0_87 = arith.constant 0 : index
    %c0_88 = arith.constant 0 : index
    %258 = vector.load %arg10[%c0_87, %c0_88] : memref<64x512xf32, #tpu.memory_space<vmem>>, vector<8x512xf32>
    %cst_89 = arith.constant dense<0.000000e+00> : vector<8x512xf32>
    %259 = tpu.matmul %256, %255, %cst_89 {dimension_numbers = #tpu.dot_dimension_numbers<[1], [0], [0], [1], [0, 0, 1, 1], [], []>} : vector<8x128xf32>, vector<128x512xf32>, vector<8x512xf32> -> vector<8x512xf32>
    %260 = arith.addf %258, %259 : vector<8x512xf32>
    %261 = vector.extract_strided_slice %260 {offsets = [0, 0], sizes = [8, 128], strides = [1, 1]} : vector<8x512xf32> to vector<8x128xf32>
    %262 = arith.negf %261 : vector<8x128xf32>
    %263 = math.exp %262 : vector<8x128xf32>
    %cst_90 = arith.constant 1.000000e+00 : f32
    %264 = vector.broadcast %cst_90 : f32 to vector<8x128xf32>
    %265 = arith.addf %264, %263 : vector<8x128xf32>
    %266 = arith.divf %264, %265 : vector<8x128xf32>
    %267 = vector.extract_strided_slice %260 {offsets = [0, 128], sizes = [8, 128], strides = [1, 1]} : vector<8x512xf32> to vector<8x128xf32>
    %268 = arith.negf %267 : vector<8x128xf32>
    %269 = math.exp %268 : vector<8x128xf32>
    %cst_91 = arith.constant 1.000000e+00 : f32
    %270 = vector.broadcast %cst_91 : f32 to vector<8x128xf32>
    %271 = arith.addf %270, %269 : vector<8x128xf32>
    %272 = arith.divf %270, %271 : vector<8x128xf32>
    %273 = vector.extract_strided_slice %260 {offsets = [0, 256], sizes = [8, 128], strides = [1, 1]} : vector<8x512xf32> to vector<8x128xf32>
    %274 = math.tanh %273 : vector<8x128xf32>
    %275 = vector.extract_strided_slice %260 {offsets = [0, 384], sizes = [8, 128], strides = [1, 1]} : vector<8x512xf32> to vector<8x128xf32>
    %276 = arith.negf %275 : vector<8x128xf32>
    %277 = math.exp %276 : vector<8x128xf32>
    %cst_92 = arith.constant 1.000000e+00 : f32
    %278 = vector.broadcast %cst_92 : f32 to vector<8x128xf32>
    %279 = arith.addf %278, %277 : vector<8x128xf32>
    %280 = arith.divf %278, %279 : vector<8x128xf32>
    %281 = arith.mulf %272, %257 : vector<8x128xf32>
    %282 = arith.mulf %266, %274 : vector<8x128xf32>
    %283 = arith.addf %281, %282 : vector<8x128xf32>
    %284 = math.tanh %283 : vector<8x128xf32>
    %285 = arith.mulf %280, %284 : vector<8x128xf32>
    %c0_93 = arith.constant 0 : index
    %c0_94 = arith.constant 0 : index
    %286 = vector.load %arg7[%c0_93, %c0_94] : memref<64x128xf32, #tpu.memory_space<vmem>>, vector<8x128xf32>
    tpu.vector_store %arg7[%c0_93, %c0_94], %285 {strides = array<i32>} : memref<64x128xf32, #tpu.memory_space<vmem>>, vector<8x128xf32>,
    %c8_95 = arith.constant 8 : index
    %c0_96 = arith.constant 0 : index
    %287 = vector.load %arg10[%c8_95, %c0_96] : memref<64x512xf32, #tpu.memory_space<vmem>>, vector<8x512xf32>
    %cst_97 = arith.constant dense<0.000000e+00> : vector<8x512xf32>
    %288 = tpu.matmul %285, %255, %cst_97 {dimension_numbers = #tpu.dot_dimension_numbers<[1], [0], [0], [1], [0, 0, 1, 1], [], []>} : vector<8x128xf32>, vector<128x512xf32>, vector<8x512xf32> -> vector<8x512xf32>
    %289 = arith.addf %287, %288 : vector<8x512xf32>
    %290 = vector.extract_strided_slice %289 {offsets = [0, 0], sizes = [8, 128], strides = [1, 1]} : vector<8x512xf32> to vector<8x128xf32>
    %291 = arith.negf %290 : vector<8x128xf32>
    %292 = math.exp %291 : vector<8x128xf32>
    %cst_98 = arith.constant 1.000000e+00 : f32
    %293 = vector.broadcast %cst_98 : f32 to vector<8x128xf32>
    %294 = arith.addf %293, %292 : vector<8x128xf32>
    %295 = arith.divf %293, %294 : vector<8x128xf32>
    %296 = vector.extract_strided_slice %289 {offsets = [0, 128], sizes = [8, 128], strides = [1, 1]} : vector<8x512xf32> to vector<8x128xf32>
    %297 = arith.negf %296 : vector<8x128xf32>
    %298 = math.exp %297 : vector<8x128xf32>
    %cst_99 = arith.constant 1.000000e+00 : f32
    %299 = vector.broadcast %cst_99 : f32 to vector<8x128xf32>
    %300 = arith.addf %299, %298 : vector<8x128xf32>
    %301 = arith.divf %299, %300 : vector<8x128xf32>
    %302 = vector.extract_strided_slice %289 {offsets = [0, 256], sizes = [8, 128], strides = [1, 1]} : vector<8x512xf32> to vector<8x128xf32>
    %303 = math.tanh %302 : vector<8x128xf32>
    %304 = vector.extract_strided_slice %289 {offsets = [0, 384], sizes = [8, 128], strides = [1, 1]} : vector<8x512xf32> to vector<8x128xf32>
    %305 = arith.negf %304 : vector<8x128xf32>
    %306 = math.exp %305 : vector<8x128xf32>
    %cst_100 = arith.constant 1.000000e+00 : f32
    %307 = vector.broadcast %cst_100 : f32 to vector<8x128xf32>
    %308 = arith.addf %307, %306 : vector<8x128xf32>
    %309 = arith.divf %307, %308 : vector<8x128xf32>
    %310 = arith.mulf %301, %283 : vector<8x128xf32>
    %311 = arith.mulf %295, %303 : vector<8x128xf32>
    %312 = arith.addf %310, %311 : vector<8x128xf32>
    %313 = math.tanh %312 : vector<8x128xf32>
    %314 = arith.mulf %309, %313 : vector<8x128xf32>
    %c8_101 = arith.constant 8 : index
    %c0_102 = arith.constant 0 : index
    %315 = vector.load %arg7[%c8_101, %c0_102] : memref<64x128xf32, #tpu.memory_space<vmem>>, vector<8x128xf32>
    tpu.vector_store %arg7[%c8_101, %c0_102], %314 {strides = array<i32>} : memref<64x128xf32, #tpu.memory_space<vmem>>, vector<8x128xf32>,
    %c16_103 = arith.constant 16 : index
    %c0_104 = arith.constant 0 : index
    %316 = vector.load %arg10[%c16_103, %c0_104] : memref<64x512xf32, #tpu.memory_space<vmem>>, vector<8x512xf32>
    %cst_105 = arith.constant dense<0.000000e+00> : vector<8x512xf32>
    %317 = tpu.matmul %314, %255, %cst_105 {dimension_numbers = #tpu.dot_dimension_numbers<[1], [0], [0], [1], [0, 0, 1, 1], [], []>} : vector<8x128xf32>, vector<128x512xf32>, vector<8x512xf32> -> vector<8x512xf32>
    %318 = arith.addf %316, %317 : vector<8x512xf32>
    %319 = vector.extract_strided_slice %318 {offsets = [0, 0], sizes = [8, 128], strides = [1, 1]} : vector<8x512xf32> to vector<8x128xf32>
    %320 = arith.negf %319 : vector<8x128xf32>
    %321 = math.exp %320 : vector<8x128xf32>
    %cst_106 = arith.constant 1.000000e+00 : f32
    %322 = vector.broadcast %cst_106 : f32 to vector<8x128xf32>
    %323 = arith.addf %322, %321 : vector<8x128xf32>
    %324 = arith.divf %322, %323 : vector<8x128xf32>
    %325 = vector.extract_strided_slice %318 {offsets = [0, 128], sizes = [8, 128], strides = [1, 1]} : vector<8x512xf32> to vector<8x128xf32>
    %326 = arith.negf %325 : vector<8x128xf32>
    %327 = math.exp %326 : vector<8x128xf32>
    %cst_107 = arith.constant 1.000000e+00 : f32
    %328 = vector.broadcast %cst_107 : f32 to vector<8x128xf32>
    %329 = arith.addf %328, %327 : vector<8x128xf32>
    %330 = arith.divf %328, %329 : vector<8x128xf32>
    %331 = vector.extract_strided_slice %318 {offsets = [0, 256], sizes = [8, 128], strides = [1, 1]} : vector<8x512xf32> to vector<8x128xf32>
    %332 = math.tanh %331 : vector<8x128xf32>
    %333 = vector.extract_strided_slice %318 {offsets = [0, 384], sizes = [8, 128], strides = [1, 1]} : vector<8x512xf32> to vector<8x128xf32>
    %334 = arith.negf %333 : vector<8x128xf32>
    %335 = math.exp %334 : vector<8x128xf32>
    %cst_108 = arith.constant 1.000000e+00 : f32
    %336 = vector.broadcast %cst_108 : f32 to vector<8x128xf32>
    %337 = arith.addf %336, %335 : vector<8x128xf32>
    %338 = arith.divf %336, %337 : vector<8x128xf32>
    %339 = arith.mulf %330, %312 : vector<8x128xf32>
    %340 = arith.mulf %324, %332 : vector<8x128xf32>
    %341 = arith.addf %339, %340 : vector<8x128xf32>
    %342 = math.tanh %341 : vector<8x128xf32>
    %343 = arith.mulf %338, %342 : vector<8x128xf32>
    %c16_109 = arith.constant 16 : index
    %c0_110 = arith.constant 0 : index
    %344 = vector.load %arg7[%c16_109, %c0_110] : memref<64x128xf32, #tpu.memory_space<vmem>>, vector<8x128xf32>
    tpu.vector_store %arg7[%c16_109, %c0_110], %343 {strides = array<i32>} : memref<64x128xf32, #tpu.memory_space<vmem>>, vector<8x128xf32>,
    %c24_111 = arith.constant 24 : index
    %c0_112 = arith.constant 0 : index
    %345 = vector.load %arg10[%c24_111, %c0_112] : memref<64x512xf32, #tpu.memory_space<vmem>>, vector<8x512xf32>
    %cst_113 = arith.constant dense<0.000000e+00> : vector<8x512xf32>
    %346 = tpu.matmul %343, %255, %cst_113 {dimension_numbers = #tpu.dot_dimension_numbers<[1], [0], [0], [1], [0, 0, 1, 1], [], []>} : vector<8x128xf32>, vector<128x512xf32>, vector<8x512xf32> -> vector<8x512xf32>
    %347 = arith.addf %345, %346 : vector<8x512xf32>
    %348 = vector.extract_strided_slice %347 {offsets = [0, 0], sizes = [8, 128], strides = [1, 1]} : vector<8x512xf32> to vector<8x128xf32>
    %349 = arith.negf %348 : vector<8x128xf32>
    %350 = math.exp %349 : vector<8x128xf32>
    %cst_114 = arith.constant 1.000000e+00 : f32
    %351 = vector.broadcast %cst_114 : f32 to vector<8x128xf32>
    %352 = arith.addf %351, %350 : vector<8x128xf32>
    %353 = arith.divf %351, %352 : vector<8x128xf32>
    %354 = vector.extract_strided_slice %347 {offsets = [0, 128], sizes = [8, 128], strides = [1, 1]} : vector<8x512xf32> to vector<8x128xf32>
    %355 = arith.negf %354 : vector<8x128xf32>
    %356 = math.exp %355 : vector<8x128xf32>
    %cst_115 = arith.constant 1.000000e+00 : f32
    %357 = vector.broadcast %cst_115 : f32 to vector<8x128xf32>
    %358 = arith.addf %357, %356 : vector<8x128xf32>
    %359 = arith.divf %357, %358 : vector<8x128xf32>
    %360 = vector.extract_strided_slice %347 {offsets = [0, 256], sizes = [8, 128], strides = [1, 1]} : vector<8x512xf32> to vector<8x128xf32>
    %361 = math.tanh %360 : vector<8x128xf32>
    %362 = vector.extract_strided_slice %347 {offsets = [0, 384], sizes = [8, 128], strides = [1, 1]} : vector<8x512xf32> to vector<8x128xf32>
    %363 = arith.negf %362 : vector<8x128xf32>
    %364 = math.exp %363 : vector<8x128xf32>
    %cst_116 = arith.constant 1.000000e+00 : f32
    %365 = vector.broadcast %cst_116 : f32 to vector<8x128xf32>
    %366 = arith.addf %365, %364 : vector<8x128xf32>
    %367 = arith.divf %365, %366 : vector<8x128xf32>
    %368 = arith.mulf %359, %341 : vector<8x128xf32>
    %369 = arith.mulf %353, %361 : vector<8x128xf32>
    %370 = arith.addf %368, %369 : vector<8x128xf32>
    %371 = math.tanh %370 : vector<8x128xf32>
    %372 = arith.mulf %367, %371 : vector<8x128xf32>
    %c24_117 = arith.constant 24 : index
    %c0_118 = arith.constant 0 : index
    %373 = vector.load %arg7[%c24_117, %c0_118] : memref<64x128xf32, #tpu.memory_space<vmem>>, vector<8x128xf32>
    tpu.vector_store %arg7[%c24_117, %c0_118], %372 {strides = array<i32>} : memref<64x128xf32, #tpu.memory_space<vmem>>, vector<8x128xf32>,
    %c32_119 = arith.constant 32 : index
    %c0_120 = arith.constant 0 : index
    %374 = vector.load %arg10[%c32_119, %c0_120] : memref<64x512xf32, #tpu.memory_space<vmem>>, vector<8x512xf32>
    %cst_121 = arith.constant dense<0.000000e+00> : vector<8x512xf32>
    %375 = tpu.matmul %372, %255, %cst_121 {dimension_numbers = #tpu.dot_dimension_numbers<[1], [0], [0], [1], [0, 0, 1, 1], [], []>} : vector<8x128xf32>, vector<128x512xf32>, vector<8x512xf32> -> vector<8x512xf32>
    %376 = arith.addf %374, %375 : vector<8x512xf32>
    %377 = vector.extract_strided_slice %376 {offsets = [0, 0], sizes = [8, 128], strides = [1, 1]} : vector<8x512xf32> to vector<8x128xf32>
    %378 = arith.negf %377 : vector<8x128xf32>
    %379 = math.exp %378 : vector<8x128xf32>
    %cst_122 = arith.constant 1.000000e+00 : f32
    %380 = vector.broadcast %cst_122 : f32 to vector<8x128xf32>
    %381 = arith.addf %380, %379 : vector<8x128xf32>
    %382 = arith.divf %380, %381 : vector<8x128xf32>
    %383 = vector.extract_strided_slice %376 {offsets = [0, 128], sizes = [8, 128], strides = [1, 1]} : vector<8x512xf32> to vector<8x128xf32>
    %384 = arith.negf %383 : vector<8x128xf32>
    %385 = math.exp %384 : vector<8x128xf32>
    %cst_123 = arith.constant 1.000000e+00 : f32
    %386 = vector.broadcast %cst_123 : f32 to vector<8x128xf32>
    %387 = arith.addf %386, %385 : vector<8x128xf32>
    %388 = arith.divf %386, %387 : vector<8x128xf32>
    %389 = vector.extract_strided_slice %376 {offsets = [0, 256], sizes = [8, 128], strides = [1, 1]} : vector<8x512xf32> to vector<8x128xf32>
    %390 = math.tanh %389 : vector<8x128xf32>
    %391 = vector.extract_strided_slice %376 {offsets = [0, 384], sizes = [8, 128], strides = [1, 1]} : vector<8x512xf32> to vector<8x128xf32>
    %392 = arith.negf %391 : vector<8x128xf32>
    %393 = math.exp %392 : vector<8x128xf32>
    %cst_124 = arith.constant 1.000000e+00 : f32
    %394 = vector.broadcast %cst_124 : f32 to vector<8x128xf32>
    %395 = arith.addf %394, %393 : vector<8x128xf32>
    %396 = arith.divf %394, %395 : vector<8x128xf32>
    %397 = arith.mulf %388, %370 : vector<8x128xf32>
    %398 = arith.mulf %382, %390 : vector<8x128xf32>
    %399 = arith.addf %397, %398 : vector<8x128xf32>
    %400 = math.tanh %399 : vector<8x128xf32>
    %401 = arith.mulf %396, %400 : vector<8x128xf32>
    %c32_125 = arith.constant 32 : index
    %c0_126 = arith.constant 0 : index
    %402 = vector.load %arg7[%c32_125, %c0_126] : memref<64x128xf32, #tpu.memory_space<vmem>>, vector<8x128xf32>
    tpu.vector_store %arg7[%c32_125, %c0_126], %401 {strides = array<i32>} : memref<64x128xf32, #tpu.memory_space<vmem>>, vector<8x128xf32>,
    %c40_127 = arith.constant 40 : index
    %c0_128 = arith.constant 0 : index
    %403 = vector.load %arg10[%c40_127, %c0_128] : memref<64x512xf32, #tpu.memory_space<vmem>>, vector<8x512xf32>
    %cst_129 = arith.constant dense<0.000000e+00> : vector<8x512xf32>
    %404 = tpu.matmul %401, %255, %cst_129 {dimension_numbers = #tpu.dot_dimension_numbers<[1], [0], [0], [1], [0, 0, 1, 1], [], []>} : vector<8x128xf32>, vector<128x512xf32>, vector<8x512xf32> -> vector<8x512xf32>
    %405 = arith.addf %403, %404 : vector<8x512xf32>
    %406 = vector.extract_strided_slice %405 {offsets = [0, 0], sizes = [8, 128], strides = [1, 1]} : vector<8x512xf32> to vector<8x128xf32>
    %407 = arith.negf %406 : vector<8x128xf32>
    %408 = math.exp %407 : vector<8x128xf32>
    %cst_130 = arith.constant 1.000000e+00 : f32
    %409 = vector.broadcast %cst_130 : f32 to vector<8x128xf32>
    %410 = arith.addf %409, %408 : vector<8x128xf32>
    %411 = arith.divf %409, %410 : vector<8x128xf32>
    %412 = vector.extract_strided_slice %405 {offsets = [0, 128], sizes = [8, 128], strides = [1, 1]} : vector<8x512xf32> to vector<8x128xf32>
    %413 = arith.negf %412 : vector<8x128xf32>
    %414 = math.exp %413 : vector<8x128xf32>
    %cst_131 = arith.constant 1.000000e+00 : f32
    %415 = vector.broadcast %cst_131 : f32 to vector<8x128xf32>
    %416 = arith.addf %415, %414 : vector<8x128xf32>
    %417 = arith.divf %415, %416 : vector<8x128xf32>
    %418 = vector.extract_strided_slice %405 {offsets = [0, 256], sizes = [8, 128], strides = [1, 1]} : vector<8x512xf32> to vector<8x128xf32>
    %419 = math.tanh %418 : vector<8x128xf32>
    %420 = vector.extract_strided_slice %405 {offsets = [0, 384], sizes = [8, 128], strides = [1, 1]} : vector<8x512xf32> to vector<8x128xf32>
    %421 = arith.negf %420 : vector<8x128xf32>
    %422 = math.exp %421 : vector<8x128xf32>
    %cst_132 = arith.constant 1.000000e+00 : f32
    %423 = vector.broadcast %cst_132 : f32 to vector<8x128xf32>
    %424 = arith.addf %423, %422 : vector<8x128xf32>
    %425 = arith.divf %423, %424 : vector<8x128xf32>
    %426 = arith.mulf %417, %399 : vector<8x128xf32>
    %427 = arith.mulf %411, %419 : vector<8x128xf32>
    %428 = arith.addf %426, %427 : vector<8x128xf32>
    %429 = math.tanh %428 : vector<8x128xf32>
    %430 = arith.mulf %425, %429 : vector<8x128xf32>
    %c40_133 = arith.constant 40 : index
    %c0_134 = arith.constant 0 : index
    %431 = vector.load %arg7[%c40_133, %c0_134] : memref<64x128xf32, #tpu.memory_space<vmem>>, vector<8x128xf32>
    tpu.vector_store %arg7[%c40_133, %c0_134], %430 {strides = array<i32>} : memref<64x128xf32, #tpu.memory_space<vmem>>, vector<8x128xf32>,
    %c48_135 = arith.constant 48 : index
    %c0_136 = arith.constant 0 : index
    %432 = vector.load %arg10[%c48_135, %c0_136] : memref<64x512xf32, #tpu.memory_space<vmem>>, vector<8x512xf32>
    %cst_137 = arith.constant dense<0.000000e+00> : vector<8x512xf32>
    %433 = tpu.matmul %430, %255, %cst_137 {dimension_numbers = #tpu.dot_dimension_numbers<[1], [0], [0], [1], [0, 0, 1, 1], [], []>} : vector<8x128xf32>, vector<128x512xf32>, vector<8x512xf32> -> vector<8x512xf32>
    %434 = arith.addf %432, %433 : vector<8x512xf32>
    %435 = vector.extract_strided_slice %434 {offsets = [0, 0], sizes = [8, 128], strides = [1, 1]} : vector<8x512xf32> to vector<8x128xf32>
    %436 = arith.negf %435 : vector<8x128xf32>
    %437 = math.exp %436 : vector<8x128xf32>
    %cst_138 = arith.constant 1.000000e+00 : f32
    %438 = vector.broadcast %cst_138 : f32 to vector<8x128xf32>
    %439 = arith.addf %438, %437 : vector<8x128xf32>
    %440 = arith.divf %438, %439 : vector<8x128xf32>
    %441 = vector.extract_strided_slice %434 {offsets = [0, 128], sizes = [8, 128], strides = [1, 1]} : vector<8x512xf32> to vector<8x128xf32>
    %442 = arith.negf %441 : vector<8x128xf32>
    %443 = math.exp %442 : vector<8x128xf32>
    %cst_139 = arith.constant 1.000000e+00 : f32
    %444 = vector.broadcast %cst_139 : f32 to vector<8x128xf32>
    %445 = arith.addf %444, %443 : vector<8x128xf32>
    %446 = arith.divf %444, %445 : vector<8x128xf32>
    %447 = vector.extract_strided_slice %434 {offsets = [0, 256], sizes = [8, 128], strides = [1, 1]} : vector<8x512xf32> to vector<8x128xf32>
    %448 = math.tanh %447 : vector<8x128xf32>
    %449 = vector.extract_strided_slice %434 {offsets = [0, 384], sizes = [8, 128], strides = [1, 1]} : vector<8x512xf32> to vector<8x128xf32>
    %450 = arith.negf %449 : vector<8x128xf32>
    %451 = math.exp %450 : vector<8x128xf32>
    %cst_140 = arith.constant 1.000000e+00 : f32
    %452 = vector.broadcast %cst_140 : f32 to vector<8x128xf32>
    %453 = arith.addf %452, %451 : vector<8x128xf32>
    %454 = arith.divf %452, %453 : vector<8x128xf32>
    %455 = arith.mulf %446, %428 : vector<8x128xf32>
    %456 = arith.mulf %440, %448 : vector<8x128xf32>
    %457 = arith.addf %455, %456 : vector<8x128xf32>
    %458 = math.tanh %457 : vector<8x128xf32>
    %459 = arith.mulf %454, %458 : vector<8x128xf32>
    %c48_141 = arith.constant 48 : index
    %c0_142 = arith.constant 0 : index
    %460 = vector.load %arg7[%c48_141, %c0_142] : memref<64x128xf32, #tpu.memory_space<vmem>>, vector<8x128xf32>
    tpu.vector_store %arg7[%c48_141, %c0_142], %459 {strides = array<i32>} : memref<64x128xf32, #tpu.memory_space<vmem>>, vector<8x128xf32>,
    %c56_143 = arith.constant 56 : index
    %c0_144 = arith.constant 0 : index
    %461 = vector.load %arg10[%c56_143, %c0_144] : memref<64x512xf32, #tpu.memory_space<vmem>>, vector<8x512xf32>
    %cst_145 = arith.constant dense<0.000000e+00> : vector<8x512xf32>
    %462 = tpu.matmul %459, %255, %cst_145 {dimension_numbers = #tpu.dot_dimension_numbers<[1], [0], [0], [1], [0, 0, 1, 1], [], []>} : vector<8x128xf32>, vector<128x512xf32>, vector<8x512xf32> -> vector<8x512xf32>
    %463 = arith.addf %461, %462 : vector<8x512xf32>
    %464 = vector.extract_strided_slice %463 {offsets = [0, 0], sizes = [8, 128], strides = [1, 1]} : vector<8x512xf32> to vector<8x128xf32>
    %465 = arith.negf %464 : vector<8x128xf32>
    %466 = math.exp %465 : vector<8x128xf32>
    %cst_146 = arith.constant 1.000000e+00 : f32
    %467 = vector.broadcast %cst_146 : f32 to vector<8x128xf32>
    %468 = arith.addf %467, %466 : vector<8x128xf32>
    %469 = arith.divf %467, %468 : vector<8x128xf32>
    %470 = vector.extract_strided_slice %463 {offsets = [0, 128], sizes = [8, 128], strides = [1, 1]} : vector<8x512xf32> to vector<8x128xf32>
    %471 = arith.negf %470 : vector<8x128xf32>
    %472 = math.exp %471 : vector<8x128xf32>
    %cst_147 = arith.constant 1.000000e+00 : f32
    %473 = vector.broadcast %cst_147 : f32 to vector<8x128xf32>
    %474 = arith.addf %473, %472 : vector<8x128xf32>
    %475 = arith.divf %473, %474 : vector<8x128xf32>
    %476 = vector.extract_strided_slice %463 {offsets = [0, 256], sizes = [8, 128], strides = [1, 1]} : vector<8x512xf32> to vector<8x128xf32>
    %477 = math.tanh %476 : vector<8x128xf32>
    %478 = vector.extract_strided_slice %463 {offsets = [0, 384], sizes = [8, 128], strides = [1, 1]} : vector<8x512xf32> to vector<8x128xf32>
    %479 = arith.negf %478 : vector<8x128xf32>
    %480 = math.exp %479 : vector<8x128xf32>
    %cst_148 = arith.constant 1.000000e+00 : f32
    %481 = vector.broadcast %cst_148 : f32 to vector<8x128xf32>
    %482 = arith.addf %481, %480 : vector<8x128xf32>
    %483 = arith.divf %481, %482 : vector<8x128xf32>
    %484 = arith.mulf %475, %457 : vector<8x128xf32>
    %485 = arith.mulf %469, %477 : vector<8x128xf32>
    %486 = arith.addf %484, %485 : vector<8x128xf32>
    %487 = math.tanh %486 : vector<8x128xf32>
    %488 = arith.mulf %483, %487 : vector<8x128xf32>
    %c56_149 = arith.constant 56 : index
    %c0_150 = arith.constant 0 : index
    %489 = vector.load %arg7[%c56_149, %c0_150] : memref<64x128xf32, #tpu.memory_space<vmem>>, vector<8x128xf32>
    tpu.vector_store %arg7[%c56_149, %c0_150], %488 {strides = array<i32>} : memref<64x128xf32, #tpu.memory_space<vmem>>, vector<8x128xf32>,
    %c1 = arith.constant 1 : index
    %c0_151 = arith.constant 0 : index
    %c0_152 = arith.constant 0 : index
    %490 = vector.load %arg8[%c1, %c0_151, %c0_152] : memref<2x8x128xf32, #tpu.memory_space<vmem>>, vector<1x8x128xf32>
    %491 = vector.shape_cast %490 : vector<1x8x128xf32> to vector<8x128xf32>
    %492 = vector.shape_cast %488 : vector<8x128xf32> to vector<1x8x128xf32>
    tpu.vector_store %arg8[%c1, %c0_151, %c0_152], %492 {strides = array<i32>} : memref<2x8x128xf32, #tpu.memory_space<vmem>>, vector<1x8x128xf32>,
    %c1_153 = arith.constant 1 : index
    %c0_154 = arith.constant 0 : index
    %c0_155 = arith.constant 0 : index
    %493 = vector.load %arg9[%c1_153, %c0_154, %c0_155] : memref<2x8x128xf32, #tpu.memory_space<vmem>>, vector<1x8x128xf32>
    %494 = vector.shape_cast %493 : vector<1x8x128xf32> to vector<8x128xf32>
    %495 = vector.shape_cast %486 : vector<8x128xf32> to vector<1x8x128xf32>
    tpu.vector_store %arg9[%c1_153, %c0_154, %c0_155], %495 {strides = array<i32>} : memref<2x8x128xf32, #tpu.memory_space<vmem>>, vector<1x8x128xf32>,
    return
  }
}

</mosaic_0001>

<bundles_post_ra>
// kernel: lstm_forward.1
= control target key start
LH: loop header
LB: loop body
LE: loop exit
PB: predicated region body
PF: predicated region fallthrough
CT: control target
= control target key end

     0   :  { %15 = vsyncpa [#allocation5], 0  ;;  %s6525_s0 = inlined_call_operand.vmem [shape: f32[64,128], index: 0, kind: input, shape index: {}]   ;;  %s6526_s1 = inlined_call_operand.hbm [shape: f32[128,512], index: 1, kind: input, shape index: {}]   ;;  %s6527_s2 = inlined_call_operand.hbm [shape: f32[128,512], index: 2, kind: input, shape index: {}]   ;;  %s6528_s3 = inlined_call_operand.vmem [shape: f32[1,512], index: 3, kind: input, shape index: {}]   ;;  %s6529_s4 = inlined_call_operand.hbm [shape: f32[128,512], index: 4, kind: input, shape index: {}]   ;;  %s6530_s5 = inlined_call_operand.hbm [shape: f32[128,512], index: 5, kind: input, shape index: {}]   ;;  %s6531_s6 = inlined_call_operand.vmem [shape: f32[1,512], index: 6, kind: input, shape index: {}]   ;;  %s6532_s7 = inlined_call_operand.vmem [shape: f32[64,128], index: 7, kind: output, shape index: {0}]   ;;  %s6533_s8 = inlined_call_operand.vmem [shape: f32[2,8,128], index: 8, kind: output, shape index: {1}]   ;;  %s6534_s9 = inlined_call_operand.vmem [shape: f32[2,8,128], index: 9, kind: output, shape index: {2}]  }
   0x1   :  { %16 = vsyncpa [#allocation7], 0 }
   0x2   :  { %17 = vsyncpa [#allocation10], 0  ;;  %s5424_s30 = smov [#allocation6]   ;;  %s5425_s11 = smov [#allocation4]  }
   0x3   :  { %s37_s10 = sshll.u32 %s5424_s30, 4  ;;  %s25_s12 = sshll.u32 %s5425_s11, 4  ;;  %s38_s10 = int_to_ptr.vmem [resolvable:$true] %s37_s10  ;;  %s5481_s12 = int_to_ptr.vmem [resolvable:$true] %s25_s12 }
   0x4   :  { %s5330_s15 = scalar_lea.hbm %s6527_s2, 8192 }
   0x5   :  { %p5331_p0 = scmp.ne.s32.totalorder %s6527_s2, %s5330_s15  ;;  %p5334_p1 = scmp.lt.u32.totalorder %s5330_s15, %s6527_s2 }
   0x7   :  { %p5336_p2 = pnand %p5334_p1, %p5331_p0 }
   0x9   :  { %5339 = shalt.err (!%p5336_p2)
}
   0xa   :  { %s5340_s20 = scalar_lea.vmem %s38_s10, 8192  ;;  %p5345_p4 = scmp.lt.s32.totalorder %s38_s10, %s38_s10 }
   0xb   :  { %p5341_p3 = scmp.ne.s32.totalorder %s38_s10, %s5340_s20  ;;  %p5346_p5 = scmp.lt.s32.totalorder %s5340_s20, %s5340_s20 }
   0xd   :  { %p5347_p6 = por %p5346_p5, %p5345_p4 }
   0xf   :  { %p5348_p7 = pnand %p5347_p6, %p5341_p3 }
  0x11   :  { %5351 = shalt.err (!%p5348_p7)
}
  0x12   :  { %s5426_s21 = smov 512   ;;  %s5427_s22 = smov 32  }
  0x13   :  { %43 = dma.hbm_to_vmem [thread:$0]  %s6527_s2, 8192, %s38_s10, [#allocation7], %s5426_s21, %s5426_s21, %s5427_s22  }
  0x14   :  { %s5352_s27 = scalar_lea.hbm %s6526_s1, 8192 }
  0x15   :  { %p5353_p8 = scmp.ne.s32.totalorder %s6526_s1, %s5352_s27  ;;  %p5356_p9 = scmp.lt.u32.totalorder %s5352_s27, %s6526_s1 }
  0x17   :  { %p5358_p10 = pnand %p5356_p9, %p5353_p8 }
  0x19   :  { %5361 = shalt.err (!%p5358_p10)
}
  0x1a   :  { %s5362_s13 = scalar_lea.vmem %s5481_s12, 8192  ;;  %p5367_p12 = scmp.lt.s32.totalorder %s5481_s12, %s5481_s12 }
  0x1b   :  { %p5363_p11 = scmp.ne.s32.totalorder %s5481_s12, %s5362_s13  ;;  %p5368_p13 = scmp.lt.s32.totalorder %s5362_s13, %s5362_s13 }
  0x1d   :  { %p5369_p0 = por %p5368_p13, %p5367_p12 }
  0x1f   :  { %p5370_p1 = pnand %p5369_p0, %p5363_p11 }
  0x21   :  { %5373 = shalt.err (!%p5370_p1)
}
  0x22   :  { %31 = dma.hbm_to_vmem [thread:$0]  %s6526_s1, 8192, %s5481_s12, [#allocation5], %s5426_s21, %s5426_s21, %s5427_s22  }
  0x23   :  { %s5428_s14 = smov [#allocation8]   ;;  %s5429_s16 = smov [#allocation9]  }
  0x24   :  { %s51_s15 = sshll.u32 %s5428_s14, 4  ;;  %s63_s17 = sshll.u32 %s5429_s16, 4  ;;  %s52_s15 = int_to_ptr.vmem [resolvable:$true] %s51_s15  ;;  %s5518_s17 = int_to_ptr.vmem [resolvable:$true] %s63_s17 }
  0x25   :  { %s5374_s20 = scalar_lea.hbm %s6529_s4, 8192 }
  0x26   :  { %p5375_p2 = scmp.ne.s32.totalorder %s6529_s4, %s5374_s20  ;;  %p5378_p3 = scmp.lt.u32.totalorder %s5374_s20, %s6529_s4 }
  0x28   :  { %p5380_p4 = pnand %p5378_p3, %p5375_p2 }
  0x2a   :  { %5383 = shalt.err (!%p5380_p4)
}
  0x2b   :  { %s5384_s1 = scalar_lea.vmem %s52_s15, 8192  ;;  %p5389_p6 = scmp.lt.s32.totalorder %s52_s15, %s52_s15 }
  0x2c   :  { %p5385_p5 = scmp.ne.s32.totalorder %s52_s15, %s5384_s1  ;;  %p5390_p7 = scmp.lt.s32.totalorder %s5384_s1, %s5384_s1 }
  0x2e   :  { %p5391_p8 = por %p5390_p7, %p5389_p6 }
  0x30   :  { %p5392_p9 = pnand %p5391_p8, %p5385_p5 }
  0x32   :  { %5395 = shalt.err (!%p5392_p9)
}
  0x33   :  { %57 = dma.hbm_to_vmem [thread:$0]  %s6529_s4, 8192, %s52_s15, [#allocation7], %s5426_s21, %s5426_s21, %s5427_s22  }
  0x34   :  { %s5396_s30 = scalar_lea.hbm %s6530_s5, 8192 }
  0x35   :  { %p5397_p10 = scmp.ne.s32.totalorder %s6530_s5, %s5396_s30  ;;  %p5400_p11 = scmp.lt.u32.totalorder %s5396_s30, %s6530_s5 }
  0x37   :  { %p5402_p12 = pnand %p5400_p11, %p5397_p10 }
  0x39   :  { %5405 = shalt.err (!%p5402_p12)
}
  0x3a   :  { %s5406_s14 = scalar_lea.vmem %s5518_s17, 8192  ;;  %p5411_p0 = scmp.lt.s32.totalorder %s5518_s17, %s5518_s17 }
  0x3b   :  { %p5407_p13 = scmp.ne.s32.totalorder %s5518_s17, %s5406_s14  ;;  %p5412_p1 = scmp.lt.s32.totalorder %s5406_s14, %s5406_s14 }
  0x3d   :  { %p5413_p2 = por %p5412_p1, %p5411_p0 }
  0x3f   :  { %p5414_p3 = pnand %p5413_p2, %p5407_p13 }
  0x41   :  { %5417 = shalt.err (!%p5414_p3)
}
  0x42   :  { %69 = dma.hbm_to_vmem [thread:$0]  %s6530_s5, 8192, %s5518_s17, [#allocation10], %s5426_s21, %s5426_s21, %s5427_s22  }
  0x43   :  { %5418 = dma.done.wait [#allocation5], 8192  }
  0x44   :  { %5419 = vsyncadd [#allocation5], 4294959104 }
  0x45   :  { %5420 = dma.done.wait [#allocation7], 16384  }
  0x46   :  { %5421 = vsyncadd [#allocation7], 4294950912 }
  0x47   :  { %5422 = dma.done.wait [#allocation10], 8192  }
  0x48   :  { %5423 = vsyncadd [#allocation10], 4294959104  ;;  %v5430_v0 = vmov 0.0   ;;  %v93_v1 = vld [vmem:[#allocation4 + $0x8] sm:$0xff]  ;;  %v95_v3 = vld [vmem:[#allocation4 + $0x18] sm:$0xff] }
  0x49   :  { %242 = vmatprep.mubr.f32.mxu0 %v5430_v0  ;;  %355 = vmatprep.mubr.f32.mxu1 %v5430_v0  ;;  %v97_v2 = vld [vmem:[#allocation4 + $0x28] sm:$0xff]  ;;  %v99_v5 = vld [vmem:[#allocation4 + $0x38] sm:$0xff]  ;;  %v92_v6 = vld [vmem:[#allocation4] sm:$0xff] }
  0x4a   :  { %v3787_v4 = vpack.c.bf16 %v97_v2, %v93_v1  ;;  %v96_v7 = vld [vmem:[#allocation4 + $0x20] sm:$0xff]  ;;  %v3819_v8 = vpack.c.bf16 %v99_v5, %v95_v3  ;;  %v94_v10 = vld [vmem:[#allocation4 + $0x10] sm:$0xff]  ;;  %v101_v12 = vld [vmem:[#allocation4 + $0x48] sm:$0xff] }
  0x4b   :  { %v3789_v9 = vpack.c.bf16 %v96_v7, %v92_v6  ;;  %v98_v11 = vld [vmem:[#allocation4 + $0x30] sm:$0xff]  ;;  %v105_v14 = vld [vmem:[#allocation4 + $0x68] sm:$0xff]  ;;  %v103_v15 = vld [vmem:[#allocation4 + $0x58] sm:$0xff] }
  0x4c   :  { %3788 = vmatprep.subr.bf16.mxu0 %v3787_v4  ;;  %v3821_v13 = vpack.c.bf16 %v98_v11, %v94_v10  ;;  %v107_v16 = vld [vmem:[#allocation4 + $0x78] sm:$0xff]  ;;  %3820 = vmatprep.subr.bf16.mxu1 %v3819_v8  ;;  %v3791_v17 = vpack.c.bf16 %v105_v14, %v101_v12  ;;  %v100_v19 = vld [vmem:[#allocation4 + $0x40] sm:$0xff]  ;;  %v102_v21 = vld [vmem:[#allocation4 + $0x50] sm:$0xff] }
  0x4d   :  { %3790 = vmatpush1.bf16.msra.mxu0 %v3789_v9  ;;  %v3823_v18 = vpack.c.bf16 %v107_v16, %v103_v15  ;;  %v104_v20 = vld [vmem:[#allocation4 + $0x60] sm:$0xff]  ;;  %v106_v23 = vld [vmem:[#allocation4 + $0x70] sm:$0xff]  ;;  %v109_v24 = vld [vmem:[#allocation4 + $0x88] sm:$0xff] }
  0x4e   :  { %3822 = vmatpush1.bf16.msra.mxu1 %v3821_v13  ;;  %v3793_v22 = vpack.c.bf16 %v104_v20, %v100_v19  ;;  %v113_v25 = vld [vmem:[#allocation4 + $0xa8] sm:$0xff]  ;;  %3792 = vmatprep.subr.bf16.mxu0 %v3791_v17  ;;  %v3825_v26 = vpack.c.bf16 %v106_v23, %v102_v21  ;;  %v111_v28 = vld [vmem:[#allocation4 + $0x98] sm:$0xff]  ;;  %v108_v30 = vld [vmem:[#allocation4 + $0x80] sm:$0xff] }
  0x4f   :  { %3824 = vmatprep.subr.bf16.mxu1 %v3823_v18  ;;  %v3795_v27 = vpack.c.bf16 %v113_v25, %v109_v24  ;;  %v115_v29 = vld [vmem:[#allocation4 + $0xb8] sm:$0xff]  ;;  %v112_v32 = vld [vmem:[#allocation4 + $0xa0] sm:$0xff]  ;;  %v110_v33 = vld [vmem:[#allocation4 + $0x90] sm:$0xff] }
  0x50   :  { %v3827_v31 = vpack.c.bf16 %v115_v29, %v111_v28  ;;  %v114_v34 = vld [vmem:[#allocation4 + $0xb0] sm:$0xff]  ;;  %v3797_v35 = vpack.c.bf16 %v112_v32, %v108_v30  ;;  %v117_v36 = vld [vmem:[#allocation4 + $0xc8] sm:$0xff]  ;;  %v119_v38 = vld [vmem:[#allocation4 + $0xd8] sm:$0xff] }
  0x51   :  { %3794 = vmatpush1.bf16.msra.mxu0 %v3793_v22  ;;  %v121_v37 = vld [vmem:[#allocation4 + $0xe8] sm:$0xff]  ;;  %v3829_v39 = vpack.c.bf16 %v114_v34, %v110_v33  ;;  %v123_v41 = vld [vmem:[#allocation4 + $0xf8] sm:$0xff]  ;;  %v116_v42 = vld [vmem:[#allocation4 + $0xc0] sm:$0xff] }
  0x52   :  { %3826 = vmatpush1.bf16.msra.mxu1 %v3825_v26  ;;  %3796 = vmatprep.subr.bf16.mxu0 %v3795_v27  ;;  %v3799_v40 = vpack.c.bf16 %v121_v37, %v117_v36  ;;  %v120_v43 = vld [vmem:[#allocation4 + $0xe0] sm:$0xff]  ;;  %v3831_v44 = vpack.c.bf16 %v123_v41, %v119_v38  ;;  %v118_v45 = vld [vmem:[#allocation4 + $0xd0] sm:$0xff]  ;;  %v125_v47 = vld [vmem:[#allocation4 + $0x108] sm:$0xff] }
  0x53   :  { %3828 = vmatprep.subr.bf16.mxu1 %v3827_v31  ;;  %v122_v46 = vld [vmem:[#allocation4 + $0xf0] sm:$0xff]  ;;  %v129_v48 = vld [vmem:[#allocation4 + $0x128] sm:$0xff]  ;;  %v127_v49 = vld [vmem:[#allocation4 + $0x118] sm:$0xff]  ;;  %v3801_v51 = vpack.c.bf16 %v120_v43, %v116_v42 }
  0x54   :  { %v131_v50 = vld [vmem:[#allocation4 + $0x138] sm:$0xff]  ;;  %v3833_v52 = vpack.c.bf16 %v122_v46, %v118_v45  ;;  %v3803_v53 = vpack.c.bf16 %v129_v48, %v125_v47  ;;  %v124_v54 = vld [vmem:[#allocation4 + $0x100] sm:$0xff]  ;;  %v126_v56 = vld [vmem:[#allocation4 + $0x110] sm:$0xff] }
  0x55   :  { %3798 = vmatpush1.bf16.msra.mxu0 %v3797_v35  ;;  %v128_v55 = vld [vmem:[#allocation4 + $0x120] sm:$0xff]  ;;  %v3835_v57 = vpack.c.bf16 %v131_v50, %v127_v49  ;;  %v130_v58 = vld [vmem:[#allocation4 + $0x130] sm:$0xff]  ;;  %v133_v59 = vld [vmem:[#allocation4 + $0x148] sm:$0xff] }
  0x56   :  { %3830 = vmatpush1.bf16.msra.mxu1 %v3829_v39  ;;  %3800 = vmatprep.subr.bf16.mxu0 %v3799_v40  ;;  %v137_v60 = vld [vmem:[#allocation4 + $0x168] sm:$0xff]  ;;  %v135_v61 = vld [vmem:[#allocation4 + $0x158] sm:$0xff]  ;;  %v3805_v63 = vpack.c.bf16 %v128_v55, %v124_v54  ;;  %v3837_v1 = vpack.c.bf16 %v130_v58, %v126_v56  ;;  %v132_v3 = vld [vmem:[#allocation4 + $0x140] sm:$0xff] }
  0x57   :  { %3832 = vmatprep.subr.bf16.mxu1 %v3831_v44  ;;  %v139_v62 = vld [vmem:[#allocation4 + $0x178] sm:$0xff]  ;;  %v3807_v2 = vpack.c.bf16 %v137_v60, %v133_v59  ;;  %v136_v4 = vld [vmem:[#allocation4 + $0x160] sm:$0xff]  ;;  %v134_v5 = vld [vmem:[#allocation4 + $0x150] sm:$0xff] }
  0x58   :  { %v3839_v6 = vpack.c.bf16 %v139_v62, %v135_v61  ;;  %v138_v7 = vld [vmem:[#allocation4 + $0x170] sm:$0xff]  ;;  %v141_v8 = vld [vmem:[#allocation4 + $0x188] sm:$0xff]  ;;  %v143_v10 = vld [vmem:[#allocation4 + $0x198] sm:$0xff]  ;;  %v3809_v12 = vpack.c.bf16 %v136_v4, %v132_v3 }
  0x59   :  { %3802 = vmatpush1.bf16.msra.mxu0 %v3801_v51  ;;  %v145_v9 = vld [vmem:[#allocation4 + $0x1a8] sm:$0xff]  ;;  %v147_v11 = vld [vmem:[#allocation4 + $0x1b8] sm:$0xff]  ;;  %v3841_v13 = vpack.c.bf16 %v138_v7, %v134_v5  ;;  %v140_v15 = vld [vmem:[#allocation4 + $0x180] sm:$0xff] }
  0x5a   :  { %3834 = vmatpush1.bf16.msra.mxu1 %v3833_v52  ;;  %3804 = vmatprep.subr.bf16.mxu0 %v3803_v53  ;;  %v3811_v14 = vpack.c.bf16 %v145_v9, %v141_v8  ;;  %v144_v16 = vld [vmem:[#allocation4 + $0x1a0] sm:$0xff]  ;;  %v142_v17 = vld [vmem:[#allocation4 + $0x190] sm:$0xff]  ;;  %v3843_v18 = vpack.c.bf16 %v147_v11, %v143_v10  ;;  %v149_v20 = vld [vmem:[#allocation4 + $0x1c8] sm:$0xff] }
  0x5b   :  { %3836 = vmatprep.subr.bf16.mxu1 %v3835_v57  ;;  %v146_v19 = vld [vmem:[#allocation4 + $0x1b0] sm:$0xff]  ;;  %v153_v21 = vld [vmem:[#allocation4 + $0x1e8] sm:$0xff]  ;;  %v151_v22 = vld [vmem:[#allocation4 + $0x1d8] sm:$0xff]  ;;  %v3813_v24 = vpack.c.bf16 %v144_v16, %v140_v15 }
  0x5c   :  { %v155_v23 = vld [vmem:[#allocation4 + $0x1f8] sm:$0xff]  ;;  %v3845_v25 = vpack.c.bf16 %v146_v19, %v142_v17  ;;  %v3815_v26 = vpack.c.bf16 %v153_v21, %v149_v20  ;;  %v148_v27 = vld [vmem:[#allocation4 + $0x1c0] sm:$0xff]  ;;  %v150_v29 = vld [vmem:[#allocation4 + $0x1d0] sm:$0xff] }
  0x5d   :  { %3806 = vmatpush1.bf16.msra.mxu0 %v3805_v63  ;;  %v152_v28 = vld [vmem:[#allocation4 + $0x1e0] sm:$0xff]  ;;  %v3847_v30 = vpack.c.bf16 %v155_v23, %v151_v22  ;;  %v154_v31 = vld [vmem:[#allocation4 + $0x1f0] sm:$0xff]  ;;  %v437_v32 = vld [vmem:[#allocation6 + $0x8] sm:$0xff] }
  0x5e   :  { %3838 = vmatpush1.bf16.msra.mxu1 %v3837_v1  ;;  %3808 = vmatprep.subr.bf16.mxu0 %v3807_v2  ;;  %v441_v33 = vld [vmem:[#allocation6 + $0x28] sm:$0xff]  ;;  %v439_v34 = vld [vmem:[#allocation6 + $0x18] sm:$0xff]  ;;  %v3817_v36 = vpack.c.bf16 %v152_v28, %v148_v27  ;;  %v3849_v37 = vpack.c.bf16 %v154_v31, %v150_v29  ;;  %v436_v39 = vld [vmem:[#allocation6] sm:$0xff] }
  0x5f   :  { %3840 = vmatprep.subr.bf16.mxu1 %v3839_v6  ;;  %v443_v35 = vld [vmem:[#allocation6 + $0x38] sm:$0xff]  ;;  %v5557_v38 = vpack.c.bf16 %v441_v33, %v437_v32  ;;  %v440_v40 = vld [vmem:[#allocation6 + $0x20] sm:$0xff]  ;;  %v438_v42 = vld [vmem:[#allocation6 + $0x10] sm:$0xff] }
  0x60   :  { %v5559_v41 = vpack.c.bf16 %v443_v35, %v439_v34  ;;  %v442_v43 = vld [vmem:[#allocation6 + $0x30] sm:$0xff]  ;;  %v445_v44 = vld [vmem:[#allocation6 + $0x48] sm:$0xff]  ;;  %v84_v46 = vld [vmem:[%s6525_s0] sm:$0xff]  ;;  %v5564_v47 = vpack.c.bf16 %v440_v40, %v436_v39 }
  0x61   :  { %3810 = vmatpush1.bf16.msra.mxu0 %v3809_v12  ;;  %v449_v45 = vld [vmem:[#allocation6 + $0x68] sm:$0xff]  ;;  %v447_v48 = vld [vmem:[#allocation6 + $0x58] sm:$0xff]  ;;  %v5567_v50 = vpack.c.bf16 %v442_v43, %v438_v42  ;;  %v444_v51 = vld [vmem:[#allocation6 + $0x40] sm:$0xff] }
  0x62   :  { %3842 = vmatpush1.bf16.msra.mxu1 %v3841_v13  ;;  %3812 = vmatprep.subr.bf16.mxu0 %v3811_v14  ;;  %v451_v49 = vld [vmem:[#allocation6 + $0x78] sm:$0xff]  ;;  %v448_v52 = vld [vmem:[#allocation6 + $0x60] sm:$0xff]  ;;  %v5570_v53 = vpack.c.bf16 %v449_v45, %v445_v44  ;;  %v446_v54 = vld [vmem:[#allocation6 + $0x50] sm:$0xff] }
  0x63   :  { %3844 = vmatprep.subr.bf16.mxu1 %v3843_v18  ;;  %v450_v55 = vld [vmem:[#allocation6 + $0x70] sm:$0xff]  ;;  %v5572_v56 = vpack.c.bf16 %v451_v49, %v447_v48  ;;  %v453_v57 = vld [vmem:[#allocation6 + $0x88] sm:$0xff]  ;;  %v5578_v60 = vpack.c.bf16 %v448_v52, %v444_v51  ;;  %v455_v61 = vld [vmem:[#allocation6 + $0x98] sm:$0xff] }
  0x64   :  { %v457_v58 = vld [vmem:[#allocation6 + $0xa8] sm:$0xff]  ;;  %v459_v62 = vld [vmem:[#allocation6 + $0xb8] sm:$0xff]  ;;  %v5582_v63 = vpack.c.bf16 %v450_v55, %v446_v54  ;;  %v452_v1 = vld [vmem:[#allocation6 + $0x80] sm:$0xff] }
  0x65   :  { %3814 = vmatpush1.bf16.msra.mxu0 %v3813_v24  ;;  %v85_v59 = vld [vmem:[%s6525_s0 + $0x8] sm:$0xff]  ;;  %v456_v2 = vld [vmem:[#allocation6 + $0xa0] sm:$0xff]  ;;  %v5586_v3 = vpack.c.bf16 %v457_v58, %v453_v57  ;;  %v454_v4 = vld [vmem:[#allocation6 + $0x90] sm:$0xff]  ;;  %v5589_v6 = vpack.c.bf16 %v459_v62, %v455_v61 }
  0x66   :  { %3846 = vmatpush1.bf16.msra.mxu1 %v3845_v25  ;;  %3816 = vmatprep.subr.bf16.mxu0 %v3815_v26  ;;  %v458_v5 = vld [vmem:[#allocation6 + $0xb0] sm:$0xff]  ;;  %v461_v7 = vld [vmem:[#allocation6 + $0xc8] sm:$0xff]  ;;  %v5595_v10 = vpack.c.bf16 %v456_v2, %v452_v1  ;;  %v463_v11 = vld [vmem:[#allocation6 + $0xd8] sm:$0xff] }
  0x67   :  { %3848 = vmatprep.subr.bf16.mxu1 %v3847_v30  ;;  %v465_v8 = vld [vmem:[#allocation6 + $0xe8] sm:$0xff]  ;;  %v86_v9 = vld [vmem:[%s6525_s0 + $0x10] sm:$0xff]  ;;  %v467_v12 = vld [vmem:[#allocation6 + $0xf8] sm:$0xff]  ;;  %v5599_v13 = vpack.c.bf16 %v458_v5, %v454_v4 }
  0x68   :  { %v460_v14 = vld [vmem:[#allocation6 + $0xc0] sm:$0xff]  ;;  %v5603_v16 = vpack.c.bf16 %v465_v8, %v461_v7  ;;  %v462_v17 = vld [vmem:[#allocation6 + $0xd0] sm:$0xff]  ;;  %v5606_v19 = vpack.c.bf16 %v467_v12, %v463_v11  ;;  %v469_v20 = vld [vmem:[#allocation6 + $0x108] sm:$0xff] }
  0x69   :  { %3818 = vmatpush1.bf16.msra.mxu0 %v3817_v36  ;;  %v464_v15 = vld [vmem:[#allocation6 + $0xe0] sm:$0xff]  ;;  %v466_v18 = vld [vmem:[#allocation6 + $0xf0] sm:$0xff]  ;;  %v473_v21 = vld [vmem:[#allocation6 + $0x128] sm:$0xff] }
  0x6a   :  { %3850 = vmatpush1.bf16.msra.mxu1 %v3849_v37  ;;  %3852 = vmatprep.subr.bf16.mxu0 %v5557_v38  ;;  %v87_v22 = vld [vmem:[%s6525_s0 + $0x18] sm:$0xff]  ;;  %v5612_v23 = vpack.c.bf16 %v464_v15, %v460_v14  ;;  %v5616_v26 = vpack.c.bf16 %v466_v18, %v462_v17  ;;  %v468_v27 = vld [vmem:[#allocation6 + $0x100] sm:$0xff]  ;;  %v5620_v29 = vpack.c.bf16 %v473_v21, %v469_v20  ;;  %v470_v30 = vld [vmem:[#allocation6 + $0x110] sm:$0xff] }
  0x6b   :  { %3884 = vmatprep.subr.bf16.mxu1 %v5559_v41  ;;  %v471_v24 = vld [vmem:[#allocation6 + $0x118] sm:$0xff]  ;;  %v472_v28 = vld [vmem:[#allocation6 + $0x120] sm:$0xff]  ;;  %v474_v31 = vld [vmem:[#allocation6 + $0x130] sm:$0xff] }
  0x6c   :  { %243 = vmatmul.mubr.f32.vlgmr.msra.gmra.mrb[0].mxu0 %v84_v46  ;;  %v475_v25 = vld [vmem:[#allocation6 + $0x138] sm:$0xff]  ;;  %v477_v33 = vld [vmem:[#allocation6 + $0x148] sm:$0xff]  ;;  %v88_v35 = vld [vmem:[%s6525_s0 + $0x20] sm:$0xff]  ;;  %v5629_v36 = vpack.c.bf16 %v472_v28, %v468_v27  ;;  %v5633_v40 = vpack.c.bf16 %v474_v31, %v470_v30  ;;  %v158_v28 = vlaneseq }
  0x6d   :  { %356 = vmatmul.mubr.f32.vlgmr.msra.gmra.mrb[0].mxu1 %v84_v46  ;;  %3854 = vmatpush1.bf16.msra.mxu0 %v5564_v47  ;;  %v5623_v32 = vpack.c.bf16 %v475_v25, %v471_v24  ;;  %v481_v34 = vld [vmem:[#allocation6 + $0x168] sm:$0xff]  ;;  %v479_v37 = vld [vmem:[#allocation6 + $0x158] sm:$0xff]  ;;  %v476_v42 = vld [vmem:[#allocation6 + $0x140] sm:$0xff] }
  0x6e   :  { %3886 = vmatpush1.bf16.msra.mxu1 %v5567_v50  ;;  %248 = vmatprep.mubr.f32.mxu0 %v5430_v0  ;;  %v483_v39 = vld [vmem:[#allocation6 + $0x178] sm:$0xff]  ;;  %v480_v43 = vld [vmem:[#allocation6 + $0x160] sm:$0xff]  ;;  %v5637_v44 = vpack.c.bf16 %v481_v34, %v477_v33  ;;  %v478_v45 = vld [vmem:[#allocation6 + $0x150] sm:$0xff]  ;;  %v5731_v30 = vshrl.u32 %v158_v28, 7 }
  0x6f   :  { %361 = vmatprep.mubr.f32.mxu1 %v5430_v0  ;;  %3856 = vmatprep.subr.bf16.mxu0 %v5570_v53  ;;  %v482_v46 = vld [vmem:[#allocation6 + $0x170] sm:$0xff]  ;;  %v5640_v48 = vpack.c.bf16 %v483_v39, %v479_v37  ;;  %v485_v49 = vld [vmem:[#allocation6 + $0x188] sm:$0xff]  ;;  %v5646_v54 = vpack.c.bf16 %v480_v43, %v476_v42  ;;  %v487_v55 = vld [vmem:[#allocation6 + $0x198] sm:$0xff] }
  0x70   :  { %249 = vmatmul.mubr.f32.gmra.mrb[2].mxu0 %v85_v59  ;;  %3888 = vmatprep.subr.bf16.mxu1 %v5572_v56  ;;  %v489_v51 = vld [vmem:[#allocation6 + $0x1a8] sm:$0xff]  ;;  %v491_v57 = vld [vmem:[#allocation6 + $0x1b8] sm:$0xff]  ;;  %v5650_v58 = vpack.c.bf16 %v482_v46, %v478_v45  ;;  %v488_v61 = vld [vmem:[#allocation6 + $0x1a0] sm:$0xff]  ;;  %v160_v31 = vsub.s32 0, %v5731_v30  ;;  %v164_v34 = vsub.s32 1, %v5731_v30  ;;  %v172_v42 = vsub.s32 3, %v5731_v30 }
  0x71   :  { %362 = vmatmul.mubr.f32.gmra.mrb[2].mxu1 %v85_v59  ;;  %3858 = vmatpush1.bf16.msra.mxu0 %v5578_v60  ;;  %v89_v52 = vld [vmem:[%s6525_s0 + $0x28] sm:$0xff]  ;;  %v484_v59 = vld [vmem:[#allocation6 + $0x180] sm:$0xff]  ;;  %v5654_v62 = vpack.c.bf16 %v489_v51, %v485_v49  ;;  %v486_v1 = vld [vmem:[#allocation6 + $0x190] sm:$0xff]  ;;  %v5657_v4 = vpack.c.bf16 %v491_v57, %v487_v55 }
  0x72   :  { %3890 = vmatpush1.bf16.msra.mxu1 %v5582_v63  ;;  %254 = vmatprep.mubr.f32.mxu0 %v5430_v0  ;;  %v490_v2 = vld [vmem:[#allocation6 + $0x1b0] sm:$0xff]  ;;  %v493_v5 = vld [vmem:[#allocation6 + $0x1c8] sm:$0xff]  ;;  %v495_v11 = vld [vmem:[#allocation6 + $0x1d8] sm:$0xff] }
  0x73   :  { %367 = vmatprep.mubr.f32.mxu1 %v5430_v0  ;;  %3860 = vmatprep.subr.bf16.mxu0 %v5586_v3  ;;  %v497_v7 = vld [vmem:[#allocation6 + $0x1e8] sm:$0xff]  ;;  %v90_v8 = vld [vmem:[%s6525_s0 + $0x30] sm:$0xff]  ;;  %v499_v12 = vld [vmem:[#allocation6 + $0x1f8] sm:$0xff]  ;;  %v5667_v14 = vpack.c.bf16 %v490_v2, %v486_v1 }
  0x74   :  { %255 = vmatmul.mubr.f32.gmra.mrb[4].mxu0 %v86_v9  ;;  %3892 = vmatprep.subr.bf16.mxu1 %v5589_v6  ;;  %v492_v15 = vld [vmem:[#allocation6 + $0x1c0] sm:$0xff]  ;;  %v5671_v18 = vpack.c.bf16 %v497_v7, %v493_v5  ;;  %v494_v20 = vld [vmem:[#allocation6 + $0x1d0] sm:$0xff]  ;;  %v91_v24 = vld [vmem:[%s6525_s0 + $0x38] sm:$0xff] }
  0x75   :  { %368 = vmatmul.mubr.f32.gmra.mrb[4].mxu1 %v86_v9  ;;  %3862 = vmatpush1.bf16.msra.mxu0 %v5595_v10  ;;  %v5663_v9 = vpack.c.bf16 %v488_v61, %v484_v59  ;;  %v496_v17 = vld [vmem:[#allocation6 + $0x1e0] sm:$0xff]  ;;  %v498_v21 = vld [vmem:[#allocation6 + $0x1f0] sm:$0xff]  ;;  %v168_v59 = vsub.s32 2, %v5731_v30 }
  0x76   :  { %3894 = vmatpush1.bf16.msra.mxu1 %v5599_v13  ;;  %260 = vmatprep.mubr.f32.mxu0 %v5430_v0  ;;  %v5680_v25 = vpack.c.bf16 %v496_v17, %v492_v15  ;;  %v5684_v27 = vpack.c.bf16 %v498_v21, %v494_v20  ;;  %v156_v33 = vld [vmem:[%s6528_s3] sm:$0xf] }
  0x77   :  { %373 = vmatprep.mubr.f32.mxu1 %v5430_v0  ;;  %3864 = vmatprep.subr.bf16.mxu0 %v5603_v16  ;;  %v5744_v37 = vrot.slane %v156_v33, %v164_v34  ;;  %v5751_v57 = vrot.slane %v156_v33, %v172_v42  ;;  %v5757_v1 = vrot.slane %v156_v33, %v168_v59 }
  0x78   :  { %261 = vmatmul.mubr.f32.gmra.mrb[6].mxu0 %v87_v22  ;;  %3896 = vmatprep.subr.bf16.mxu1 %v5606_v19 }
  0x79   :  { %374 = vmatmul.mubr.f32.gmra.mrb[6].mxu1 %v87_v22  ;;  %3866 = vmatpush1.bf16.msra.mxu0 %v5612_v23  ;;  %v5674_v22 = vpack.c.bf16 %v499_v12, %v495_v11 }
  0x7a   :  { %3898 = vmatpush1.bf16.msra.mxu1 %v5616_v26  ;;  %266 = vmatprep.mubr.f32.mxu0 %v5430_v0 }
  0x7b   :  { %379 = vmatprep.mubr.f32.mxu1 %v5430_v0  ;;  %3868 = vmatprep.subr.bf16.mxu0 %v5620_v29 }
  0x7c   :  { %267 = vmatmul.mubr.f32.gmra.mrb[8].mxu0 %v88_v35  ;;  %3900 = vmatprep.subr.bf16.mxu1 %v5623_v32 }
  0x7d   :  { %380 = vmatmul.mubr.f32.gmra.mrb[8].mxu1 %v88_v35  ;;  %3870 = vmatpush1.bf16.msra.mxu0 %v5629_v36  ;;  %v5740_v35 = vrot.slane %v156_v33, %v160_v31 }
  0x7e   :  { %3902 = vmatpush1.bf16.msra.mxu1 %v5633_v40  ;;  %272 = vmatprep.mubr.f32.mxu0 %v5430_v0 }
  0x7f   :  { %385 = vmatprep.mubr.f32.mxu1 %v5430_v0  ;;  %3872 = vmatprep.subr.bf16.mxu0 %v5637_v44 }
  0x80   :  { %273 = vmatmul.mubr.f32.gmra.mrb[10].mxu0 %v89_v52  ;;  %3904 = vmatprep.subr.bf16.mxu1 %v5640_v48 }
  0x81   :  { %386 = vmatmul.mubr.f32.gmra.mrb[10].mxu1 %v89_v52  ;;  %3874 = vmatpush1.bf16.msra.mxu0 %v5646_v54 }
  0x82   :  { %3906 = vmatpush1.bf16.msra.mxu1 %v5650_v58  ;;  %278 = vmatprep.mubr.f32.mxu0 %v5430_v0 }
  0x83   :  { %391 = vmatprep.mubr.f32.mxu1 %v5430_v0  ;;  %3876 = vmatprep.subr.bf16.mxu0 %v5654_v62 }
  0x84   :  { %279 = vmatmul.mubr.f32.gmra.mrb[12].mxu0 %v90_v8  ;;  %3908 = vmatprep.subr.bf16.mxu1 %v5657_v4 }
  0x85   :  { %392 = vmatmul.mubr.f32.gmra.mrb[12].mxu1 %v90_v8  ;;  %3878 = vmatpush1.bf16.msra.mxu0 %v5663_v9 }
  0x86   :  { %3910 = vmatpush1.bf16.msra.mxu1 %v5667_v14  ;;  %284 = vmatprep.mubr.f32.mxu0 %v5430_v0 }
  0x87   :  { %397 = vmatprep.mubr.f32.mxu1 %v5430_v0  ;;  %3880 = vmatprep.subr.bf16.mxu0 %v5671_v18 }
  0x88   :  { %285 = vmatmul.mubr.f32.gmra.mrb[14].mxu0 %v91_v24  ;;  %3912 = vmatprep.subr.bf16.mxu1 %v5674_v22 }
  0x89   :  { %398 = vmatmul.mubr.f32.gmra.mrb[14].mxu1 %v91_v24  ;;  %3882 = vmatpush1.bf16.msra.mxu0 %v5680_v25 }
  0x8a   :  { %3914 = vmatpush1.bf16.msra.mxu1 %v5684_v27  ;;  %568 = vmatprep.mubr.f32.mxu0 %v5430_v0 }
  0x8b   :  { %639 = vmatprep.mubr.f32.mxu1 %v5430_v0  ;;  %3916 = vmatprep.subr.bf16.mxu0 %v5557_v38 }
  0x8c   :  { %569 = vmatmul.mubr.f32.vlgmr.msra.gmra.mrb[0].mxu0 %v5430_v0  ;;  %3948 = vmatprep.subr.bf16.mxu1 %v5559_v41 }
  0x8d   :  { %640 = vmatmul.mubr.f32.vlgmr.msra.gmra.mrb[0].mxu1 %v5430_v0  ;;  %3918 = vmatpush1.bf16.msra.mxu0 %v5564_v47 }
  0x8e   :  { %3950 = vmatpush1.bf16.msra.mxu1 %v5567_v50  ;;  %3920 = vmatprep.subr.bf16.mxu0 %v5570_v53 }
  0x8f   :  { %3952 = vmatprep.subr.bf16.mxu1 %v5572_v56  ;;  %743 = vmatprep.mubr.f32.mxu0 %v5430_v0 }
  0x90   :  { %814 = vmatprep.mubr.f32.mxu1 %v5430_v0 }
  0x91   :  { %3922 = vmatpush1.bf16.msra.mxu0 %v5578_v60 }
  0x92   :  { %3954 = vmatpush1.bf16.msra.mxu1 %v5582_v63  ;;  %3924 = vmatprep.subr.bf16.mxu0 %v5586_v3 }
  0x93   :  { %3956 = vmatprep.subr.bf16.mxu1 %v5589_v6 }
  0x95   :  { %3926 = vmatpush1.bf16.msra.mxu0 %v5595_v10 }
  0x96   :  { %3958 = vmatpush1.bf16.msra.mxu1 %v5599_v13  ;;  %3928 = vmatprep.subr.bf16.mxu0 %v5603_v16 }
  0x97   :  { %3960 = vmatprep.subr.bf16.mxu1 %v5606_v19 }
  0x99   :  { %3930 = vmatpush1.bf16.msra.mxu0 %v5612_v23 }
  0x9a   :  { %3962 = vmatpush1.bf16.msra.mxu1 %v5616_v26  ;;  %3932 = vmatprep.subr.bf16.mxu0 %v5620_v29 }
  0x9b   :  { %3964 = vmatprep.subr.bf16.mxu1 %v5623_v32 }
  0x9d   :  { %3934 = vmatpush1.bf16.msra.mxu0 %v5629_v36 }
  0x9e   :  { %3966 = vmatpush1.bf16.msra.mxu1 %v5633_v40  ;;  %3936 = vmatprep.subr.bf16.mxu0 %v5637_v44 }
  0x9f   :  { %3968 = vmatprep.subr.bf16.mxu1 %v5640_v48 }
  0xa1   :  { %3938 = vmatpush1.bf16.msra.mxu0 %v5646_v54 }
  0xa2   :  { %3970 = vmatpush1.bf16.msra.mxu1 %v5650_v58  ;;  %3940 = vmatprep.subr.bf16.mxu0 %v5654_v62 }
  0xa3   :  { %3972 = vmatprep.subr.bf16.mxu1 %v5657_v4 }
  0xa5   :  { %3942 = vmatpush1.bf16.msra.mxu0 %v5663_v9 }
  0xa6   :  { %3974 = vmatpush1.bf16.msra.mxu1 %v5667_v14  ;;  %3944 = vmatprep.subr.bf16.mxu0 %v5671_v18 }
  0xa7   :  { %3976 = vmatprep.subr.bf16.mxu1 %v5674_v22 }
  0xa9   :  { %3946 = vmatpush1.bf16.msra.mxu0 %v5680_v25 }
  0xaa   :  { %3978 = vmatpush1.bf16.msra.mxu1 %v5684_v27  ;;  %3980 = vmatprep.subr.bf16.mxu0 %v5557_v38 }
  0xab   :  { %4012 = vmatprep.subr.bf16.mxu1 %v5559_v41 }
 0x15f   :  { %v570_v39 = vpop.f32.mrb[0].mxu0 }
 0x160   :  { %v4939_v43 = vadd.f32 %v570_v39, %v5740_v35  ;;  %v641_v45 = vpop.f32.mrb[0].mxu1  ;;  %v572_v46 = vpop.f32.mrb[1].mxu0 }
 0x161   :  { %v4940_v49 = vadd.f32 %v572_v46, %v5744_v37  ;;  %v643_v51 = vpop.f32.mrb[1].mxu1  ;;  %v4955_v5 = vadd.f32 %v641_v45, %v5757_v1 }
 0x162   :  { %v3737_v52 = vmul.f32 -1.442695, %v4939_v43  ;;  %v4956_v61 = vadd.f32 %v643_v51, %v5751_v57 }
 0x163   :  { %v3738_v55 = vmul.f32 -1.442695, %v4940_v49 }
 0x164   :  { %5074 = vpow2.f32 %v3737_v52  ;;  %v3739_v2 = vmul.f32 -1.442695, %v4956_v61 }
 0x165   :  { %5076 = vpow2.f32 %v3738_v55 }
 0x166   :  { %5078 = vpow2.f32 %v3739_v2 }
 0x167   :  { %5080 = vtanh.f32 %v4955_v5 }
 0x16e   :  { %v5075_v7 = vpop.eup %5074 }
 0x16f   :  { %v5077_v8 = vpop.eup %5076  ;;  %v653_v11 = vadd.f32 1.0, %v5075_v7 }
 0x170   :  { %v659_v12 = vadd.f32 1.0, %v5077_v8  ;;  %v5079_v15 = vpop.eup %5078 }
 0x171   :  { %5082 = vrcp.f32 %v653_v11  ;;  %v5081_v17 = vpop.eup %5080  ;;  %v666_v28 = vadd.f32 1.0, %v5079_v15 }
 0x172   :  { %5084 = vrcp.f32 %v659_v12 }
 0x173   :  { %5086 = vrcp.f32 %v666_v28 }
 0x17b   :  { %v5083_v20 = vpop.eup %5082 }
 0x17c   :  { %v5085_v21 = vpop.eup %5084  ;;  %v670_v24 = vmul.f32 %v5083_v20, %v5081_v17 }
 0x17d   :  { %v669_v39 = vmul.f32 0.0, %v5085_v21  ;;  %v5087_v43 = vpop.eup %5086 }
 0x17f   :  { %v5760_v33 = vadd.f32 %v670_v24, %v669_v39 }
 0x181   :  { %5088 = vtanh.f32 %v5760_v33 }
 0x18b   :  { %v5089_v45 = vpop.eup %5088 }
 0x18c   :  { %v5763_v46 = vmul.f32 %v5089_v45, %v5087_v43 }
 0x18e   :  { %744 = vmatmul.mubr.f32.vlgmr.msra.gmra.mrb[2].mxu0 %v5763_v46  ;;  %815 = vmatmul.mubr.f32.vlgmr.msra.gmra.mrb[2].mxu1 %v5763_v46 }
 0x18f   :  { %3982 = vmatpush1.bf16.msra.mxu0 %v5564_v47  ;;  %4014 = vmatpush1.bf16.msra.mxu1 %v5567_v50 }
 0x190   :  { %3984 = vmatprep.subr.bf16.mxu0 %v5570_v53  ;;  %4016 = vmatprep.subr.bf16.mxu1 %v5572_v56 }
 0x191   :  { %918 = vmatprep.mubr.f32.mxu0 %v5430_v0  ;;  %989 = vmatprep.mubr.f32.mxu1 %v5430_v0 }
 0x193   :  { %3986 = vmatpush1.bf16.msra.mxu0 %v5578_v60  ;;  %4018 = vmatpush1.bf16.msra.mxu1 %v5582_v63 }
 0x194   :  { %3988 = vmatprep.subr.bf16.mxu0 %v5586_v3  ;;  %4020 = vmatprep.subr.bf16.mxu1 %v5589_v6 }
 0x197   :  { %3990 = vmatpush1.bf16.msra.mxu0 %v5595_v10  ;;  %4022 = vmatpush1.bf16.msra.mxu1 %v5599_v13 }
 0x198   :  { %3992 = vmatprep.subr.bf16.mxu0 %v5603_v16  ;;  %4024 = vmatprep.subr.bf16.mxu1 %v5606_v19 }
 0x19b   :  { %3994 = vmatpush1.bf16.msra.mxu0 %v5612_v23  ;;  %4026 = vmatpush1.bf16.msra.mxu1 %v5616_v26 }
 0x19c   :  { %3996 = vmatprep.subr.bf16.mxu0 %v5620_v29  ;;  %4028 = vmatprep.subr.bf16.mxu1 %v5623_v32 }
 0x19f   :  { %3998 = vmatpush1.bf16.msra.mxu0 %v5629_v36  ;;  %4030 = vmatpush1.bf16.msra.mxu1 %v5633_v40 }
 0x1a0   :  { %4000 = vmatprep.subr.bf16.mxu0 %v5637_v44  ;;  %4032 = vmatprep.subr.bf16.mxu1 %v5640_v48 }
 0x1a3   :  { %4002 = vmatpush1.bf16.msra.mxu0 %v5646_v54  ;;  %4034 = vmatpush1.bf16.msra.mxu1 %v5650_v58 }
 0x1a4   :  { %4004 = vmatprep.subr.bf16.mxu0 %v5654_v62  ;;  %4036 = vmatprep.subr.bf16.mxu1 %v5657_v4 }
 0x1a7   :  { %4006 = vmatpush1.bf16.msra.mxu0 %v5663_v9  ;;  %4038 = vmatpush1.bf16.msra.mxu1 %v5667_v14 }
 0x1a8   :  { %4008 = vmatprep.subr.bf16.mxu0 %v5671_v18  ;;  %4040 = vmatprep.subr.bf16.mxu1 %v5674_v22 }
 0x1ab   :  { %4010 = vmatpush1.bf16.msra.mxu0 %v5680_v25  ;;  %4042 = vmatpush1.bf16.msra.mxu1 %v5684_v27 }
 0x1ac   :  { %4044 = vmatprep.subr.bf16.mxu0 %v5557_v38  ;;  %4076 = vmatprep.subr.bf16.mxu1 %v5559_v41 }
 0x261   :  { %v745_v49 = vpop.f32.mrb[2].mxu0  ;;  %v816_v51 = vpop.f32.mrb[2].mxu1 }
 0x262   :  { %v4941_v52 = vadd.f32 %v745_v49, %v5740_v35  ;;  %v747_v55 = vpop.f32.mrb[3].mxu0  ;;  %v818_v61 = vpop.f32.mrb[3].mxu1  ;;  %v4957_v12 = vadd.f32 %v816_v51, %v5757_v1 }
 0x263   :  { %v4942_v2 = vadd.f32 %v747_v55, %v5744_v37  ;;  %v4958_v8 = vadd.f32 %v818_v61, %v5751_v57 }
 0x264   :  { %v3740_v5 = vmul.f32 -1.442695, %v4941_v52 }
 0x265   :  { %v3741_v7 = vmul.f32 -1.442695, %v4942_v2  ;;  %v3742_v11 = vmul.f32 -1.442695, %v4958_v8 }
 0x266   :  { %5090 = vpow2.f32 %v3740_v5 }
 0x267   :  { %5092 = vpow2.f32 %v3741_v7 }
 0x268   :  { %5094 = vpow2.f32 %v3742_v11 }
 0x269   :  { %5096 = vtanh.f32 %v4957_v12 }
 0x270   :  { %v5091_v15 = vpop.eup %5090 }
 0x271   :  { %v5093_v17 = vpop.eup %5092  ;;  %v828_v20 = vadd.f32 1.0, %v5091_v15 }
 0x272   :  { %v834_v21 = vadd.f32 1.0, %v5093_v17  ;;  %v5095_v24 = vpop.eup %5094 }
 0x273   :  { %5098 = vrcp.f32 %v828_v20  ;;  %v5097_v28 = vpop.eup %5096  ;;  %v841_v49 = vadd.f32 1.0, %v5095_v24 }
 0x274   :  { %5100 = vrcp.f32 %v834_v21 }
 0x275   :  { %5102 = vrcp.f32 %v841_v49 }
 0x27d   :  { %v5099_v39 = vpop.eup %5098 }
 0x27e   :  { %v5101_v43 = vpop.eup %5100  ;;  %v845_v45 = vmul.f32 %v5099_v39, %v5097_v28 }
 0x27f   :  { %v844_v52 = vmul.f32 %v5101_v43, %v5760_v33  ;;  %v5103_v51 = vpop.eup %5102 }
 0x281   :  { %v5806_v55 = vadd.f32 %v845_v45, %v844_v52 }
 0x283   :  { %5104 = vtanh.f32 %v5806_v55 }
 0x28d   :  { %v5105_v61 = vpop.eup %5104 }
 0x28e   :  { %v5809_v2 = vmul.f32 %v5105_v61, %v5103_v51 }
 0x290   :  { %919 = vmatmul.mubr.f32.vlgmr.msra.gmra.mrb[4].mxu0 %v5809_v2  ;;  %990 = vmatmul.mubr.f32.vlgmr.msra.gmra.mrb[4].mxu1 %v5809_v2 }
 0x291   :  { %4046 = vmatpush1.bf16.msra.mxu0 %v5564_v47  ;;  %4078 = vmatpush1.bf16.msra.mxu1 %v5567_v50 }
 0x292   :  { %4048 = vmatprep.subr.bf16.mxu0 %v5570_v53  ;;  %4080 = vmatprep.subr.bf16.mxu1 %v5572_v56 }
 0x293   :  { %1093 = vmatprep.mubr.f32.mxu0 %v5430_v0  ;;  %1164 = vmatprep.mubr.f32.mxu1 %v5430_v0 }
 0x295   :  { %4050 = vmatpush1.bf16.msra.mxu0 %v5578_v60  ;;  %4082 = vmatpush1.bf16.msra.mxu1 %v5582_v63 }
 0x296   :  { %4052 = vmatprep.subr.bf16.mxu0 %v5586_v3  ;;  %4084 = vmatprep.subr.bf16.mxu1 %v5589_v6 }
 0x299   :  { %4054 = vmatpush1.bf16.msra.mxu0 %v5595_v10  ;;  %4086 = vmatpush1.bf16.msra.mxu1 %v5599_v13 }
 0x29a   :  { %4056 = vmatprep.subr.bf16.mxu0 %v5603_v16  ;;  %4088 = vmatprep.subr.bf16.mxu1 %v5606_v19 }
 0x29d   :  { %4058 = vmatpush1.bf16.msra.mxu0 %v5612_v23  ;;  %4090 = vmatpush1.bf16.msra.mxu1 %v5616_v26 }
 0x29e   :  { %4060 = vmatprep.subr.bf16.mxu0 %v5620_v29  ;;  %4092 = vmatprep.subr.bf16.mxu1 %v5623_v32 }
 0x2a1   :  { %4062 = vmatpush1.bf16.msra.mxu0 %v5629_v36  ;;  %4094 = vmatpush1.bf16.msra.mxu1 %v5633_v40 }
 0x2a2   :  { %4064 = vmatprep.subr.bf16.mxu0 %v5637_v44  ;;  %4096 = vmatprep.subr.bf16.mxu1 %v5640_v48 }
 0x2a5   :  { %4066 = vmatpush1.bf16.msra.mxu0 %v5646_v54  ;;  %4098 = vmatpush1.bf16.msra.mxu1 %v5650_v58 }
 0x2a6   :  { %4068 = vmatprep.subr.bf16.mxu0 %v5654_v62  ;;  %4100 = vmatprep.subr.bf16.mxu1 %v5657_v4 }
 0x2a9   :  { %4070 = vmatpush1.bf16.msra.mxu0 %v5663_v9  ;;  %4102 = vmatpush1.bf16.msra.mxu1 %v5667_v14 }
 0x2aa   :  { %4072 = vmatprep.subr.bf16.mxu0 %v5671_v18  ;;  %4104 = vmatprep.subr.bf16.mxu1 %v5674_v22 }
 0x2ad   :  { %4074 = vmatpush1.bf16.msra.mxu0 %v5680_v25  ;;  %4106 = vmatpush1.bf16.msra.mxu1 %v5684_v27 }
 0x2ae   :  { %4108 = vmatprep.subr.bf16.mxu0 %v5557_v38  ;;  %4140 = vmatprep.subr.bf16.mxu1 %v5559_v41 }
 0x363   :  { %v920_v33 = vpop.f32.mrb[4].mxu0  ;;  %v991_v5 = vpop.f32.mrb[4].mxu1 }
 0x364   :  { %v4943_v7 = vadd.f32 %v920_v33, %v5740_v35  ;;  %v922_v8 = vpop.f32.mrb[5].mxu0  ;;  %v993_v11 = vpop.f32.mrb[5].mxu1  ;;  %v4959_v24 = vadd.f32 %v991_v5, %v5757_v1 }
 0x365   :  { %v4944_v12 = vadd.f32 %v922_v8, %v5744_v37  ;;  %v4960_v20 = vadd.f32 %v993_v11, %v5751_v57 }
 0x366   :  { %v3743_v15 = vmul.f32 -1.442695, %v4943_v7 }
 0x367   :  { %v3744_v17 = vmul.f32 -1.442695, %v4944_v12  ;;  %v3745_v21 = vmul.f32 -1.442695, %v4960_v20 }
 0x368   :  { %5106 = vpow2.f32 %v3743_v15 }
 0x369   :  { %5108 = vpow2.f32 %v3744_v17 }
 0x36a   :  { %5110 = vpow2.f32 %v3745_v21 }
 0x36b   :  { %5112 = vtanh.f32 %v4959_v24 }
 0x372   :  { %v5107_v28 = vpop.eup %5106 }
 0x373   :  { %v5109_v39 = vpop.eup %5108  ;;  %v1003_v43 = vadd.f32 1.0, %v5107_v28 }
 0x374   :  { %v1009_v45 = vadd.f32 1.0, %v5109_v39  ;;  %v5111_v49 = vpop.eup %5110 }
 0x375   :  { %5114 = vrcp.f32 %v1003_v43  ;;  %v5113_v52 = vpop.eup %5112  ;;  %v1016_v7 = vadd.f32 1.0, %v5111_v49 }
 0x376   :  { %5116 = vrcp.f32 %v1009_v45 }
 0x377   :  { %5118 = vrcp.f32 %v1016_v7 }
 0x37f   :  { %v5115_v51 = vpop.eup %5114 }
 0x380   :  { %v5117_v61 = vpop.eup %5116  ;;  %v1020_v33 = vmul.f32 %v5115_v51, %v5113_v52 }
 0x381   :  { %v1019_v8 = vmul.f32 %v5117_v61, %v5806_v55  ;;  %v5119_v5 = vpop.eup %5118 }
 0x383   :  { %v5852_v11 = vadd.f32 %v1020_v33, %v1019_v8 }
 0x385   :  { %5120 = vtanh.f32 %v5852_v11 }
 0x38f   :  { %v5121_v12 = vpop.eup %5120 }
 0x390   :  { %v5855_v15 = vmul.f32 %v5121_v12, %v5119_v5 }
 0x392   :  { %1094 = vmatmul.mubr.f32.vlgmr.msra.gmra.mrb[6].mxu0 %v5855_v15  ;;  %1165 = vmatmul.mubr.f32.vlgmr.msra.gmra.mrb[6].mxu1 %v5855_v15 }
 0x393   :  { %4110 = vmatpush1.bf16.msra.mxu0 %v5564_v47  ;;  %4142 = vmatpush1.bf16.msra.mxu1 %v5567_v50 }
 0x394   :  { %4112 = vmatprep.subr.bf16.mxu0 %v5570_v53  ;;  %4144 = vmatprep.subr.bf16.mxu1 %v5572_v56 }
 0x395   :  { %1268 = vmatprep.mubr.f32.mxu0 %v5430_v0  ;;  %1339 = vmatprep.mubr.f32.mxu1 %v5430_v0 }
 0x397   :  { %4114 = vmatpush1.bf16.msra.mxu0 %v5578_v60  ;;  %4146 = vmatpush1.bf16.msra.mxu1 %v5582_v63 }
 0x398   :  { %4116 = vmatprep.subr.bf16.mxu0 %v5586_v3  ;;  %4148 = vmatprep.subr.bf16.mxu1 %v5589_v6 }
 0x39b   :  { %4118 = vmatpush1.bf16.msra.mxu0 %v5595_v10  ;;  %4150 = vmatpush1.bf16.msra.mxu1 %v5599_v13 }
 0x39c   :  { %4120 = vmatprep.subr.bf16.mxu0 %v5603_v16  ;;  %4152 = vmatprep.subr.bf16.mxu1 %v5606_v19 }
 0x39f   :  { %4122 = vmatpush1.bf16.msra.mxu0 %v5612_v23  ;;  %4154 = vmatpush1.bf16.msra.mxu1 %v5616_v26 }
 0x3a0   :  { %4124 = vmatprep.subr.bf16.mxu0 %v5620_v29  ;;  %4156 = vmatprep.subr.bf16.mxu1 %v5623_v32 }
 0x3a3   :  { %4126 = vmatpush1.bf16.msra.mxu0 %v5629_v36  ;;  %4158 = vmatpush1.bf16.msra.mxu1 %v5633_v40 }
 0x3a4   :  { %4128 = vmatprep.subr.bf16.mxu0 %v5637_v44  ;;  %4160 = vmatprep.subr.bf16.mxu1 %v5640_v48 }
 0x3a7   :  { %4130 = vmatpush1.bf16.msra.mxu0 %v5646_v54  ;;  %4162 = vmatpush1.bf16.msra.mxu1 %v5650_v58 }
 0x3a8   :  { %4132 = vmatprep.subr.bf16.mxu0 %v5654_v62  ;;  %4164 = vmatprep.subr.bf16.mxu1 %v5657_v4 }
 0x3ab   :  { %4134 = vmatpush1.bf16.msra.mxu0 %v5663_v9  ;;  %4166 = vmatpush1.bf16.msra.mxu1 %v5667_v14 }
 0x3ac   :  { %4136 = vmatprep.subr.bf16.mxu0 %v5671_v18  ;;  %4168 = vmatprep.subr.bf16.mxu1 %v5674_v22 }
 0x3af   :  { %4138 = vmatpush1.bf16.msra.mxu0 %v5680_v25  ;;  %4170 = vmatpush1.bf16.msra.mxu1 %v5684_v27 }
 0x3b0   :  { %4172 = vmatprep.subr.bf16.mxu0 %v5557_v38  ;;  %4204 = vmatprep.subr.bf16.mxu1 %v5559_v41 }
 0x465   :  { %v1095_v55 = vpop.f32.mrb[6].mxu0  ;;  %v1166_v17 = vpop.f32.mrb[6].mxu1 }
 0x466   :  { %v4945_v20 = vadd.f32 %v1095_v55, %v5740_v35  ;;  %v1097_v21 = vpop.f32.mrb[7].mxu0  ;;  %v1168_v24 = vpop.f32.mrb[7].mxu1  ;;  %v4961_v52 = vadd.f32 %v1166_v17, %v5757_v1 }
 0x467   :  { %v4946_v28 = vadd.f32 %v1097_v21, %v5744_v37  ;;  %v4962_v45 = vadd.f32 %v1168_v24, %v5751_v57 }
 0x468   :  { %v3746_v39 = vmul.f32 -1.442695, %v4945_v20 }
 0x469   :  { %v3747_v43 = vmul.f32 -1.442695, %v4946_v28  ;;  %v3748_v49 = vmul.f32 -1.442695, %v4962_v45 }
 0x46a   :  { %5122 = vpow2.f32 %v3746_v39 }
 0x46b   :  { %5124 = vpow2.f32 %v3747_v43 }
 0x46c   :  { %5126 = vpow2.f32 %v3748_v49 }
 0x46d   :  { %5128 = vtanh.f32 %v4961_v52 }
 0x474   :  { %v5123_v51 = vpop.eup %5122 }
 0x475   :  { %v5125_v61 = vpop.eup %5124  ;;  %v1178_v33 = vadd.f32 1.0, %v5123_v51 }
 0x476   :  { %v1184_v7 = vadd.f32 1.0, %v5125_v61  ;;  %v5127_v8 = vpop.eup %5126 }
 0x477   :  { %5130 = vrcp.f32 %v1178_v33  ;;  %v5129_v5 = vpop.eup %5128  ;;  %v1191_v21 = vadd.f32 1.0, %v5127_v8 }
 0x478   :  { %5132 = vrcp.f32 %v1184_v7 }
 0x479   :  { %5134 = vrcp.f32 %v1191_v21 }
 0x481   :  { %v5131_v12 = vpop.eup %5130 }
 0x482   :  { %v5133_v55 = vpop.eup %5132  ;;  %v1195_v20 = vmul.f32 %v5131_v12, %v5129_v5 }
 0x483   :  { %v1194_v28 = vmul.f32 %v5133_v55, %v5852_v11  ;;  %v5135_v17 = vpop.eup %5134 }
 0x485   :  { %v5898_v24 = vadd.f32 %v1195_v20, %v1194_v28 }
 0x487   :  { %5136 = vtanh.f32 %v5898_v24 }
 0x491   :  { %v5137_v39 = vpop.eup %5136 }
 0x492   :  { %v5901_v43 = vmul.f32 %v5137_v39, %v5135_v17 }
 0x494   :  { %1269 = vmatmul.mubr.f32.vlgmr.msra.gmra.mrb[8].mxu0 %v5901_v43  ;;  %1340 = vmatmul.mubr.f32.vlgmr.msra.gmra.mrb[8].mxu1 %v5901_v43 }
 0x495   :  { %4174 = vmatpush1.bf16.msra.mxu0 %v5564_v47  ;;  %4206 = vmatpush1.bf16.msra.mxu1 %v5567_v50 }
 0x496   :  { %4176 = vmatprep.subr.bf16.mxu0 %v5570_v53  ;;  %4208 = vmatprep.subr.bf16.mxu1 %v5572_v56 }
 0x497   :  { %1443 = vmatprep.mubr.f32.mxu0 %v5430_v0  ;;  %1514 = vmatprep.mubr.f32.mxu1 %v5430_v0 }
 0x499   :  { %4178 = vmatpush1.bf16.msra.mxu0 %v5578_v60  ;;  %4210 = vmatpush1.bf16.msra.mxu1 %v5582_v63 }
 0x49a   :  { %4180 = vmatprep.subr.bf16.mxu0 %v5586_v3  ;;  %4212 = vmatprep.subr.bf16.mxu1 %v5589_v6 }
 0x49d   :  { %4182 = vmatpush1.bf16.msra.mxu0 %v5595_v10  ;;  %4214 = vmatpush1.bf16.msra.mxu1 %v5599_v13 }
 0x49e   :  { %4184 = vmatprep.subr.bf16.mxu0 %v5603_v16  ;;  %4216 = vmatprep.subr.bf16.mxu1 %v5606_v19 }
 0x4a1   :  { %4186 = vmatpush1.bf16.msra.mxu0 %v5612_v23  ;;  %4218 = vmatpush1.bf16.msra.mxu1 %v5616_v26 }
 0x4a2   :  { %4188 = vmatprep.subr.bf16.mxu0 %v5620_v29  ;;  %4220 = vmatprep.subr.bf16.mxu1 %v5623_v32 }
 0x4a5   :  { %4190 = vmatpush1.bf16.msra.mxu0 %v5629_v36  ;;  %4222 = vmatpush1.bf16.msra.mxu1 %v5633_v40 }
 0x4a6   :  { %4192 = vmatprep.subr.bf16.mxu0 %v5637_v44  ;;  %4224 = vmatprep.subr.bf16.mxu1 %v5640_v48 }
 0x4a9   :  { %4194 = vmatpush1.bf16.msra.mxu0 %v5646_v54  ;;  %4226 = vmatpush1.bf16.msra.mxu1 %v5650_v58 }
 0x4aa   :  { %4196 = vmatprep.subr.bf16.mxu0 %v5654_v62  ;;  %4228 = vmatprep.subr.bf16.mxu1 %v5657_v4 }
 0x4ad   :  { %4198 = vmatpush1.bf16.msra.mxu0 %v5663_v9  ;;  %4230 = vmatpush1.bf16.msra.mxu1 %v5667_v14 }
 0x4ae   :  { %4200 = vmatprep.subr.bf16.mxu0 %v5671_v18  ;;  %4232 = vmatprep.subr.bf16.mxu1 %v5674_v22 }
 0x4b1   :  { %4202 = vmatpush1.bf16.msra.mxu0 %v5680_v25  ;;  %4234 = vmatpush1.bf16.msra.mxu1 %v5684_v27 }
 0x4b2   :  { %4236 = vmatprep.subr.bf16.mxu0 %v5557_v38  ;;  %4268 = vmatprep.subr.bf16.mxu1 %v5559_v41 }
 0x567   :  { %v1270_v11 = vpop.f32.mrb[8].mxu0  ;;  %v1341_v45 = vpop.f32.mrb[8].mxu1 }
 0x568   :  { %v4947_v49 = vadd.f32 %v1270_v11, %v5740_v35  ;;  %v1272_v52 = vpop.f32.mrb[9].mxu0  ;;  %v1343_v51 = vpop.f32.mrb[9].mxu1  ;;  %v4963_v12 = vadd.f32 %v1341_v45, %v5757_v1 }
 0x569   :  { %v4948_v61 = vadd.f32 %v1272_v52, %v5744_v37  ;;  %v4964_v8 = vadd.f32 %v1343_v51, %v5751_v57 }
 0x56a   :  { %v3749_v33 = vmul.f32 -1.442695, %v4947_v49 }
 0x56b   :  { %v3750_v7 = vmul.f32 -1.442695, %v4948_v61  ;;  %v3751_v5 = vmul.f32 -1.442695, %v4964_v8 }
 0x56c   :  { %5138 = vpow2.f32 %v3749_v33 }
 0x56d   :  { %5140 = vpow2.f32 %v3750_v7 }
 0x56e   :  { %5142 = vpow2.f32 %v3751_v5 }
 0x56f   :  { %5144 = vtanh.f32 %v4963_v12 }
 0x576   :  { %v5139_v55 = vpop.eup %5138 }
 0x577   :  { %v5141_v20 = vpop.eup %5140  ;;  %v1353_v21 = vadd.f32 1.0, %v5139_v55 }
 0x578   :  { %v1359_v28 = vadd.f32 1.0, %v5141_v20  ;;  %v5143_v17 = vpop.eup %5142 }
 0x579   :  { %5146 = vrcp.f32 %v1353_v21  ;;  %v5145_v39 = vpop.eup %5144  ;;  %v1366_v61 = vadd.f32 1.0, %v5143_v17 }
 0x57a   :  { %5148 = vrcp.f32 %v1359_v28 }
 0x57b   :  { %5150 = vrcp.f32 %v1366_v61 }
 0x583   :  { %v5147_v11 = vpop.eup %5146 }
 0x584   :  { %v5149_v49 = vpop.eup %5148  ;;  %v1370_v52 = vmul.f32 %v5147_v11, %v5145_v39 }
 0x585   :  { %v1369_v33 = vmul.f32 %v5149_v49, %v5898_v24  ;;  %v5151_v45 = vpop.eup %5150 }
 0x587   :  { %v5944_v51 = vadd.f32 %v1370_v52, %v1369_v33 }
 0x589   :  { %5152 = vtanh.f32 %v5944_v51 }
 0x593   :  { %v5153_v7 = vpop.eup %5152 }
 0x594   :  { %v5947_v8 = vmul.f32 %v5153_v7, %v5151_v45 }
 0x596   :  { %1444 = vmatmul.mubr.f32.vlgmr.msra.gmra.mrb[10].mxu0 %v5947_v8  ;;  %1515 = vmatmul.mubr.f32.vlgmr.msra.gmra.mrb[10].mxu1 %v5947_v8 }
 0x597   :  { %4238 = vmatpush1.bf16.msra.mxu0 %v5564_v47  ;;  %4270 = vmatpush1.bf16.msra.mxu1 %v5567_v50 }
 0x598   :  { %4240 = vmatprep.subr.bf16.mxu0 %v5570_v53  ;;  %4272 = vmatprep.subr.bf16.mxu1 %v5572_v56 }
 0x599   :  { %1618 = vmatprep.mubr.f32.mxu0 %v5430_v0  ;;  %1689 = vmatprep.mubr.f32.mxu1 %v5430_v0 }
 0x59b   :  { %4242 = vmatpush1.bf16.msra.mxu0 %v5578_v60  ;;  %4274 = vmatpush1.bf16.msra.mxu1 %v5582_v63 }
 0x59c   :  { %4244 = vmatprep.subr.bf16.mxu0 %v5586_v3  ;;  %4276 = vmatprep.subr.bf16.mxu1 %v5589_v6 }
 0x59f   :  { %4246 = vmatpush1.bf16.msra.mxu0 %v5595_v10  ;;  %4278 = vmatpush1.bf16.msra.mxu1 %v5599_v13 }
 0x5a0   :  { %4248 = vmatprep.subr.bf16.mxu0 %v5603_v16  ;;  %4280 = vmatprep.subr.bf16.mxu1 %v5606_v19 }
 0x5a3   :  { %4250 = vmatpush1.bf16.msra.mxu0 %v5612_v23  ;;  %4282 = vmatpush1.bf16.msra.mxu1 %v5616_v26 }
 0x5a4   :  { %4252 = vmatprep.subr.bf16.mxu0 %v5620_v29  ;;  %4284 = vmatprep.subr.bf16.mxu1 %v5623_v32 }
 0x5a7   :  { %4254 = vmatpush1.bf16.msra.mxu0 %v5629_v36  ;;  %4286 = vmatpush1.bf16.msra.mxu1 %v5633_v40 }
 0x5a8   :  { %4256 = vmatprep.subr.bf16.mxu0 %v5637_v44  ;;  %4288 = vmatprep.subr.bf16.mxu1 %v5640_v48 }
 0x5ab   :  { %4258 = vmatpush1.bf16.msra.mxu0 %v5646_v54  ;;  %4290 = vmatpush1.bf16.msra.mxu1 %v5650_v58 }
 0x5ac   :  { %4260 = vmatprep.subr.bf16.mxu0 %v5654_v62  ;;  %4292 = vmatprep.subr.bf16.mxu1 %v5657_v4 }
 0x5af   :  { %4262 = vmatpush1.bf16.msra.mxu0 %v5663_v9  ;;  %4294 = vmatpush1.bf16.msra.mxu1 %v5667_v14 }
 0x5b0   :  { %4264 = vmatprep.subr.bf16.mxu0 %v5671_v18  ;;  %4296 = vmatprep.subr.bf16.mxu1 %v5674_v22 }
 0x5b3   :  { %4266 = vmatpush1.bf16.msra.mxu0 %v5680_v25  ;;  %4298 = vmatpush1.bf16.msra.mxu1 %v5684_v27 }
 0x5b4   :  { %4300 = vmatprep.subr.bf16.mxu0 %v5557_v38  ;;  %4332 = vmatprep.subr.bf16.mxu1 %v5559_v41 }
 0x669   :  { %v1445_v24 = vpop.f32.mrb[10].mxu0  ;;  %v1516_v5 = vpop.f32.mrb[10].mxu1 }
 0x66a   :  { %v4949_v12 = vadd.f32 %v1445_v24, %v5740_v35  ;;  %v1447_v55 = vpop.f32.mrb[11].mxu0  ;;  %v1518_v20 = vpop.f32.mrb[11].mxu1  ;;  %v4965_v49 = vadd.f32 %v1516_v5, %v5757_v1 }
 0x66b   :  { %v4950_v21 = vadd.f32 %v1447_v55, %v5744_v37  ;;  %v4966_v39 = vadd.f32 %v1518_v20, %v5751_v57 }
 0x66c   :  { %v3752_v28 = vmul.f32 -1.442695, %v4949_v12 }
 0x66d   :  { %v3753_v17 = vmul.f32 -1.442695, %v4950_v21  ;;  %v3754_v11 = vmul.f32 -1.442695, %v4966_v39  ;;  %v1912_v39 = vld [vmem:[#allocation8 + $0x10] sm:$0xff] }
 0x66e   :  { %5154 = vpow2.f32 %v3752_v28 }
 0x66f   :  { %5156 = vpow2.f32 %v3753_v17 }
 0x670   :  { %5158 = vpow2.f32 %v3754_v11  ;;  %v1916_v11 = vld [vmem:[#allocation8 + $0x30] sm:$0xff] }
 0x671   :  { %5160 = vtanh.f32 %v4965_v49  ;;  %v1919_v49 = vld [vmem:[#allocation8 + $0x48] sm:$0xff] }
 0x678   :  { %v5155_v38 = vpop.eup %5154 }
 0x679   :  { %v5157_v52 = vpop.eup %5156  ;;  %v1528_v41 = vadd.f32 1.0, %v5155_v38  ;;  %v1923_v38 = vld [vmem:[#allocation8 + $0x68] sm:$0xff] }
 0x67a   :  { %v1534_v61 = vadd.f32 1.0, %v5157_v52  ;;  %v5159_v33 = vpop.eup %5158  ;;  %v1921_v52 = vld [vmem:[#allocation8 + $0x58] sm:$0xff] }
 0x67b   :  { %5162 = vrcp.f32 %v1528_v41  ;;  %v5161_v45 = vpop.eup %5160  ;;  %v1541_v55 = vadd.f32 1.0, %v5159_v33  ;;  %v1925_v41 = vld [vmem:[#allocation8 + $0x78] sm:$0xff] }
 0x67c   :  { %5164 = vrcp.f32 %v1534_v61 }
 0x67d   :  { %5166 = vrcp.f32 %v1541_v55 }
 0x685   :  { %v5163_v7 = vpop.eup %5162 }
 0x686   :  { %v5165_v24 = vpop.eup %5164  ;;  %v1545_v12 = vmul.f32 %v5163_v7, %v5161_v45  ;;  %v4397_v7 = vpack.c.bf16 %v1916_v11, %v1912_v39  ;;  %v1942_v39 = vld [vmem:[#allocation8 + $0x100] sm:$0xff] }
 0x687   :  { %v1544_v21 = vmul.f32 %v5165_v24, %v5944_v51  ;;  %v5167_v5 = vpop.eup %5166  ;;  %v1914_v51 = vld [vmem:[#allocation8 + $0x20] sm:$0xff] }
 0x688   :  { %v1918_v24 = vld [vmem:[#allocation8 + $0x40] sm:$0xff] }
 0x689   :  { %v5990_v20 = vadd.f32 %v1545_v12, %v1544_v21  ;;  %v1922_v12 = vld [vmem:[#allocation8 + $0x60] sm:$0xff]  ;;  %v4367_v21 = vpack.c.bf16 %v1923_v38, %v1919_v49 }
 0x68a   :  { %v1946_v11 = vld [vmem:[#allocation8 + $0x120] sm:$0xff] }
 0x68b   :  { %5168 = vtanh.f32 %v5990_v20 }
 0x695   :  { %v5169_v28 = vpop.eup %5168 }
 0x696   :  { %v5993_v17 = vmul.f32 %v5169_v28, %v5167_v5  ;;  %v1920_v5 = vld [vmem:[#allocation8 + $0x50] sm:$0xff] }
 0x697   :  { %v1924_v28 = vld [vmem:[#allocation8 + $0x70] sm:$0xff] }
 0x698   :  { %1619 = vmatmul.mubr.f32.vlgmr.msra.gmra.mrb[12].mxu0 %v5993_v17  ;;  %1690 = vmatmul.mubr.f32.vlgmr.msra.gmra.mrb[12].mxu1 %v5993_v17 }
 0x699   :  { %4302 = vmatpush1.bf16.msra.mxu0 %v5564_v47  ;;  %4334 = vmatpush1.bf16.msra.mxu1 %v5567_v50  ;;  %v1911_v47 = vld [vmem:[#allocation8 + $0x8] sm:$0xff] }
 0x69a   :  { %4304 = vmatprep.subr.bf16.mxu0 %v5570_v53  ;;  %4336 = vmatprep.subr.bf16.mxu1 %v5572_v56  ;;  %v1915_v50 = vld [vmem:[#allocation8 + $0x28] sm:$0xff]  ;;  %v1913_v53 = vld [vmem:[#allocation8 + $0x18] sm:$0xff] }
 0x69b   :  { %1793 = vmatprep.mubr.f32.mxu0 %v5430_v0  ;;  %1864 = vmatprep.mubr.f32.mxu1 %v5430_v0  ;;  %v4363_v56 = vpack.c.bf16 %v1915_v50, %v1911_v47  ;;  %v1927_v47 = vld [vmem:[#allocation8 + $0x88] sm:$0xff] }
 0x69c   :  { %v1931_v50 = vld [vmem:[#allocation8 + $0xa8] sm:$0xff] }
 0x69d   :  { %4306 = vmatpush1.bf16.msra.mxu0 %v5578_v60  ;;  %4338 = vmatpush1.bf16.msra.mxu1 %v5582_v63  ;;  %v1917_v60 = vld [vmem:[#allocation8 + $0x38] sm:$0xff] }
 0x69e   :  { %4308 = vmatprep.subr.bf16.mxu0 %v5586_v3  ;;  %4340 = vmatprep.subr.bf16.mxu1 %v5589_v6  ;;  %v4395_v63 = vpack.c.bf16 %v1917_v60, %v1913_v53  ;;  %v1929_v53 = vld [vmem:[#allocation8 + $0x98] sm:$0xff]  ;;  %v4369_v60 = vpack.c.bf16 %v1922_v12, %v1918_v24  ;;  %v4381_v24 = vpack.c.bf16 %v1946_v11, %v1942_v39  ;;  %v2256_v11 = vld [vmem:[#allocation9 + $0x10] sm:$0xff] }
 0x6a1   :  { %4310 = vmatpush1.bf16.msra.mxu0 %v5595_v10  ;;  %4342 = vmatpush1.bf16.msra.mxu1 %v5599_v13 }
 0x6a2   :  { %4312 = vmatprep.subr.bf16.mxu0 %v5603_v16  ;;  %4344 = vmatprep.subr.bf16.mxu1 %v5606_v19 }
 0x6a5   :  { %4314 = vmatpush1.bf16.msra.mxu0 %v5612_v23  ;;  %4346 = vmatpush1.bf16.msra.mxu1 %v5616_v26 }
 0x6a6   :  { %4316 = vmatprep.subr.bf16.mxu0 %v5620_v29  ;;  %4348 = vmatprep.subr.bf16.mxu1 %v5623_v32 }
 0x6a9   :  { %4318 = vmatpush1.bf16.msra.mxu0 %v5629_v36  ;;  %4350 = vmatpush1.bf16.msra.mxu1 %v5633_v40 }
 0x6aa   :  { %4320 = vmatprep.subr.bf16.mxu0 %v5637_v44  ;;  %4352 = vmatprep.subr.bf16.mxu1 %v5640_v48 }
 0x6ad   :  { %4322 = vmatpush1.bf16.msra.mxu0 %v5646_v54  ;;  %4354 = vmatpush1.bf16.msra.mxu1 %v5650_v58 }
 0x6ae   :  { %4324 = vmatprep.subr.bf16.mxu0 %v5654_v62  ;;  %4356 = vmatprep.subr.bf16.mxu1 %v5657_v4 }
 0x6b1   :  { %4326 = vmatpush1.bf16.msra.mxu0 %v5663_v9  ;;  %4358 = vmatpush1.bf16.msra.mxu1 %v5667_v14 }
 0x6b2   :  { %4328 = vmatprep.subr.bf16.mxu0 %v5671_v18  ;;  %4360 = vmatprep.subr.bf16.mxu1 %v5674_v22 }
 0x6b5   :  { %4330 = vmatpush1.bf16.msra.mxu0 %v5680_v25  ;;  %4362 = vmatpush1.bf16.msra.mxu1 %v5684_v27  ;;  %v1910_v27 = vld [vmem:[#allocation8] sm:$0xff] }
 0x6b6   :  { %4364 = vmatprep.subr.bf16.mxu0 %v4363_v56  ;;  %4396 = vmatprep.subr.bf16.mxu1 %v4395_v63  ;;  %v4365_v45 = vpack.c.bf16 %v1914_v51, %v1910_v27  ;;  %v1933_v56 = vld [vmem:[#allocation8 + $0xb8] sm:$0xff]  ;;  %v4401_v63 = vpack.c.bf16 %v1924_v28, %v1920_v5 }
 0x76b   :  { %v1620_v3 = vpop.f32.mrb[12].mxu0  ;;  %v1691_v6 = vpop.f32.mrb[12].mxu1 }
 0x76c   :  { %v4951_v10 = vadd.f32 %v1620_v3, %v5740_v35  ;;  %v1622_v13 = vpop.f32.mrb[13].mxu0  ;;  %v1693_v16 = vpop.f32.mrb[13].mxu1  ;;  %v4967_v36 = vadd.f32 %v1691_v6, %v5757_v1  ;;  %v1926_v3 = vld [vmem:[#allocation8 + $0x80] sm:$0xff] }
 0x76d   :  { %v4952_v19 = vadd.f32 %v1622_v13, %v5744_v37  ;;  %v4968_v29 = vadd.f32 %v1693_v16, %v5751_v57  ;;  %v1930_v6 = vld [vmem:[#allocation8 + $0xa0] sm:$0xff]  ;;  %v4403_v13 = vpack.c.bf16 %v1933_v56, %v1929_v53  ;;  %v1928_v16 = vld [vmem:[#allocation8 + $0x90] sm:$0xff]  ;;  %v1959_v53 = vld [vmem:[#allocation8 + $0x188] sm:$0xff] }
 0x76e   :  { %v3755_v23 = vmul.f32 -1.442695, %v4951_v10  ;;  %v4371_v10 = vpack.c.bf16 %v1931_v50, %v1927_v47  ;;  %v1952_v47 = vld [vmem:[#allocation8 + $0x150] sm:$0xff]  ;;  %v1963_v56 = vld [vmem:[#allocation8 + $0x1a8] sm:$0xff] }
 0x76f   :  { %v3756_v26 = vmul.f32 -1.442695, %v4952_v19  ;;  %v3757_v32 = vmul.f32 -1.442695, %v4968_v29  ;;  %v1932_v19 = vld [vmem:[#allocation8 + $0xb0] sm:$0xff]  ;;  %v1937_v29 = vld [vmem:[#allocation8 + $0xd8] sm:$0xff] }
 0x770   :  { %5170 = vpow2.f32 %v3755_v23  ;;  %v1935_v23 = vld [vmem:[#allocation8 + $0xc8] sm:$0xff]  ;;  %v1956_v50 = vld [vmem:[#allocation8 + $0x170] sm:$0xff] }
 0x771   :  { %5172 = vpow2.f32 %v3756_v26  ;;  %v1939_v26 = vld [vmem:[#allocation8 + $0xe8] sm:$0xff] }
 0x772   :  { %5174 = vpow2.f32 %v3757_v32  ;;  %v1941_v32 = vld [vmem:[#allocation8 + $0xf8] sm:$0xff] }
 0x773   :  { %5176 = vtanh.f32 %v4967_v36  ;;  %v4373_v36 = vpack.c.bf16 %v1930_v6, %v1926_v3  ;;  %v4417_v6 = vpack.c.bf16 %v1956_v50, %v1952_v47  ;;  %v2275_v47 = vld [vmem:[#allocation9 + $0xa8] sm:$0xff]  ;;  %v2273_v50 = vld [vmem:[#allocation9 + $0x98] sm:$0xff] }
 0x77a   :  { %v5171_v40 = vpop.eup %5170 }
 0x77b   :  { %v5173_v44 = vpop.eup %5172  ;;  %v1703_v48 = vadd.f32 1.0, %v5171_v40  ;;  %v4405_v40 = vpack.c.bf16 %v1932_v19, %v1928_v16  ;;  %v4387_v16 = vpack.c.bf16 %v1963_v56, %v1959_v53  ;;  %v2277_v56 = vld [vmem:[#allocation9 + $0xb8] sm:$0xff] }
 0x77c   :  { %v1709_v54 = vadd.f32 1.0, %v5173_v44  ;;  %v5175_v58 = vpop.eup %5174  ;;  %v1934_v44 = vld [vmem:[#allocation8 + $0xc0] sm:$0xff] }
 0x77d   :  { %5178 = vrcp.f32 %v1703_v48  ;;  %v5177_v62 = vpop.eup %5176  ;;  %v1716_v18 = vadd.f32 1.0, %v5175_v58  ;;  %v1938_v48 = vld [vmem:[#allocation8 + $0xe0] sm:$0xff]  ;;  %v4407_v58 = vpack.c.bf16 %v1941_v32, %v1937_v29  ;;  %v1967_v29 = vld [vmem:[#allocation8 + $0x1c8] sm:$0xff] }
 0x77e   :  { %5180 = vrcp.f32 %v1709_v54  ;;  %v4375_v54 = vpack.c.bf16 %v1939_v26, %v1935_v23  ;;  %v4377_v27 = vpack.c.bf16 %v1938_v48, %v1934_v44  ;;  %v1960_v23 = vld [vmem:[#allocation8 + $0x190] sm:$0xff]  ;;  %v1971_v32 = vld [vmem:[#allocation8 + $0x1e8] sm:$0xff] }
 0x77f   :  { %5182 = vrcp.f32 %v1716_v18  ;;  %v1945_v18 = vld [vmem:[#allocation8 + $0x118] sm:$0xff]  ;;  %v1964_v26 = vld [vmem:[#allocation8 + $0x1b0] sm:$0xff] }
 0x780   :  { %v4421_v48 = vpack.c.bf16 %v1964_v26, %v1960_v23  ;;  %v2283_v23 = vld [vmem:[#allocation9 + $0xe8] sm:$0xff]  ;;  %v2281_v26 = vld [vmem:[#allocation9 + $0xd8] sm:$0xff] }
 0x787   :  { %v5179_v4 = vpop.eup %5178 }
 0x788   :  { %v5181_v9 = vpop.eup %5180  ;;  %v1720_v14 = vmul.f32 %v5179_v4, %v5177_v62  ;;  %v1936_v62 = vld [vmem:[#allocation8 + $0xd0] sm:$0xff] }
 0x789   :  { %v1719_v22 = vmul.f32 %v5181_v9, %v5990_v20  ;;  %v5183_v61 = vpop.eup %5182  ;;  %v4399_v20 = vpack.c.bf16 %v1925_v41, %v1921_v52  ;;  %v1940_v4 = vld [vmem:[#allocation8 + $0xf0] sm:$0xff]  ;;  %v1943_v9 = vld [vmem:[#allocation8 + $0x108] sm:$0xff] }
 0x78a   :  { %v4409_v51 = vpack.c.bf16 %v1940_v4, %v1936_v62  ;;  %v1944_v52 = vld [vmem:[#allocation8 + $0x110] sm:$0xff]  ;;  %v1970_v4 = vld [vmem:[#allocation8 + $0x1e0] sm:$0xff] }
 0x78b   :  { %v6034_v25 = vadd.f32 %v1720_v14, %v1719_v22  ;;  %v1947_v14 = vld [vmem:[#allocation8 + $0x128] sm:$0xff]  ;;  %v1949_v22 = vld [vmem:[#allocation8 + $0x138] sm:$0xff]  ;;  %v1948_v41 = vld [vmem:[#allocation8 + $0x130] sm:$0xff] }
 0x78c   :  { %v4379_v49 = vpack.c.bf16 %v1947_v14, %v1943_v9  ;;  %v4411_v38 = vpack.c.bf16 %v1949_v22, %v1945_v18  ;;  %v4413_v12 = vpack.c.bf16 %v1948_v41, %v1944_v52  ;;  %v1968_v9 = vld [vmem:[#allocation8 + $0x1d0] sm:$0xff]  ;;  %v2267_v52 = vld [vmem:[#allocation9 + $0x68] sm:$0xff]  ;;  %v2265_v41 = vld [vmem:[#allocation9 + $0x58] sm:$0xff] }
 0x78d   :  { %5184 = vtanh.f32 %v6034_v25  ;;  %v1972_v14 = vld [vmem:[#allocation8 + $0x1f0] sm:$0xff] }
 0x78e   :  { %v4425_v22 = vpack.c.bf16 %v1972_v14, %v1968_v9  ;;  %v2291_v9 = vld [vmem:[#allocation9 + $0x128] sm:$0xff]  ;;  %v2289_v14 = vld [vmem:[#allocation9 + $0x118] sm:$0xff] }
 0x797   :  { %v5185_v33 = vpop.eup %5184 }
 0x798   :  { %v6037_v55 = vmul.f32 %v5185_v33, %v5183_v61  ;;  %v1951_v61 = vld [vmem:[#allocation8 + $0x148] sm:$0xff] }
 0x799   :  { %v1955_v33 = vld [vmem:[#allocation8 + $0x168] sm:$0xff] }
 0x79a   :  { %1794 = vmatmul.mubr.f32.vlgmr.msra.gmra.mrb[14].mxu0 %v6037_v55  ;;  %1865 = vmatmul.mubr.f32.vlgmr.msra.gmra.mrb[14].mxu1 %v6037_v55  ;;  %v4383_v5 = vpack.c.bf16 %v1955_v33, %v1951_v61  ;;  %v2269_v33 = vld [vmem:[#allocation9 + $0x78] sm:$0xff] }
 0x79b   :  { %4366 = vmatpush1.bf16.msra.mxu0 %v4365_v45  ;;  %4398 = vmatpush1.bf16.msra.mxu1 %v4397_v7  ;;  %v1953_v45 = vld [vmem:[#allocation8 + $0x158] sm:$0xff] }
 0x79c   :  { %4368 = vmatprep.subr.bf16.mxu0 %v4367_v21  ;;  %4400 = vmatprep.subr.bf16.mxu1 %v4399_v20  ;;  %v1957_v7 = vld [vmem:[#allocation8 + $0x178] sm:$0xff]  ;;  %v1950_v21 = vld [vmem:[#allocation8 + $0x140] sm:$0xff] }
 0x79d   :  { %2060 = vmatprep.mubr.f32.mxu0 %v5430_v0  ;;  %2173 = vmatprep.mubr.f32.mxu1 %v5430_v0  ;;  %v1954_v20 = vld [vmem:[#allocation8 + $0x160] sm:$0xff]  ;;  %v4415_v28 = vpack.c.bf16 %v1957_v7, %v1953_v45 }
 0x79e   :  { %v4385_v3 = vpack.c.bf16 %v1954_v20, %v1950_v21  ;;  %v2262_v45 = vld [vmem:[#allocation9 + $0x40] sm:$0xff]  ;;  %v2264_v21 = vld [vmem:[#allocation9 + $0x50] sm:$0xff] }
 0x79f   :  { %4370 = vmatpush1.bf16.msra.mxu0 %v4369_v60  ;;  %4402 = vmatpush1.bf16.msra.mxu1 %v4401_v63  ;;  %v1961_v60 = vld [vmem:[#allocation8 + $0x198] sm:$0xff]  ;;  %v2266_v7 = vld [vmem:[#allocation9 + $0x60] sm:$0xff]  ;;  %v2268_v20 = vld [vmem:[#allocation9 + $0x70] sm:$0xff] }
 0x7a0   :  { %4372 = vmatprep.subr.bf16.mxu0 %v4371_v10  ;;  %4404 = vmatprep.subr.bf16.mxu1 %v4403_v13  ;;  %v1965_v63 = vld [vmem:[#allocation8 + $0x1b8] sm:$0xff]  ;;  %v1958_v10 = vld [vmem:[#allocation8 + $0x180] sm:$0xff] }
 0x7a1   :  { %v1962_v13 = vld [vmem:[#allocation8 + $0x1a0] sm:$0xff]  ;;  %v4419_v19 = vpack.c.bf16 %v1965_v63, %v1961_v60 }
 0x7a2   :  { %v4389_v44 = vpack.c.bf16 %v1962_v13, %v1958_v10  ;;  %v2270_v60 = vld [vmem:[#allocation9 + $0x80] sm:$0xff]  ;;  %v2272_v10 = vld [vmem:[#allocation9 + $0x90] sm:$0xff] }
 0x7a3   :  { %4374 = vmatpush1.bf16.msra.mxu0 %v4373_v36  ;;  %4406 = vmatpush1.bf16.msra.mxu1 %v4405_v40  ;;  %v1969_v36 = vld [vmem:[#allocation8 + $0x1d8] sm:$0xff]  ;;  %v2274_v63 = vld [vmem:[#allocation9 + $0xa0] sm:$0xff]  ;;  %v2276_v13 = vld [vmem:[#allocation9 + $0xb0] sm:$0xff] }
 0x7a4   :  { %4376 = vmatprep.subr.bf16.mxu0 %v4375_v54  ;;  %4408 = vmatprep.subr.bf16.mxu1 %v4407_v58  ;;  %v1973_v40 = vld [vmem:[#allocation8 + $0x1f8] sm:$0xff]  ;;  %v1966_v54 = vld [vmem:[#allocation8 + $0x1c0] sm:$0xff]  ;;  %v4391_v58 = vpack.c.bf16 %v1971_v32, %v1967_v29 }
 0x7a5   :  { %v4423_v62 = vpack.c.bf16 %v1973_v40, %v1969_v36  ;;  %v4393_v18 = vpack.c.bf16 %v1970_v4, %v1966_v54  ;;  %v2285_v32 = vld [vmem:[#allocation9 + $0xf8] sm:$0xff]  ;;  %v2278_v36 = vld [vmem:[#allocation9 + $0xc0] sm:$0xff]  ;;  %v2280_v54 = vld [vmem:[#allocation9 + $0xd0] sm:$0xff] }
 0x7a6   :  { %v2282_v40 = vld [vmem:[#allocation9 + $0xe0] sm:$0xff] }
 0x7a7   :  { %4378 = vmatpush1.bf16.msra.mxu0 %v4377_v27  ;;  %4410 = vmatpush1.bf16.msra.mxu1 %v4409_v51  ;;  %v2254_v27 = vld [vmem:[#allocation9] sm:$0xff] }
 0x7a8   :  { %4380 = vmatprep.subr.bf16.mxu0 %v4379_v49  ;;  %4412 = vmatprep.subr.bf16.mxu1 %v4411_v38  ;;  %v2260_v49 = vld [vmem:[#allocation9 + $0x30] sm:$0xff]  ;;  %v2263_v38 = vld [vmem:[#allocation9 + $0x48] sm:$0xff] }
 0x7a9   :  { %v6083_v61 = vpack.c.bf16 %v2267_v52, %v2263_v38 }
 0x7ab   :  { %4382 = vmatpush1.bf16.msra.mxu0 %v4381_v24  ;;  %4414 = vmatpush1.bf16.msra.mxu1 %v4413_v12  ;;  %v6085_v24 = vpack.c.bf16 %v2269_v33, %v2265_v41  ;;  %v6087_v12 = vpack.c.bf16 %v2266_v7, %v2262_v45  ;;  %v2297_v41 = vld [vmem:[#allocation9 + $0x158] sm:$0xff]  ;;  %v2294_v45 = vld [vmem:[#allocation9 + $0x140] sm:$0xff] }
 0x7ac   :  { %4384 = vmatprep.subr.bf16.mxu0 %v4383_v5  ;;  %4416 = vmatprep.subr.bf16.mxu1 %v4415_v28  ;;  %v6090_v5 = vpack.c.bf16 %v2268_v20, %v2264_v21  ;;  %v2271_v28 = vld [vmem:[#allocation9 + $0x88] sm:$0xff]  ;;  %v2301_v33 = vld [vmem:[#allocation9 + $0x178] sm:$0xff]  ;;  %v2298_v21 = vld [vmem:[#allocation9 + $0x160] sm:$0xff] }
 0x7ad   :  { %v6095_v53 = vpack.c.bf16 %v2275_v47, %v2271_v28  ;;  %v6131_v7 = vpack.c.bf16 %v2301_v33, %v2297_v41  ;;  %v2296_v20 = vld [vmem:[#allocation9 + $0x150] sm:$0xff]  ;;  %v6134_v47 = vpack.c.bf16 %v2298_v21, %v2294_v45 }
 0x7ae   :  { %v2300_v28 = vld [vmem:[#allocation9 + $0x170] sm:$0xff] }
 0x7af   :  { %4386 = vmatpush1.bf16.msra.mxu0 %v4385_v3  ;;  %4418 = vmatpush1.bf16.msra.mxu1 %v4417_v6  ;;  %v6097_v3 = vpack.c.bf16 %v2277_v56, %v2273_v50  ;;  %v6099_v6 = vpack.c.bf16 %v2274_v63, %v2270_v60  ;;  %v2303_v50 = vld [vmem:[#allocation9 + $0x188] sm:$0xff]  ;;  %v2305_v60 = vld [vmem:[#allocation9 + $0x198] sm:$0xff]  ;;  %v6138_v63 = vpack.c.bf16 %v2300_v28, %v2296_v20 }
 0x7b0   :  { %4388 = vmatprep.subr.bf16.mxu0 %v4387_v16  ;;  %4420 = vmatprep.subr.bf16.mxu1 %v4419_v19  ;;  %v6102_v16 = vpack.c.bf16 %v2276_v13, %v2272_v10  ;;  %v2279_v19 = vld [vmem:[#allocation9 + $0xc8] sm:$0xff]  ;;  %v2309_v13 = vld [vmem:[#allocation9 + $0x1b8] sm:$0xff] }
 0x7b1   :  { %v6107_v29 = vpack.c.bf16 %v2283_v23, %v2279_v19  ;;  %v2307_v56 = vld [vmem:[#allocation9 + $0x1a8] sm:$0xff]  ;;  %v2302_v19 = vld [vmem:[#allocation9 + $0x180] sm:$0xff] }
 0x7b2   :  { %v6140_v10 = vpack.c.bf16 %v2307_v56, %v2303_v50  ;;  %v2306_v23 = vld [vmem:[#allocation9 + $0x1a0] sm:$0xff] }
 0x7b3   :  { %4390 = vmatpush1.bf16.msra.mxu0 %v4389_v44  ;;  %4422 = vmatpush1.bf16.msra.mxu1 %v4421_v48  ;;  %v6109_v44 = vpack.c.bf16 %v2285_v32, %v2281_v26  ;;  %v6111_v48 = vpack.c.bf16 %v2282_v40, %v2278_v36  ;;  %v6143_v26 = vpack.c.bf16 %v2309_v13, %v2305_v60  ;;  %v2304_v32 = vld [vmem:[#allocation9 + $0x190] sm:$0xff] }
 0x7b4   :  { %4392 = vmatprep.subr.bf16.mxu0 %v4391_v58  ;;  %4424 = vmatprep.subr.bf16.mxu1 %v4423_v62  ;;  %v2284_v58 = vld [vmem:[#allocation9 + $0xf0] sm:$0xff]  ;;  %v2287_v62 = vld [vmem:[#allocation9 + $0x108] sm:$0xff]  ;;  %v6146_v40 = vpack.c.bf16 %v2306_v23, %v2302_v19 }
 0x7b5   :  { %v6114_v4 = vpack.c.bf16 %v2284_v58, %v2280_v54  ;;  %v2308_v36 = vld [vmem:[#allocation9 + $0x1b0] sm:$0xff]  ;;  %v2311_v58 = vld [vmem:[#allocation9 + $0x1c8] sm:$0xff] }
 0x7b6   :  { %v6150_v54 = vpack.c.bf16 %v2308_v36, %v2304_v32 }
 0x7b7   :  { %4394 = vmatpush1.bf16.msra.mxu0 %v4393_v18  ;;  %4426 = vmatpush1.bf16.msra.mxu1 %v4425_v22  ;;  %v2293_v18 = vld [vmem:[#allocation9 + $0x138] sm:$0xff]  ;;  %v6118_v22 = vpack.c.bf16 %v2291_v9, %v2287_v62  ;;  %v2315_v62 = vld [vmem:[#allocation9 + $0x1e8] sm:$0xff] }
 0x7b8   :  { %v2313_v9 = vld [vmem:[#allocation9 + $0x1d8] sm:$0xff] }
 0x7ba   :  { %2061 = vmatmul.mubr.f32.vlgmr.msra.gmra.mrb[16].mxu0 %v5763_v46  ;;  %2174 = vmatmul.mubr.f32.vlgmr.msra.gmra.mrb[16].mxu1 %v5763_v46  ;;  %v2255_v46 = vld [vmem:[#allocation9 + $0x8] sm:$0xff] }
 0x7bb   :  { %2066 = vmatprep.mubr.f32.mxu0 %v5430_v0  ;;  %2179 = vmatprep.mubr.f32.mxu1 %v5430_v0 }
 0x7be   :  { %2067 = vmatmul.mubr.f32.gmra.mrb[18].mxu0 %v5809_v2  ;;  %2180 = vmatmul.mubr.f32.gmra.mrb[18].mxu1 %v5809_v2  ;;  %v2259_v2 = vld [vmem:[#allocation9 + $0x28] sm:$0xff] }
 0x7bf   :  { %2072 = vmatprep.mubr.f32.mxu0 %v5430_v0  ;;  %2185 = vmatprep.mubr.f32.mxu1 %v5430_v0 }
 0x7c2   :  { %2073 = vmatmul.mubr.f32.gmra.mrb[20].mxu0 %v5855_v15  ;;  %2186 = vmatmul.mubr.f32.gmra.mrb[20].mxu1 %v5855_v15  ;;  %v2257_v15 = vld [vmem:[#allocation9 + $0x18] sm:$0xff] }
 0x7c3   :  { %2078 = vmatprep.mubr.f32.mxu0 %v5430_v0  ;;  %2191 = vmatprep.mubr.f32.mxu1 %v5430_v0 }
 0x7c6   :  { %2079 = vmatmul.mubr.f32.gmra.mrb[22].mxu0 %v5901_v43  ;;  %2192 = vmatmul.mubr.f32.gmra.mrb[22].mxu1 %v5901_v43  ;;  %v6071_v43 = vpack.c.bf16 %v2259_v2, %v2255_v46  ;;  %v6120_v46 = vpack.c.bf16 %v2293_v18, %v2289_v14  ;;  %v2286_v2 = vld [vmem:[#allocation9 + $0x100] sm:$0xff]  ;;  %v6155_v14 = vpack.c.bf16 %v2315_v62, %v2311_v58  ;;  %v2317_v18 = vld [vmem:[#allocation9 + $0x1f8] sm:$0xff] }
 0x7c7   :  { %2084 = vmatprep.mubr.f32.mxu0 %v5430_v0  ;;  %2197 = vmatprep.mubr.f32.mxu1 %v5430_v0 }
 0x7c8   :  { %4428 = vmatprep.subr.bf16.mxu0 %v6071_v43 }
 0x7ca   :  { %2085 = vmatmul.mubr.f32.gmra.mrb[24].mxu0 %v5947_v8  ;;  %2198 = vmatmul.mubr.f32.gmra.mrb[24].mxu1 %v5947_v8  ;;  %v2261_v8 = vld [vmem:[#allocation9 + $0x38] sm:$0xff] }
 0x7cb   :  { %2090 = vmatprep.mubr.f32.mxu0 %v5430_v0  ;;  %2203 = vmatprep.mubr.f32.mxu1 %v5430_v0  ;;  %v6073_v51 = vpack.c.bf16 %v2261_v8, %v2257_v15  ;;  %v2290_v15 = vld [vmem:[#allocation9 + $0x120] sm:$0xff]  ;;  %v2288_v8 = vld [vmem:[#allocation9 + $0x110] sm:$0xff] }
 0x7cd   :  { %4460 = vmatprep.subr.bf16.mxu1 %v6073_v51 }
 0x7ce   :  { %2091 = vmatmul.mubr.f32.gmra.mrb[26].mxu0 %v5993_v17  ;;  %2204 = vmatmul.mubr.f32.gmra.mrb[26].mxu1 %v5993_v17  ;;  %v2258_v17 = vld [vmem:[#allocation9 + $0x20] sm:$0xff] }
 0x7cf   :  { %2096 = vmatprep.mubr.f32.mxu0 %v5430_v0  ;;  %2209 = vmatprep.mubr.f32.mxu1 %v5430_v0  ;;  %v6075_v39 = vpack.c.bf16 %v2258_v17, %v2254_v27  ;;  %v6123_v27 = vpack.c.bf16 %v2290_v15, %v2286_v2  ;;  %v2292_v17 = vld [vmem:[#allocation9 + $0x130] sm:$0xff]  ;;  %v2310_v2 = vld [vmem:[#allocation9 + $0x1c0] sm:$0xff] }
 0x7d0   :  { %v6127_v38 = vpack.c.bf16 %v2292_v17, %v2288_v8  ;;  %v2314_v15 = vld [vmem:[#allocation9 + $0x1e0] sm:$0xff]  ;;  %v6157_v8 = vpack.c.bf16 %v2317_v18, %v2313_v9 }
 0x7d1   :  { %4430 = vmatpush1.bf16.msra.mxu0 %v6075_v39  ;;  %v6159_v17 = vpack.c.bf16 %v2314_v15, %v2310_v2 }
 0x7d2   :  { %2097 = vmatmul.mubr.f32.gmra.mrb[28].mxu0 %v6037_v55  ;;  %2210 = vmatmul.mubr.f32.gmra.mrb[28].mxu1 %v6037_v55  ;;  %v6078_v55 = vpack.c.bf16 %v2260_v49, %v2256_v11  ;;  %v2295_v11 = vld [vmem:[#allocation9 + $0x148] sm:$0xff] }
 0x7d3   :  { %2102 = vmatprep.mubr.f32.mxu0 %v5430_v0  ;;  %2215 = vmatprep.mubr.f32.mxu1 %v5430_v0  ;;  %v2299_v49 = vld [vmem:[#allocation9 + $0x168] sm:$0xff] }
 0x7d4   :  { %4462 = vmatpush1.bf16.msra.mxu1 %v6078_v55  ;;  %4432 = vmatprep.subr.bf16.mxu0 %v6083_v61  ;;  %v6129_v52 = vpack.c.bf16 %v2299_v49, %v2295_v11  ;;  %v2312_v11 = vld [vmem:[#allocation9 + $0x1d0] sm:$0xff] }
 0x7d5   :  { %4464 = vmatprep.subr.bf16.mxu1 %v6085_v24  ;;  %4434 = vmatpush1.bf16.msra.mxu0 %v6087_v12  ;;  %v2316_v49 = vld [vmem:[#allocation9 + $0x1f0] sm:$0xff] }
 0x7d6   :  { %4436 = vmatprep.subr.bf16.mxu0 %v6095_v53  ;;  %v6162_v41 = vpack.c.bf16 %v2316_v49, %v2312_v11 }
 0x7d8   :  { %4466 = vmatpush1.bf16.msra.mxu1 %v6090_v5 }
 0x7d9   :  { %4468 = vmatprep.subr.bf16.mxu1 %v6097_v3  ;;  %4438 = vmatpush1.bf16.msra.mxu0 %v6099_v6 }
 0x7da   :  { %4440 = vmatprep.subr.bf16.mxu0 %v6107_v29 }
 0x7dc   :  { %4470 = vmatpush1.bf16.msra.mxu1 %v6102_v16 }
 0x7dd   :  { %4472 = vmatprep.subr.bf16.mxu1 %v6109_v44  ;;  %4442 = vmatpush1.bf16.msra.mxu0 %v6111_v48 }
 0x7de   :  { %4444 = vmatprep.subr.bf16.mxu0 %v6118_v22 }
 0x7e0   :  { %4474 = vmatpush1.bf16.msra.mxu1 %v6114_v4 }
 0x7e1   :  { %4476 = vmatprep.subr.bf16.mxu1 %v6120_v46  ;;  %4446 = vmatpush1.bf16.msra.mxu0 %v6123_v27 }
 0x7e2   :  { %4448 = vmatprep.subr.bf16.mxu0 %v6129_v52 }
 0x7e4   :  { %4478 = vmatpush1.bf16.msra.mxu1 %v6127_v38 }
 0x7e5   :  { %4480 = vmatprep.subr.bf16.mxu1 %v6131_v7  ;;  %4450 = vmatpush1.bf16.msra.mxu0 %v6134_v47 }
 0x7e6   :  { %4452 = vmatprep.subr.bf16.mxu0 %v6140_v10 }
 0x7e8   :  { %4482 = vmatpush1.bf16.msra.mxu1 %v6138_v63 }
 0x7e9   :  { %4484 = vmatprep.subr.bf16.mxu1 %v6143_v26  ;;  %4454 = vmatpush1.bf16.msra.mxu0 %v6146_v40 }
 0x7ea   :  { %4456 = vmatprep.subr.bf16.mxu0 %v6155_v14 }
 0x7ec   :  { %4486 = vmatpush1.bf16.msra.mxu1 %v6150_v54 }
 0x7ed   :  { %4488 = vmatprep.subr.bf16.mxu1 %v6157_v8  ;;  %4458 = vmatpush1.bf16.msra.mxu0 %v6159_v17 }
 0x7ee   :  { %4492 = vmatprep.subr.bf16.mxu0 %v6071_v43 }
 0x7f0   :  { %4490 = vmatpush1.bf16.msra.mxu1 %v6162_v41 }
 0x7f1   :  { %4524 = vmatprep.subr.bf16.mxu1 %v6073_v51 }
 0x86d   :  { %v1795_v33 = vpop.f32.mrb[14].mxu0  ;;  %v1866_v45 = vpop.f32.mrb[14].mxu1 }
 0x86e   :  { %v4953_v21 = vadd.f32 %v1795_v33, %v5740_v35  ;;  %v1797_v20 = vpop.f32.mrb[15].mxu0  ;;  %v1868_v28 = vpop.f32.mrb[15].mxu1  ;;  %v4969_v23 = vadd.f32 %v1866_v45, %v5757_v1 }
 0x86f   :  { %v4954_v50 = vadd.f32 %v1797_v20, %v5744_v37  ;;  %v4970_v13 = vadd.f32 %v1868_v28, %v5751_v57 }
 0x870   :  { %v3758_v56 = vmul.f32 -1.442695, %v4953_v21 }
 0x871   :  { %v3759_v60 = vmul.f32 -1.442695, %v4954_v50  ;;  %v3760_v19 = vmul.f32 -1.442695, %v4970_v13 }
 0x872   :  { %5186 = vpow2.f32 %v3758_v56 }
 0x873   :  { %5188 = vpow2.f32 %v3759_v60 }
 0x874   :  { %5190 = vpow2.f32 %v3760_v19 }
 0x875   :  { %5192 = vtanh.f32 %v4969_v23 }
 0x87c   :  { %v5187_v32 = vpop.eup %5186 }
 0x87d   :  { %v5189_v36 = vpop.eup %5188  ;;  %v1878_v58 = vadd.f32 1.0, %v5187_v32 }
 0x87e   :  { %v1884_v62 = vadd.f32 1.0, %v5189_v36  ;;  %v5191_v35 = vpop.eup %5190 }
 0x87f   :  { %5194 = vrcp.f32 %v1878_v58  ;;  %v5193_v9 = vpop.eup %5192  ;;  %v1891_v15 = vadd.f32 1.0, %v5191_v35 }
 0x880   :  { %5196 = vrcp.f32 %v1884_v62 }
 0x881   :  { %5198 = vrcp.f32 %v1891_v15 }
 0x889   :  { %v5195_v37 = vpop.eup %5194 }
 0x88a   :  { %v5197_v18 = vpop.eup %5196  ;;  %v1895_v2 = vmul.f32 %v5195_v37, %v5193_v9 }
 0x88b   :  { %v1894_v11 = vmul.f32 %v5197_v18, %v6034_v25  ;;  %v5199_v1 = vpop.eup %5198  ;;  %v1974_v25 = vld [vmem:[%s6531_s6] sm:$0xf] }
 0x88c   :  { %v6223_v45 = vrot.slane %v1974_v25, %v160_v31  ;;  %v6227_v21 = vrot.slane %v1974_v25, %v164_v34  ;;  %v6233_v32 = vrot.slane %v1974_v25, %v172_v42  ;;  %v6238_v34 = vrot.slane %v1974_v25, %v168_v59 }
 0x88d   :  { %v1896_v57 = vadd.f32 %v1895_v2, %v1894_v11 }
 0x88f   :  { %5200 = vtanh.f32 %v1896_v57  ;;  %1901 = vst [vmem:[%s6534_s9] sm:$0xff] %v1896_v57 }
 0x899   :  { %v5201_v49 = vpop.eup %5200 }
 0x89a   :  { %v1898_v33 = vmul.f32 %v5201_v49, %v5199_v1 }
 0x89c   :  { %1900 = vst [vmem:[%s6533_s8] sm:$0xff] %v1898_v33  ;;  %2103 = vmatmul.mubr.f32.gmra.mrb[30].mxu0 %v1898_v33  ;;  %2216 = vmatmul.mubr.f32.gmra.mrb[30].mxu1 %v1898_v33 }
 0x89d   :  { %2386 = vmatprep.mubr.f32.mxu0 %v5430_v0  ;;  %2457 = vmatprep.mubr.f32.mxu1 %v5430_v0 }
 0x8a0   :  { %2387 = vmatmul.mubr.f32.vlgmr.msra.gmra.mrb[16].mxu0 %v5430_v0  ;;  %2458 = vmatmul.mubr.f32.vlgmr.msra.gmra.mrb[16].mxu1 %v5430_v0 }
 0x8a1   :  { %4494 = vmatpush1.bf16.msra.mxu0 %v6075_v39  ;;  %4526 = vmatpush1.bf16.msra.mxu1 %v6078_v55 }
 0x8a2   :  { %4496 = vmatprep.subr.bf16.mxu0 %v6083_v61  ;;  %4528 = vmatprep.subr.bf16.mxu1 %v6085_v24 }
 0x8a3   :  { %2561 = vmatprep.mubr.f32.mxu0 %v5430_v0  ;;  %2632 = vmatprep.mubr.f32.mxu1 %v5430_v0 }
 0x8a5   :  { %4498 = vmatpush1.bf16.msra.mxu0 %v6087_v12  ;;  %4530 = vmatpush1.bf16.msra.mxu1 %v6090_v5 }
 0x8a6   :  { %4500 = vmatprep.subr.bf16.mxu0 %v6095_v53  ;;  %4532 = vmatprep.subr.bf16.mxu1 %v6097_v3 }
 0x8a9   :  { %4502 = vmatpush1.bf16.msra.mxu0 %v6099_v6  ;;  %4534 = vmatpush1.bf16.msra.mxu1 %v6102_v16 }
 0x8aa   :  { %4504 = vmatprep.subr.bf16.mxu0 %v6107_v29  ;;  %4536 = vmatprep.subr.bf16.mxu1 %v6109_v44 }
 0x8ad   :  { %4506 = vmatpush1.bf16.msra.mxu0 %v6111_v48  ;;  %4538 = vmatpush1.bf16.msra.mxu1 %v6114_v4 }
 0x8ae   :  { %4508 = vmatprep.subr.bf16.mxu0 %v6118_v22  ;;  %4540 = vmatprep.subr.bf16.mxu1 %v6120_v46 }
 0x8b1   :  { %4510 = vmatpush1.bf16.msra.mxu0 %v6123_v27  ;;  %4542 = vmatpush1.bf16.msra.mxu1 %v6127_v38 }
 0x8b2   :  { %4512 = vmatprep.subr.bf16.mxu0 %v6129_v52  ;;  %4544 = vmatprep.subr.bf16.mxu1 %v6131_v7 }
 0x8b5   :  { %4514 = vmatpush1.bf16.msra.mxu0 %v6134_v47  ;;  %4546 = vmatpush1.bf16.msra.mxu1 %v6138_v63 }
 0x8b6   :  { %4516 = vmatprep.subr.bf16.mxu0 %v6140_v10  ;;  %4548 = vmatprep.subr.bf16.mxu1 %v6143_v26 }
 0x8b9   :  { %4518 = vmatpush1.bf16.msra.mxu0 %v6146_v40  ;;  %4550 = vmatpush1.bf16.msra.mxu1 %v6150_v54 }
 0x8ba   :  { %4520 = vmatprep.subr.bf16.mxu0 %v6155_v14  ;;  %4552 = vmatprep.subr.bf16.mxu1 %v6157_v8 }
 0x8bd   :  { %4522 = vmatpush1.bf16.msra.mxu0 %v6159_v17  ;;  %4554 = vmatpush1.bf16.msra.mxu1 %v6162_v41 }
 0x8be   :  { %4556 = vmatprep.subr.bf16.mxu0 %v6071_v43  ;;  %4588 = vmatprep.subr.bf16.mxu1 %v6073_v51 }
 0x973   :  { %v2388_v20 = vpop.f32.mrb[16].mxu0  ;;  %v2459_v28 = vpop.f32.mrb[16].mxu1 }
 0x974   :  { %v4971_v50 = vadd.f32 %v2388_v20, %v6223_v45  ;;  %v2390_v56 = vpop.f32.mrb[17].mxu0  ;;  %v2461_v60 = vpop.f32.mrb[17].mxu1  ;;  %v4987_v58 = vadd.f32 %v2459_v28, %v6238_v34 }
 0x975   :  { %v4972_v13 = vadd.f32 %v2390_v56, %v6227_v21  ;;  %v4988_v31 = vadd.f32 %v2461_v60, %v6233_v32 }
 0x976   :  { %v3761_v19 = vmul.f32 -1.442695, %v4971_v50 }
 0x977   :  { %v3762_v23 = vmul.f32 -1.442695, %v4972_v13  ;;  %v3763_v36 = vmul.f32 -1.442695, %v4988_v31 }
 0x978   :  { %5202 = vpow2.f32 %v3761_v19 }
 0x979   :  { %5204 = vpow2.f32 %v3762_v23 }
 0x97a   :  { %5206 = vpow2.f32 %v3763_v36 }
 0x97b   :  { %5208 = vtanh.f32 %v4987_v58 }
 0x982   :  { %v5203_v62 = vpop.eup %5202 }
 0x983   :  { %v5205_v35 = vpop.eup %5204  ;;  %v2471_v9 = vadd.f32 1.0, %v5203_v62 }
 0x984   :  { %v2477_v37 = vadd.f32 1.0, %v5205_v35  ;;  %v5207_v42 = vpop.eup %5206 }
 0x985   :  { %5210 = vrcp.f32 %v2471_v9  ;;  %v5209_v18 = vpop.eup %5208  ;;  %v2484_v57 = vadd.f32 1.0, %v5207_v42 }
 0x986   :  { %5212 = vrcp.f32 %v2477_v37 }
 0x987   :  { %5214 = vrcp.f32 %v2484_v57 }
 0x98f   :  { %v5211_v2 = vpop.eup %5210 }
 0x990   :  { %v5213_v15 = vpop.eup %5212  ;;  %v2488_v11 = vmul.f32 %v5211_v2, %v5209_v18 }
 0x991   :  { %v2487_v30 = vmul.f32 0.0, %v5213_v15  ;;  %v5215_v1 = vpop.eup %5214 }
 0x993   :  { %v6241_v59 = vadd.f32 %v2488_v11, %v2487_v30 }
 0x995   :  { %5216 = vtanh.f32 %v6241_v59 }
 0x99f   :  { %v5217_v49 = vpop.eup %5216 }
 0x9a0   :  { %v2491_v33 = vmul.f32 %v5217_v49, %v5215_v1 }
 0x9a2   :  { %2492 = vst [vmem:[%s6532_s7] sm:$0xff] %v2491_v33  ;;  %2562 = vmatmul.mubr.f32.vlgmr.msra.gmra.mrb[18].mxu0 %v2491_v33  ;;  %2633 = vmatmul.mubr.f32.vlgmr.msra.gmra.mrb[18].mxu1 %v2491_v33 }
 0x9a3   :  { %4558 = vmatpush1.bf16.msra.mxu0 %v6075_v39  ;;  %4590 = vmatpush1.bf16.msra.mxu1 %v6078_v55 }
 0x9a4   :  { %4560 = vmatprep.subr.bf16.mxu0 %v6083_v61  ;;  %4592 = vmatprep.subr.bf16.mxu1 %v6085_v24 }
 0x9a5   :  { %2736 = vmatprep.mubr.f32.mxu0 %v5430_v0  ;;  %2807 = vmatprep.mubr.f32.mxu1 %v5430_v0 }
 0x9a7   :  { %4562 = vmatpush1.bf16.msra.mxu0 %v6087_v12  ;;  %4594 = vmatpush1.bf16.msra.mxu1 %v6090_v5 }
 0x9a8   :  { %4564 = vmatprep.subr.bf16.mxu0 %v6095_v53  ;;  %4596 = vmatprep.subr.bf16.mxu1 %v6097_v3 }
 0x9ab   :  { %4566 = vmatpush1.bf16.msra.mxu0 %v6099_v6  ;;  %4598 = vmatpush1.bf16.msra.mxu1 %v6102_v16 }
 0x9ac   :  { %4568 = vmatprep.subr.bf16.mxu0 %v6107_v29  ;;  %4600 = vmatprep.subr.bf16.mxu1 %v6109_v44 }
 0x9af   :  { %4570 = vmatpush1.bf16.msra.mxu0 %v6111_v48  ;;  %4602 = vmatpush1.bf16.msra.mxu1 %v6114_v4 }
 0x9b0   :  { %4572 = vmatprep.subr.bf16.mxu0 %v6118_v22  ;;  %4604 = vmatprep.subr.bf16.mxu1 %v6120_v46 }
 0x9b3   :  { %4574 = vmatpush1.bf16.msra.mxu0 %v6123_v27  ;;  %4606 = vmatpush1.bf16.msra.mxu1 %v6127_v38 }
 0x9b4   :  { %4576 = vmatprep.subr.bf16.mxu0 %v6129_v52  ;;  %4608 = vmatprep.subr.bf16.mxu1 %v6131_v7 }
 0x9b7   :  { %4578 = vmatpush1.bf16.msra.mxu0 %v6134_v47  ;;  %4610 = vmatpush1.bf16.msra.mxu1 %v6138_v63 }
 0x9b8   :  { %4580 = vmatprep.subr.bf16.mxu0 %v6140_v10  ;;  %4612 = vmatprep.subr.bf16.mxu1 %v6143_v26 }
 0x9bb   :  { %4582 = vmatpush1.bf16.msra.mxu0 %v6146_v40  ;;  %4614 = vmatpush1.bf16.msra.mxu1 %v6150_v54 }
 0x9bc   :  { %4584 = vmatprep.subr.bf16.mxu0 %v6155_v14  ;;  %4616 = vmatprep.subr.bf16.mxu1 %v6157_v8 }
 0x9bf   :  { %4586 = vmatpush1.bf16.msra.mxu0 %v6159_v17  ;;  %4618 = vmatpush1.bf16.msra.mxu1 %v6162_v41 }
 0x9c0   :  { %4620 = vmatprep.subr.bf16.mxu0 %v6071_v43  ;;  %4652 = vmatprep.subr.bf16.mxu1 %v6073_v51 }
 0xa75   :  { %v2563_v25 = vpop.f32.mrb[18].mxu0  ;;  %v2634_v20 = vpop.f32.mrb[18].mxu1 }
 0xa76   :  { %v4973_v28 = vadd.f32 %v2563_v25, %v6223_v45  ;;  %v2565_v50 = vpop.f32.mrb[19].mxu0  ;;  %v2636_v56 = vpop.f32.mrb[19].mxu1  ;;  %v4989_v36 = vadd.f32 %v2634_v20, %v6238_v34 }
 0xa77   :  { %v4974_v60 = vadd.f32 %v2565_v50, %v6227_v21  ;;  %v4990_v23 = vadd.f32 %v2636_v56, %v6233_v32 }
 0xa78   :  { %v3764_v13 = vmul.f32 -1.442695, %v4973_v28 }
 0xa79   :  { %v3765_v19 = vmul.f32 -1.442695, %v4974_v60  ;;  %v3766_v31 = vmul.f32 -1.442695, %v4990_v23 }
 0xa7a   :  { %5218 = vpow2.f32 %v3764_v13 }
 0xa7b   :  { %5220 = vpow2.f32 %v3765_v19 }
 0xa7c   :  { %5222 = vpow2.f32 %v3766_v31 }
 0xa7d   :  { %5224 = vtanh.f32 %v4989_v36 }
 0xa84   :  { %v5219_v58 = vpop.eup %5218 }
 0xa85   :  { %v5221_v62 = vpop.eup %5220  ;;  %v2646_v35 = vadd.f32 1.0, %v5219_v58 }
 0xa86   :  { %v2652_v9 = vadd.f32 1.0, %v5221_v62  ;;  %v5223_v37 = vpop.eup %5222 }
 0xa87   :  { %5226 = vrcp.f32 %v2646_v35  ;;  %v5225_v42 = vpop.eup %5224  ;;  %v2659_v11 = vadd.f32 1.0, %v5223_v37 }
 0xa88   :  { %5228 = vrcp.f32 %v2652_v9 }
 0xa89   :  { %5230 = vrcp.f32 %v2659_v11 }
 0xa91   :  { %v5227_v18 = vpop.eup %5226 }
 0xa92   :  { %v5229_v2 = vpop.eup %5228  ;;  %v2663_v15 = vmul.f32 %v5227_v18, %v5225_v42 }
 0xa93   :  { %v2662_v57 = vmul.f32 %v5229_v2, %v6241_v59  ;;  %v5231_v1 = vpop.eup %5230 }
 0xa95   :  { %v6286_v30 = vadd.f32 %v2663_v15, %v2662_v57 }
 0xa97   :  { %5232 = vtanh.f32 %v6286_v30 }
 0xaa1   :  { %v5233_v49 = vpop.eup %5232 }
 0xaa2   :  { %v2666_v33 = vmul.f32 %v5233_v49, %v5231_v1 }
 0xaa4   :  { %2667 = vst [vmem:[%s6532_s7 + $0x8] sm:$0xff] %v2666_v33  ;;  %2737 = vmatmul.mubr.f32.vlgmr.msra.gmra.mrb[20].mxu0 %v2666_v33  ;;  %2808 = vmatmul.mubr.f32.vlgmr.msra.gmra.mrb[20].mxu1 %v2666_v33 }
 0xaa5   :  { %4622 = vmatpush1.bf16.msra.mxu0 %v6075_v39  ;;  %4654 = vmatpush1.bf16.msra.mxu1 %v6078_v55 }
 0xaa6   :  { %4624 = vmatprep.subr.bf16.mxu0 %v6083_v61  ;;  %4656 = vmatprep.subr.bf16.mxu1 %v6085_v24 }
 0xaa7   :  { %2911 = vmatprep.mubr.f32.mxu0 %v5430_v0  ;;  %2982 = vmatprep.mubr.f32.mxu1 %v5430_v0 }
 0xaa9   :  { %4626 = vmatpush1.bf16.msra.mxu0 %v6087_v12  ;;  %4658 = vmatpush1.bf16.msra.mxu1 %v6090_v5 }
 0xaaa   :  { %4628 = vmatprep.subr.bf16.mxu0 %v6095_v53  ;;  %4660 = vmatprep.subr.bf16.mxu1 %v6097_v3 }
 0xaad   :  { %4630 = vmatpush1.bf16.msra.mxu0 %v6099_v6  ;;  %4662 = vmatpush1.bf16.msra.mxu1 %v6102_v16 }
 0xaae   :  { %4632 = vmatprep.subr.bf16.mxu0 %v6107_v29  ;;  %4664 = vmatprep.subr.bf16.mxu1 %v6109_v44 }
 0xab1   :  { %4634 = vmatpush1.bf16.msra.mxu0 %v6111_v48  ;;  %4666 = vmatpush1.bf16.msra.mxu1 %v6114_v4 }
 0xab2   :  { %4636 = vmatprep.subr.bf16.mxu0 %v6118_v22  ;;  %4668 = vmatprep.subr.bf16.mxu1 %v6120_v46 }
 0xab5   :  { %4638 = vmatpush1.bf16.msra.mxu0 %v6123_v27  ;;  %4670 = vmatpush1.bf16.msra.mxu1 %v6127_v38 }
 0xab6   :  { %4640 = vmatprep.subr.bf16.mxu0 %v6129_v52  ;;  %4672 = vmatprep.subr.bf16.mxu1 %v6131_v7 }
 0xab9   :  { %4642 = vmatpush1.bf16.msra.mxu0 %v6134_v47  ;;  %4674 = vmatpush1.bf16.msra.mxu1 %v6138_v63 }
 0xaba   :  { %4644 = vmatprep.subr.bf16.mxu0 %v6140_v10  ;;  %4676 = vmatprep.subr.bf16.mxu1 %v6143_v26 }
 0xabd   :  { %4646 = vmatpush1.bf16.msra.mxu0 %v6146_v40  ;;  %4678 = vmatpush1.bf16.msra.mxu1 %v6150_v54 }
 0xabe   :  { %4648 = vmatprep.subr.bf16.mxu0 %v6155_v14  ;;  %4680 = vmatprep.subr.bf16.mxu1 %v6157_v8 }
 0xac1   :  { %4650 = vmatpush1.bf16.msra.mxu0 %v6159_v17  ;;  %4682 = vmatpush1.bf16.msra.mxu1 %v6162_v41 }
 0xac2   :  { %4684 = vmatprep.subr.bf16.mxu0 %v6071_v43  ;;  %4716 = vmatprep.subr.bf16.mxu1 %v6073_v51 }
 0xb77   :  { %v2738_v59 = vpop.f32.mrb[20].mxu0  ;;  %v2809_v25 = vpop.f32.mrb[20].mxu1 }
 0xb78   :  { %v4975_v20 = vadd.f32 %v2738_v59, %v6223_v45  ;;  %v2740_v28 = vpop.f32.mrb[21].mxu0  ;;  %v2811_v50 = vpop.f32.mrb[21].mxu1  ;;  %v4991_v31 = vadd.f32 %v2809_v25, %v6238_v34 }
 0xb79   :  { %v4976_v56 = vadd.f32 %v2740_v28, %v6227_v21  ;;  %v4992_v19 = vadd.f32 %v2811_v50, %v6233_v32 }
 0xb7a   :  { %v3767_v60 = vmul.f32 -1.442695, %v4975_v20 }
 0xb7b   :  { %v3768_v13 = vmul.f32 -1.442695, %v4976_v56  ;;  %v3769_v23 = vmul.f32 -1.442695, %v4992_v19 }
 0xb7c   :  { %5234 = vpow2.f32 %v3767_v60 }
 0xb7d   :  { %5236 = vpow2.f32 %v3768_v13 }
 0xb7e   :  { %5238 = vpow2.f32 %v3769_v23 }
 0xb7f   :  { %5240 = vtanh.f32 %v4991_v31 }
 0xb86   :  { %v5235_v36 = vpop.eup %5234 }
 0xb87   :  { %v5237_v58 = vpop.eup %5236  ;;  %v2821_v62 = vadd.f32 1.0, %v5235_v36 }
 0xb88   :  { %v2827_v35 = vadd.f32 1.0, %v5237_v58  ;;  %v5239_v9 = vpop.eup %5238 }
 0xb89   :  { %5242 = vrcp.f32 %v2821_v62  ;;  %v5241_v37 = vpop.eup %5240  ;;  %v2834_v15 = vadd.f32 1.0, %v5239_v9 }
 0xb8a   :  { %5244 = vrcp.f32 %v2827_v35 }
 0xb8b   :  { %5246 = vrcp.f32 %v2834_v15 }
 0xb93   :  { %v5243_v42 = vpop.eup %5242 }
 0xb94   :  { %v5245_v18 = vpop.eup %5244  ;;  %v2838_v2 = vmul.f32 %v5243_v42, %v5241_v37 }
 0xb95   :  { %v2837_v11 = vmul.f32 %v5245_v18, %v6286_v30  ;;  %v5247_v1 = vpop.eup %5246 }
 0xb97   :  { %v6331_v57 = vadd.f32 %v2838_v2, %v2837_v11 }
 0xb99   :  { %5248 = vtanh.f32 %v6331_v57 }
 0xba3   :  { %v5249_v49 = vpop.eup %5248 }
 0xba4   :  { %v2841_v33 = vmul.f32 %v5249_v49, %v5247_v1 }
 0xba6   :  { %2842 = vst [vmem:[%s6532_s7 + $0x10] sm:$0xff] %v2841_v33  ;;  %2912 = vmatmul.mubr.f32.vlgmr.msra.gmra.mrb[22].mxu0 %v2841_v33  ;;  %2983 = vmatmul.mubr.f32.vlgmr.msra.gmra.mrb[22].mxu1 %v2841_v33 }
 0xba7   :  { %4686 = vmatpush1.bf16.msra.mxu0 %v6075_v39  ;;  %4718 = vmatpush1.bf16.msra.mxu1 %v6078_v55 }
 0xba8   :  { %4688 = vmatprep.subr.bf16.mxu0 %v6083_v61  ;;  %4720 = vmatprep.subr.bf16.mxu1 %v6085_v24 }
 0xba9   :  { %3086 = vmatprep.mubr.f32.mxu0 %v5430_v0  ;;  %3157 = vmatprep.mubr.f32.mxu1 %v5430_v0 }
 0xbab   :  { %4690 = vmatpush1.bf16.msra.mxu0 %v6087_v12  ;;  %4722 = vmatpush1.bf16.msra.mxu1 %v6090_v5 }
 0xbac   :  { %4692 = vmatprep.subr.bf16.mxu0 %v6095_v53  ;;  %4724 = vmatprep.subr.bf16.mxu1 %v6097_v3 }
 0xbaf   :  { %4694 = vmatpush1.bf16.msra.mxu0 %v6099_v6  ;;  %4726 = vmatpush1.bf16.msra.mxu1 %v6102_v16 }
 0xbb0   :  { %4696 = vmatprep.subr.bf16.mxu0 %v6107_v29  ;;  %4728 = vmatprep.subr.bf16.mxu1 %v6109_v44 }
 0xbb3   :  { %4698 = vmatpush1.bf16.msra.mxu0 %v6111_v48  ;;  %4730 = vmatpush1.bf16.msra.mxu1 %v6114_v4 }
 0xbb4   :  { %4700 = vmatprep.subr.bf16.mxu0 %v6118_v22  ;;  %4732 = vmatprep.subr.bf16.mxu1 %v6120_v46 }
 0xbb7   :  { %4702 = vmatpush1.bf16.msra.mxu0 %v6123_v27  ;;  %4734 = vmatpush1.bf16.msra.mxu1 %v6127_v38 }
 0xbb8   :  { %4704 = vmatprep.subr.bf16.mxu0 %v6129_v52  ;;  %4736 = vmatprep.subr.bf16.mxu1 %v6131_v7 }
 0xbbb   :  { %4706 = vmatpush1.bf16.msra.mxu0 %v6134_v47  ;;  %4738 = vmatpush1.bf16.msra.mxu1 %v6138_v63 }
 0xbbc   :  { %4708 = vmatprep.subr.bf16.mxu0 %v6140_v10  ;;  %4740 = vmatprep.subr.bf16.mxu1 %v6143_v26 }
 0xbbf   :  { %4710 = vmatpush1.bf16.msra.mxu0 %v6146_v40  ;;  %4742 = vmatpush1.bf16.msra.mxu1 %v6150_v54 }
 0xbc0   :  { %4712 = vmatprep.subr.bf16.mxu0 %v6155_v14  ;;  %4744 = vmatprep.subr.bf16.mxu1 %v6157_v8 }
 0xbc3   :  { %4714 = vmatpush1.bf16.msra.mxu0 %v6159_v17  ;;  %4746 = vmatpush1.bf16.msra.mxu1 %v6162_v41 }
 0xbc4   :  { %4748 = vmatprep.subr.bf16.mxu0 %v6071_v43  ;;  %4780 = vmatprep.subr.bf16.mxu1 %v6073_v51 }
 0xc79   :  { %v2913_v30 = vpop.f32.mrb[22].mxu0  ;;  %v2984_v59 = vpop.f32.mrb[22].mxu1 }
 0xc7a   :  { %v4977_v25 = vadd.f32 %v2913_v30, %v6223_v45  ;;  %v2915_v20 = vpop.f32.mrb[23].mxu0  ;;  %v2986_v28 = vpop.f32.mrb[23].mxu1  ;;  %v4993_v23 = vadd.f32 %v2984_v59, %v6238_v34 }
 0xc7b   :  { %v4978_v50 = vadd.f32 %v2915_v20, %v6227_v21  ;;  %v4994_v13 = vadd.f32 %v2986_v28, %v6233_v32 }
 0xc7c   :  { %v3770_v56 = vmul.f32 -1.442695, %v4977_v25 }
 0xc7d   :  { %v3771_v60 = vmul.f32 -1.442695, %v4978_v50  ;;  %v3772_v19 = vmul.f32 -1.442695, %v4994_v13 }
 0xc7e   :  { %5250 = vpow2.f32 %v3770_v56 }
 0xc7f   :  { %5252 = vpow2.f32 %v3771_v60 }
 0xc80   :  { %5254 = vpow2.f32 %v3772_v19 }
 0xc81   :  { %5256 = vtanh.f32 %v4993_v23 }
 0xc88   :  { %v5251_v31 = vpop.eup %5250 }
 0xc89   :  { %v5253_v36 = vpop.eup %5252  ;;  %v2996_v58 = vadd.f32 1.0, %v5251_v31 }
 0xc8a   :  { %v3002_v62 = vadd.f32 1.0, %v5253_v36  ;;  %v5255_v35 = vpop.eup %5254 }
 0xc8b   :  { %5258 = vrcp.f32 %v2996_v58  ;;  %v5257_v9 = vpop.eup %5256  ;;  %v3009_v2 = vadd.f32 1.0, %v5255_v35 }
 0xc8c   :  { %5260 = vrcp.f32 %v3002_v62 }
 0xc8d   :  { %5262 = vrcp.f32 %v3009_v2 }
 0xc95   :  { %v5259_v37 = vpop.eup %5258 }
 0xc96   :  { %v5261_v42 = vpop.eup %5260  ;;  %v3013_v18 = vmul.f32 %v5259_v37, %v5257_v9 }
 0xc97   :  { %v3012_v15 = vmul.f32 %v5261_v42, %v6331_v57  ;;  %v5263_v1 = vpop.eup %5262 }
 0xc99   :  { %v6376_v11 = vadd.f32 %v3013_v18, %v3012_v15 }
 0xc9b   :  { %5264 = vtanh.f32 %v6376_v11 }
 0xca5   :  { %v5265_v49 = vpop.eup %5264 }
 0xca6   :  { %v3016_v33 = vmul.f32 %v5265_v49, %v5263_v1 }
 0xca8   :  { %3017 = vst [vmem:[%s6532_s7 + $0x18] sm:$0xff] %v3016_v33  ;;  %3087 = vmatmul.mubr.f32.vlgmr.msra.gmra.mrb[24].mxu0 %v3016_v33  ;;  %3158 = vmatmul.mubr.f32.vlgmr.msra.gmra.mrb[24].mxu1 %v3016_v33 }
 0xca9   :  { %4750 = vmatpush1.bf16.msra.mxu0 %v6075_v39  ;;  %4782 = vmatpush1.bf16.msra.mxu1 %v6078_v55 }
 0xcaa   :  { %4752 = vmatprep.subr.bf16.mxu0 %v6083_v61  ;;  %4784 = vmatprep.subr.bf16.mxu1 %v6085_v24 }
 0xcab   :  { %3261 = vmatprep.mubr.f32.mxu0 %v5430_v0  ;;  %3332 = vmatprep.mubr.f32.mxu1 %v5430_v0 }
 0xcad   :  { %4754 = vmatpush1.bf16.msra.mxu0 %v6087_v12  ;;  %4786 = vmatpush1.bf16.msra.mxu1 %v6090_v5 }
 0xcae   :  { %4756 = vmatprep.subr.bf16.mxu0 %v6095_v53  ;;  %4788 = vmatprep.subr.bf16.mxu1 %v6097_v3 }
 0xcb1   :  { %4758 = vmatpush1.bf16.msra.mxu0 %v6099_v6  ;;  %4790 = vmatpush1.bf16.msra.mxu1 %v6102_v16 }
 0xcb2   :  { %4760 = vmatprep.subr.bf16.mxu0 %v6107_v29  ;;  %4792 = vmatprep.subr.bf16.mxu1 %v6109_v44 }
 0xcb5   :  { %4762 = vmatpush1.bf16.msra.mxu0 %v6111_v48  ;;  %4794 = vmatpush1.bf16.msra.mxu1 %v6114_v4 }
 0xcb6   :  { %4764 = vmatprep.subr.bf16.mxu0 %v6118_v22  ;;  %4796 = vmatprep.subr.bf16.mxu1 %v6120_v46 }
 0xcb9   :  { %4766 = vmatpush1.bf16.msra.mxu0 %v6123_v27  ;;  %4798 = vmatpush1.bf16.msra.mxu1 %v6127_v38 }
 0xcba   :  { %4768 = vmatprep.subr.bf16.mxu0 %v6129_v52  ;;  %4800 = vmatprep.subr.bf16.mxu1 %v6131_v7 }
 0xcbd   :  { %4770 = vmatpush1.bf16.msra.mxu0 %v6134_v47  ;;  %4802 = vmatpush1.bf16.msra.mxu1 %v6138_v63 }
 0xcbe   :  { %4772 = vmatprep.subr.bf16.mxu0 %v6140_v10  ;;  %4804 = vmatprep.subr.bf16.mxu1 %v6143_v26 }
 0xcc1   :  { %4774 = vmatpush1.bf16.msra.mxu0 %v6146_v40  ;;  %4806 = vmatpush1.bf16.msra.mxu1 %v6150_v54 }
 0xcc2   :  { %4776 = vmatprep.subr.bf16.mxu0 %v6155_v14  ;;  %4808 = vmatprep.subr.bf16.mxu1 %v6157_v8 }
 0xcc5   :  { %4778 = vmatpush1.bf16.msra.mxu0 %v6159_v17  ;;  %4810 = vmatpush1.bf16.msra.mxu1 %v6162_v41 }
 0xcc6   :  { %4812 = vmatprep.subr.bf16.mxu0 %v6071_v43  ;;  %4844 = vmatprep.subr.bf16.mxu1 %v6073_v51 }
 0xd7b   :  { %v3088_v57 = vpop.f32.mrb[24].mxu0  ;;  %v3159_v30 = vpop.f32.mrb[24].mxu1 }
 0xd7c   :  { %v4979_v59 = vadd.f32 %v3088_v57, %v6223_v45  ;;  %v3090_v25 = vpop.f32.mrb[25].mxu0  ;;  %v3161_v20 = vpop.f32.mrb[25].mxu1  ;;  %v4995_v19 = vadd.f32 %v3159_v30, %v6238_v34 }
 0xd7d   :  { %v4980_v28 = vadd.f32 %v3090_v25, %v6227_v21  ;;  %v4996_v60 = vadd.f32 %v3161_v20, %v6233_v32 }
 0xd7e   :  { %v3773_v50 = vmul.f32 -1.442695, %v4979_v59 }
 0xd7f   :  { %v3774_v56 = vmul.f32 -1.442695, %v4980_v28  ;;  %v3775_v13 = vmul.f32 -1.442695, %v4996_v60 }
 0xd80   :  { %5266 = vpow2.f32 %v3773_v50 }
 0xd81   :  { %5268 = vpow2.f32 %v3774_v56 }
 0xd82   :  { %5270 = vpow2.f32 %v3775_v13 }
 0xd83   :  { %5272 = vtanh.f32 %v4995_v19 }
 0xd8a   :  { %v5267_v23 = vpop.eup %5266 }
 0xd8b   :  { %v5269_v31 = vpop.eup %5268  ;;  %v3171_v36 = vadd.f32 1.0, %v5267_v23 }
 0xd8c   :  { %v3177_v58 = vadd.f32 1.0, %v5269_v31  ;;  %v5271_v62 = vpop.eup %5270 }
 0xd8d   :  { %5274 = vrcp.f32 %v3171_v36  ;;  %v5273_v35 = vpop.eup %5272  ;;  %v3184_v18 = vadd.f32 1.0, %v5271_v62 }
 0xd8e   :  { %5276 = vrcp.f32 %v3177_v58 }
 0xd8f   :  { %5278 = vrcp.f32 %v3184_v18 }
 0xd97   :  { %v5275_v9 = vpop.eup %5274 }
 0xd98   :  { %v5277_v37 = vpop.eup %5276  ;;  %v3188_v42 = vmul.f32 %v5275_v9, %v5273_v35 }
 0xd99   :  { %v3187_v2 = vmul.f32 %v5277_v37, %v6376_v11  ;;  %v5279_v1 = vpop.eup %5278 }
 0xd9b   :  { %v6421_v15 = vadd.f32 %v3188_v42, %v3187_v2 }
 0xd9d   :  { %5280 = vtanh.f32 %v6421_v15 }
 0xda7   :  { %v5281_v49 = vpop.eup %5280 }
 0xda8   :  { %v3191_v33 = vmul.f32 %v5281_v49, %v5279_v1 }
 0xdaa   :  { %3192 = vst [vmem:[%s6532_s7 + $0x20] sm:$0xff] %v3191_v33  ;;  %3262 = vmatmul.mubr.f32.vlgmr.msra.gmra.mrb[26].mxu0 %v3191_v33  ;;  %3333 = vmatmul.mubr.f32.vlgmr.msra.gmra.mrb[26].mxu1 %v3191_v33 }
 0xdab   :  { %4814 = vmatpush1.bf16.msra.mxu0 %v6075_v39  ;;  %4846 = vmatpush1.bf16.msra.mxu1 %v6078_v55 }
 0xdac   :  { %4816 = vmatprep.subr.bf16.mxu0 %v6083_v61  ;;  %4848 = vmatprep.subr.bf16.mxu1 %v6085_v24 }
 0xdad   :  { %3436 = vmatprep.mubr.f32.mxu0 %v5430_v0  ;;  %3507 = vmatprep.mubr.f32.mxu1 %v5430_v0 }
 0xdaf   :  { %4818 = vmatpush1.bf16.msra.mxu0 %v6087_v12  ;;  %4850 = vmatpush1.bf16.msra.mxu1 %v6090_v5 }
 0xdb0   :  { %4820 = vmatprep.subr.bf16.mxu0 %v6095_v53  ;;  %4852 = vmatprep.subr.bf16.mxu1 %v6097_v3 }
 0xdb3   :  { %4822 = vmatpush1.bf16.msra.mxu0 %v6099_v6  ;;  %4854 = vmatpush1.bf16.msra.mxu1 %v6102_v16 }
 0xdb4   :  { %4824 = vmatprep.subr.bf16.mxu0 %v6107_v29  ;;  %4856 = vmatprep.subr.bf16.mxu1 %v6109_v44 }
 0xdb7   :  { %4826 = vmatpush1.bf16.msra.mxu0 %v6111_v48  ;;  %4858 = vmatpush1.bf16.msra.mxu1 %v6114_v4 }
 0xdb8   :  { %4828 = vmatprep.subr.bf16.mxu0 %v6118_v22  ;;  %4860 = vmatprep.subr.bf16.mxu1 %v6120_v46 }
 0xdbb   :  { %4830 = vmatpush1.bf16.msra.mxu0 %v6123_v27  ;;  %4862 = vmatpush1.bf16.msra.mxu1 %v6127_v38 }
 0xdbc   :  { %4832 = vmatprep.subr.bf16.mxu0 %v6129_v52  ;;  %4864 = vmatprep.subr.bf16.mxu1 %v6131_v7 }
 0xdbf   :  { %4834 = vmatpush1.bf16.msra.mxu0 %v6134_v47  ;;  %4866 = vmatpush1.bf16.msra.mxu1 %v6138_v63 }
 0xdc0   :  { %4836 = vmatprep.subr.bf16.mxu0 %v6140_v10  ;;  %4868 = vmatprep.subr.bf16.mxu1 %v6143_v26 }
 0xdc3   :  { %4838 = vmatpush1.bf16.msra.mxu0 %v6146_v40  ;;  %4870 = vmatpush1.bf16.msra.mxu1 %v6150_v54 }
 0xdc4   :  { %4840 = vmatprep.subr.bf16.mxu0 %v6155_v14  ;;  %4872 = vmatprep.subr.bf16.mxu1 %v6157_v8 }
 0xdc7   :  { %4842 = vmatpush1.bf16.msra.mxu0 %v6159_v17  ;;  %4874 = vmatpush1.bf16.msra.mxu1 %v6162_v41 }
 0xdc8   :  { %4876 = vmatprep.subr.bf16.mxu0 %v6071_v43  ;;  %4908 = vmatprep.subr.bf16.mxu1 %v6073_v51 }
 0xe7d   :  { %v3263_v11 = vpop.f32.mrb[26].mxu0  ;;  %v3334_v57 = vpop.f32.mrb[26].mxu1 }
 0xe7e   :  { %v4981_v30 = vadd.f32 %v3263_v11, %v6223_v45  ;;  %v3265_v59 = vpop.f32.mrb[27].mxu0  ;;  %v3336_v25 = vpop.f32.mrb[27].mxu1  ;;  %v4997_v13 = vadd.f32 %v3334_v57, %v6238_v34 }
 0xe7f   :  { %v4982_v20 = vadd.f32 %v3265_v59, %v6227_v21  ;;  %v4998_v56 = vadd.f32 %v3336_v25, %v6233_v32 }
 0xe80   :  { %v3776_v28 = vmul.f32 -1.442695, %v4981_v30 }
 0xe81   :  { %v3777_v50 = vmul.f32 -1.442695, %v4982_v20  ;;  %v3778_v60 = vmul.f32 -1.442695, %v4998_v56 }
 0xe82   :  { %5282 = vpow2.f32 %v3776_v28 }
 0xe83   :  { %5284 = vpow2.f32 %v3777_v50 }
 0xe84   :  { %5286 = vpow2.f32 %v3778_v60 }
 0xe85   :  { %5288 = vtanh.f32 %v4997_v13 }
 0xe8c   :  { %v5283_v43 = vpop.eup %5282 }
 0xe8d   :  { %v5285_v19 = vpop.eup %5284  ;;  %v3346_v51 = vadd.f32 1.0, %v5283_v43 }
 0xe8e   :  { %v3352_v23 = vadd.f32 1.0, %v5285_v19  ;;  %v5287_v31 = vpop.eup %5286 }
 0xe8f   :  { %5290 = vrcp.f32 %v3346_v51  ;;  %v5289_v36 = vpop.eup %5288  ;;  %v3359_v9 = vadd.f32 1.0, %v5287_v31 }
 0xe90   :  { %5292 = vrcp.f32 %v3352_v23 }
 0xe91   :  { %5294 = vrcp.f32 %v3359_v9 }
 0xe99   :  { %v5291_v58 = vpop.eup %5290 }
 0xe9a   :  { %v5293_v62 = vpop.eup %5292  ;;  %v3363_v35 = vmul.f32 %v5291_v58, %v5289_v36 }
 0xe9b   :  { %v3362_v37 = vmul.f32 %v5293_v62, %v6421_v15  ;;  %v5295_v18 = vpop.eup %5294 }
 0xe9d   :  { %v6466_v42 = vadd.f32 %v3363_v35, %v3362_v37 }
 0xe9f   :  { %5296 = vtanh.f32 %v6466_v42 }
 0xea9   :  { %v5297_v2 = vpop.eup %5296 }
 0xeaa   :  { %v3366_v1 = vmul.f32 %v5297_v2, %v5295_v18 }
 0xeac   :  { %3367 = vst [vmem:[%s6532_s7 + $0x28] sm:$0xff] %v3366_v1  ;;  %3437 = vmatmul.mubr.f32.vlgmr.msra.gmra.mrb[28].mxu0 %v3366_v1  ;;  %3508 = vmatmul.mubr.f32.vlgmr.msra.gmra.mrb[28].mxu1 %v3366_v1 }
 0xead   :  { %4878 = vmatpush1.bf16.msra.mxu0 %v6075_v39  ;;  %4910 = vmatpush1.bf16.msra.mxu1 %v6078_v55 }
 0xeae   :  { %4880 = vmatprep.subr.bf16.mxu0 %v6083_v61  ;;  %4912 = vmatprep.subr.bf16.mxu1 %v6085_v24 }
 0xeaf   :  { %3611 = vmatprep.mubr.f32.mxu0 %v5430_v0  ;;  %3682 = vmatprep.mubr.f32.mxu1 %v5430_v0 }
 0xeb1   :  { %4882 = vmatpush1.bf16.msra.mxu0 %v6087_v12  ;;  %4914 = vmatpush1.bf16.msra.mxu1 %v6090_v5 }
 0xeb2   :  { %4884 = vmatprep.subr.bf16.mxu0 %v6095_v53  ;;  %4916 = vmatprep.subr.bf16.mxu1 %v6097_v3 }
 0xeb5   :  { %4886 = vmatpush1.bf16.msra.mxu0 %v6099_v6  ;;  %4918 = vmatpush1.bf16.msra.mxu1 %v6102_v16 }
 0xeb6   :  { %4888 = vmatprep.subr.bf16.mxu0 %v6107_v29  ;;  %4920 = vmatprep.subr.bf16.mxu1 %v6109_v44 }
 0xeb9   :  { %4890 = vmatpush1.bf16.msra.mxu0 %v6111_v48  ;;  %4922 = vmatpush1.bf16.msra.mxu1 %v6114_v4 }
 0xeba   :  { %4892 = vmatprep.subr.bf16.mxu0 %v6118_v22  ;;  %4924 = vmatprep.subr.bf16.mxu1 %v6120_v46 }
 0xebd   :  { %4894 = vmatpush1.bf16.msra.mxu0 %v6123_v27  ;;  %4926 = vmatpush1.bf16.msra.mxu1 %v6127_v38 }
 0xebe   :  { %4896 = vmatprep.subr.bf16.mxu0 %v6129_v52  ;;  %4928 = vmatprep.subr.bf16.mxu1 %v6131_v7 }
 0xec1   :  { %4898 = vmatpush1.bf16.msra.mxu0 %v6134_v47  ;;  %4930 = vmatpush1.bf16.msra.mxu1 %v6138_v63 }
 0xec2   :  { %4900 = vmatprep.subr.bf16.mxu0 %v6140_v10  ;;  %4932 = vmatprep.subr.bf16.mxu1 %v6143_v26 }
 0xec5   :  { %4902 = vmatpush1.bf16.msra.mxu0 %v6146_v40  ;;  %4934 = vmatpush1.bf16.msra.mxu1 %v6150_v54 }
 0xec6   :  { %4904 = vmatprep.subr.bf16.mxu0 %v6155_v14  ;;  %4936 = vmatprep.subr.bf16.mxu1 %v6157_v8 }
 0xec9   :  { %4906 = vmatpush1.bf16.msra.mxu0 %v6159_v17  ;;  %4938 = vmatpush1.bf16.msra.mxu1 %v6162_v41 }
 0xf7f   :  { %v3438_v0 = vpop.f32.mrb[28].mxu0  ;;  %v3509_v39 = vpop.f32.mrb[28].mxu1 }
 0xf80   :  { %v4983_v55 = vadd.f32 %v3438_v0, %v6223_v45  ;;  %v3440_v61 = vpop.f32.mrb[29].mxu0  ;;  %v3511_v24 = vpop.f32.mrb[29].mxu1  ;;  %v4999_v16 = vadd.f32 %v3509_v39, %v6238_v34 }
 0xf81   :  { %v4984_v12 = vadd.f32 %v3440_v61, %v6227_v21  ;;  %v5000_v3 = vadd.f32 %v3511_v24, %v6233_v32 }
 0xf82   :  { %v3779_v5 = vmul.f32 -1.442695, %v4983_v55 }
 0xf83   :  { %v3780_v53 = vmul.f32 -1.442695, %v4984_v12  ;;  %v3781_v6 = vmul.f32 -1.442695, %v5000_v3 }
 0xf84   :  { %5298 = vpow2.f32 %v3779_v5 }
 0xf85   :  { %5300 = vpow2.f32 %v3780_v53 }
 0xf86   :  { %5302 = vpow2.f32 %v3781_v6 }
 0xf87   :  { %5304 = vtanh.f32 %v4999_v16 }
 0xf8e   :  { %v5299_v29 = vpop.eup %5298 }
 0xf8f   :  { %v5301_v44 = vpop.eup %5300  ;;  %v3521_v48 = vadd.f32 1.0, %v5299_v29 }
 0xf90   :  { %v3527_v4 = vadd.f32 1.0, %v5301_v44  ;;  %v5303_v22 = vpop.eup %5302 }
 0xf91   :  { %5306 = vrcp.f32 %v3521_v48  ;;  %v5305_v46 = vpop.eup %5304  ;;  %v3534_v7 = vadd.f32 1.0, %v5303_v22 }
 0xf92   :  { %5308 = vrcp.f32 %v3527_v4 }
 0xf93   :  { %5310 = vrcp.f32 %v3534_v7 }
 0xf9b   :  { %v5307_v27 = vpop.eup %5306 }
 0xf9c   :  { %v5309_v38 = vpop.eup %5308  ;;  %v3538_v52 = vmul.f32 %v5307_v27, %v5305_v46 }
 0xf9d   :  { %v3537_v47 = vmul.f32 %v5309_v38, %v6466_v42  ;;  %v5311_v10 = vpop.eup %5310 }
 0xf9f   :  { %v3539_v63 = vadd.f32 %v3538_v52, %v3537_v47 }
 0xfa1   :  { %5312 = vtanh.f32 %v3539_v63 }
 0xfab   :  { %v5313_v26 = vpop.eup %5312 }
 0xfac   :  { %v3541_v40 = vmul.f32 %v5313_v26, %v5311_v10 }
 0xfae   :  { %3542 = vst [vmem:[%s6532_s7 + $0x30] sm:$0xff] %v3541_v40  ;;  %3612 = vmatmul.mubr.f32.vlgmr.msra.gmra.mrb[30].mxu0 %v3541_v40  ;;  %3683 = vmatmul.mubr.f32.vlgmr.msra.gmra.mrb[30].mxu1 %v3541_v40 }
0x1081   :  { %v3613_v54 = vpop.f32.mrb[30].mxu0  ;;  %v3684_v14 = vpop.f32.mrb[30].mxu1 }
0x1082   :  { %v4985_v8 = vadd.f32 %v3613_v54, %v6223_v45  ;;  %v3615_v17 = vpop.f32.mrb[31].mxu0  ;;  %v3686_v41 = vpop.f32.mrb[31].mxu1  ;;  %v5001_v30 = vadd.f32 %v3684_v14, %v6238_v34 }
0x1083   :  { %v4986_v15 = vadd.f32 %v3615_v17, %v6227_v21  ;;  %v5002_v11 = vadd.f32 %v3686_v41, %v6233_v32 }
0x1084   :  { %v3782_v49 = vmul.f32 -1.442695, %v4985_v8 }
0x1085   :  { %v3783_v33 = vmul.f32 -1.442695, %v4986_v15  ;;  %v3784_v57 = vmul.f32 -1.442695, %v5002_v11 }
0x1086   :  { %5314 = vpow2.f32 %v3782_v49 }
0x1087   :  { %5316 = vpow2.f32 %v3783_v33 }
0x1088   :  { %5318 = vpow2.f32 %v3784_v57 }
0x1089   :  { %5320 = vtanh.f32 %v5001_v30 }
0x1090   :  { %v5315_v59 = vpop.eup %5314 }
0x1091   :  { %v5317_v25 = vpop.eup %5316  ;;  %v3696_v20 = vadd.f32 1.0, %v5315_v59 }
0x1092   :  { %v3702_v28 = vadd.f32 1.0, %v5317_v25  ;;  %v5319_v45 = vpop.eup %5318 }
0x1093   :  { %5322 = vrcp.f32 %v3696_v20  ;;  %v5321_v50 = vpop.eup %5320  ;;  %v3709_v13 = vadd.f32 1.0, %v5319_v45 }
0x1094   :  { %5324 = vrcp.f32 %v3702_v28 }
0x1095   :  { %5326 = vrcp.f32 %v3709_v13 }
0x109d   :  { %v5323_v21 = vpop.eup %5322 }
0x109e   :  { %v5325_v56 = vpop.eup %5324  ;;  %v3713_v60 = vmul.f32 %v5323_v21, %v5321_v50 }
0x109f   :  { %v3712_v43 = vmul.f32 %v5325_v56, %v3539_v63  ;;  %v5327_v32 = vpop.eup %5326 }
0x10a1   :  { %v3714_v19 = vadd.f32 %v3713_v60, %v3712_v43 }
0x10a3   :  { %5328 = vtanh.f32 %v3714_v19  ;;  %3786 = vst [vmem:[%s6534_s9 + $0x8] sm:$0xff] %v3714_v19 }
0x10ad   :  { %v5329_v34 = vpop.eup %5328 }
0x10ae   :  { %v3716_v51 = vmul.f32 %v5329_v34, %v5327_v32 }
0x10b0   :  { %3717 = vst [vmem:[%s6532_s7 + $0x38] sm:$0xff] %v3716_v51  ;;  %3785 = vst [vmem:[%s6533_s8 + $0x8] sm:$0xff] %v3716_v51 }
0x10b1   :  { %3734 = vsyncpa [#allocation5], 1 }
0x10b2   :  { %3735 = vsyncpa [#allocation7], 1 }
0x10b3   :  { %3736 = vsyncpa [#allocation10], 1 }

</bundles_post_ra>
